<compile_context>
chip_gen: v6e
topology: v6e:2x2x1
jax: 0.10.0
libtpu: 0.0.40
codegen_flags: <defaults>
</compile_context>

<pallas_src>
import jax
import jax.numpy as jnp
import numpy as np
from jax.experimental import pallas as pl
from jax.experimental.pallas import tpu as pltpu


def _round_up(x, m):
    return (x + m - 1) // m * m


def _make_basic_block_kernel(TH, W, Cp):
    """Kernel for one (batch, row-tile) grid step; channels padded to Cp (k*128)."""

    def kernel(xp_ref, w1_ref, w2_ref, b1_ref, b2_ref, o_ref, mid_ref):
        # xp_ref : (1, H+4, W+2, Cp) bf16  whole padded image (2-row halo, 1-col pad)
        # w1_ref : (3, 3, Cp, Cp)    bf16  conv1 weights (HWIO), BN1 scale folded in
        # w2_ref : (3, 3, Cp, Cp)    bf16  conv2 weights (HWIO), BN2 scale folded in
        # b*_ref : (1, Cp)           f32   folded BN biases
        # o_ref  : (1, TH, W, Cp)    f32   output row tile (lane-dense last dim)
        # mid_ref: (TH+2, W+2, Cp)   bf16  conv1 output (+ halo rows, zero border)
        t = pl.program_id(1)
        row0 = pl.multiple_of(t * TH, TH)

        # Rows [row0, row0+TH+4) of the padded input cover the receptive field of
        # this tile's TH output rows through both 3x3 convs (halo-of-halo).
        x_tile = xp_ref[0, pl.ds(row0, TH + 4), :, :]          # (TH+4, W+2, Cp)

        # ---- conv1 (+ folded BN1 scale) over TH+2 rows: 9 shifted bf16 matmuls.
        # Reshapes only collapse leading dims (W % 8 == 0, Cp % 128 == 0) -> free.
        acc1 = jnp.zeros(((TH + 2) * W, Cp), jnp.float32)
        for kh in range(3):
            for kw in range(3):
                patch = x_tile[kh:kh + TH + 2, kw:kw + W, :].reshape((TH + 2) * W, Cp)
                acc1 += jnp.dot(patch, w1_ref[kh, kw],
                                preferred_element_type=jnp.float32)

        # bn1 bias + relu -> interior of the padded mid scratch (bf16).
        out1 = jnp.maximum(acc1 + b1_ref[...], 0.0).astype(jnp.bfloat16)
        mid_ref[:, 1:W + 1, :] = out1.reshape(TH + 2, W, Cp)

        # Zero only the 1-pixel border (never the interior, which is fully
        # overwritten above): columns every step, halo rows only at the edges.
        zcol = jnp.zeros((TH + 2, 1, Cp), jnp.bfloat16)
        mid_ref[:, 0:1, :] = zcol
        mid_ref[:, W + 1:W + 2, :] = zcol
        zrow = jnp.zeros((1, W + 2, Cp), jnp.bfloat16)

        @pl.when(t == 0)
        def _():
            mid_ref[0:1, :, :] = zrow

        @pl.when(t == pl.num_programs(1) - 1)
        def _():
            mid_ref[TH + 1:TH + 2, :, :] = zrow

        # ---- conv2 (+ folded BN2 scale) over the TH output rows ----
        acc2 = jnp.zeros((TH * W, Cp), jnp.float32)
        for kh in range(3):
            for kw in range(3):
                patch = mid_ref[kh:kh + TH, kw:kw + W, :].reshape(TH * W, Cp)
                acc2 += jnp.dot(patch, w2_ref[kh, kw],
                                preferred_element_type=jnp.float32)

        # bn2 bias + identity residual + relu (residual read from the resident
        # padded image -> no extra HBM traffic for a second x copy).
        residual = x_tile[2:TH + 2, 1:W + 1, :].reshape(TH * W, Cp).astype(jnp.float32)
        out = jnp.maximum(acc2 + b2_ref[...] + residual, 0.0)
        o_ref[0, :, :, :] = out.reshape(TH, W, Cp)

    return kernel


def basic_block_forward(x_nchw, w1_oihw, w2_oihw,
                        g1, beta1, m1, v1, g2, beta2, m2, v2,
                        eps=1e-5, tile_h=8):
    """Pallas BasicBlock.forward (stride=1, dilation=1, no downsample), eval-mode BN."""
    N, C, H, W = x_nchw.shape
    Cp = _round_up(C, 128)                      # lane-dense channel dim
    TH = tile_h if H % tile_h == 0 else H       # output rows per grid step
    n_th = H // TH

    # ---- fold BN (running stats): scale into the conv weights, keep only bias ----
    s1 = g1 / jnp.sqrt(v1 + eps)
    b1 = beta1 - m1 * s1
    s2 = g2 / jnp.sqrt(v2 + eps)
    b2 = beta2 - m2 * s2
    w1 = jnp.transpose(w1_oihw * s1[:, None, None, None], (2, 3, 1, 0))   # OIHW -> HWIO
    w2 = jnp.transpose(w2_oihw * s2[:, None, None, None], (2, 3, 1, 0))
    w1 = jnp.pad(w1, ((0, 0), (0, 0), (0, Cp - C), (0, Cp - C))).astype(jnp.bfloat16)
    w2 = jnp.pad(w2, ((0, 0), (0, 0), (0, Cp - C), (0, Cp - C))).astype(jnp.bfloat16)
    b1 = jnp.pad(b1, (0, Cp - C)).reshape(1, Cp).astype(jnp.float32)
    b2 = jnp.pad(b2, (0, Cp - C)).reshape(1, Cp).astype(jnp.float32)

    # ---- activations: NCHW -> NHWC, bf16, pad (2-row halo, 1 col, channels->Cp) ----
    x = jnp.transpose(x_nchw, (0, 2, 3, 1)).astype(jnp.bfloat16)
    xp = jnp.pad(x, ((0, 0), (2, 2), (1, 1), (0, Cp - C)))

    kernel = _make_basic_block_kernel(TH, W, Cp)

    out_nhwc = pl.pallas_call(
        kernel,
        out_shape=jax.ShapeDtypeStruct((N, H, W, Cp), jnp.float32),
        grid_spec=pltpu.PrefetchScalarGridSpec(
            num_scalar_prefetch=0,
            grid=(N, n_th),
            in_specs=[
                # Whole padded image per batch element; block index is constant in t,
                # so it is DMA'd once per image and stays VMEM-resident across row tiles.
                pl.BlockSpec((1, H + 4, W + 2, Cp), lambda n, t: (n, 0, 0, 0)),
                # Weights / biases: constant index map -> fetched once, stay resident.
                pl.BlockSpec((3, 3, Cp, Cp), lambda n, t: (0, 0, 0, 0)),
                pl.BlockSpec((3, 3, Cp, Cp), lambda n, t: (0, 0, 0, 0)),
                pl.BlockSpec((1, Cp), lambda n, t: (0, 0)),
                pl.BlockSpec((1, Cp), lambda n, t: (0, 0)),
            ],
            out_specs=pl.BlockSpec((1, TH, W, Cp), lambda n, t: (n, t, 0, 0)),
            scratch_shapes=[pltpu.VMEM((TH + 2, W + 2, Cp), jnp.bfloat16)],
        ),
        compiler_params=pltpu.CompilerParams(
            dimension_semantics=("parallel", "parallel")),
    )(xp, w1, w2, b1, b2)

    out = out_nhwc[:, :, :, :C]                       # drop channel padding
    return jnp.transpose(out, (0, 3, 1, 2)).astype(x_nchw.dtype)   # back to NCHW


def _reference_forward(x, w1, w2, g1, beta1, m1, v1, g2, beta2, m2, v2, eps=1e-5):
    """Plain-JAX f32 reference matching PyTorch eval-mode BasicBlock."""
    def conv(z, w):
        return jax.lax.conv_general_dilated(
            z, w, window_strides=(1, 1), padding=((1, 1), (1, 1)),
            dimension_numbers=('NCHW', 'OIHW', 'NCHW'))

    def bn(z, g, b, m, v):
        sh = (1, -1, 1, 1)
        return (z - m.reshape(sh)) / jnp.sqrt(v.reshape(sh) + eps) \
            * g.reshape(sh) + b.reshape(sh)

    out = jax.nn.relu(bn(conv(x, w1), g1, beta1, m1, v1))
    out = bn(conv(out, w2), g2, beta2, m2, v2)
    return jax.nn.relu(out + x)


if __name__ == "__main__":
    # Small deterministic example: inplanes = planes = 8, 16x16 spatial, batch 2.
    N, C, H, W = 2, 8, 16, 16
    key = jax.random.PRNGKey(0)
    keys = jax.random.split(key, 8)

    x = jax.random.normal(keys[0], (N, C, H, W), dtype=jnp.float32)
    w1 = jax.random.normal(keys[1], (C, C, 3, 3), dtype=jnp.float32) * 0.1
    w2 = jax.random.normal(keys[2], (C, C, 3, 3), dtype=jnp.float32) * 0.1

    # Deterministic (non-trivial) BN params / running stats.
    g1 = 1.0 + 0.1 * jax.random.normal(keys[3], (C,), dtype=jnp.float32)
    beta1 = 0.1 * jax.random.normal(keys[4], (C,), dtype=jnp.float32)
    m1 = 0.05 * jnp.arange(C, dtype=jnp.float32)
    v1 = 1.0 + 0.02 * jnp.arange(C, dtype=jnp.float32)
    g2 = 1.0 + 0.1 * jax.random.normal(keys[5], (C,), dtype=jnp.float32)
    beta2 = 0.1 * jax.random.normal(keys[6], (C,), dtype=jnp.float32)
    m2 = -0.03 * jnp.arange(C, dtype=jnp.float32)
    v2 = 1.0 + 0.01 * jnp.arange(C, dtype=jnp.float32)

    out = basic_block_forward(x, w1, w2, g1, beta1, m1, v1, g2, beta2, m2, v2)
    out = jax.block_until_ready(out)

    ref = _reference_forward(x, w1, w2, g1, beta1, m1, v1, g2, beta2, m2, v2)
    # Kernel runs its matmuls / residual in bf16 (f32 accumulation) -> loose tolerance.
    np.testing.assert_allclose(np.asarray(out), np.asarray(ref),
                               rtol=5e-2, atol=5e-2)
    print("KERNEL_OK")
</pallas_src>

<mosaic_0001>
module attributes {stable_mosaic.version = 11 : i64} {
  func.func @kernel(%arg0: i32, %arg1: i32, %arg2: memref<1x20x18x128xbf16, #tpu.memory_space<vmem>>, %arg3: memref<3x3x128x128xbf16, #tpu.memory_space<vmem>>, %arg4: memref<3x3x128x128xbf16, #tpu.memory_space<vmem>>, %arg5: memref<1x128xf32, #tpu.memory_space<vmem>>, %arg6: memref<1x128xf32, #tpu.memory_space<vmem>>, %arg7: memref<1x8x16x128xf32, #tpu.memory_space<vmem>>, %arg8: memref<10x18x128xbf16, #tpu.memory_space<vmem>>) attributes {dimension_semantics = [#tpu.dimension_semantics<parallel>, #tpu.dimension_semantics<parallel>], iteration_bounds = array<i64: 2, 2>, scalar_prefetch = 0 : i64, scratch_operands = 1 : i64, tpu.core_type = #tpu.core_type<tc>, window_params = [{transform_indices = @transform_0, window_bounds = array<i64: 1, 20, 18, 128>}, {pipeline_mode = #tpu.pipeline_mode<synchronous>, transform_indices = @transform_1, window_bounds = array<i64: 3, 3, 128, 128>}, {pipeline_mode = #tpu.pipeline_mode<synchronous>, transform_indices = @transform_2, window_bounds = array<i64: 3, 3, 128, 128>}, {pipeline_mode = #tpu.pipeline_mode<synchronous>, transform_indices = @transform_3, window_bounds = array<i64: 1, 128>}, {pipeline_mode = #tpu.pipeline_mode<synchronous>, transform_indices = @transform_4, window_bounds = array<i64: 1, 128>}, {transform_indices = @transform_5, window_bounds = array<i64: 1, 8, 16, 128>}]} {
    %c8_i32 = arith.constant 8 : i32
    %0 = arith.muli %arg1, %c8_i32 : i32
    %1 = tpu.assume_multiple %0, 8 : i32
    %c0 = arith.constant 0 : index
    %2 = arith.index_cast %1 : i32 to index
    %c0_0 = arith.constant 0 : index
    %c0_1 = arith.constant 0 : index
    %3 = vector.load %arg2[%c0, %2, %c0_0, %c0_1] : memref<1x20x18x128xbf16, #tpu.memory_space<vmem>>, vector<1x12x18x128xbf16>
    %4 = vector.shape_cast %3 : vector<1x12x18x128xbf16> to vector<12x18x128xbf16>
    %cst = arith.constant 0.000000e+00 : f32
    %5 = vector.broadcast %cst : f32 to vector<160x128xf32>
    %6 = vector.extract_strided_slice %4 {offsets = [0, 0, 0], sizes = [10, 16, 128], strides = [1, 1, 1]} : vector<12x18x128xbf16> to vector<10x16x128xbf16>
    %7 = vector.shape_cast %6 : vector<10x16x128xbf16> to vector<160x128xbf16>
    %c0_2 = arith.constant 0 : index
    %c0_3 = arith.constant 0 : index
    %c0_4 = arith.constant 0 : index
    %c0_5 = arith.constant 0 : index
    %8 = vector.load %arg3[%c0_2, %c0_3, %c0_4, %c0_5] : memref<3x3x128x128xbf16, #tpu.memory_space<vmem>>, vector<1x1x128x128xbf16>
    %9 = vector.shape_cast %8 : vector<1x1x128x128xbf16> to vector<128x128xbf16>
    %cst_6 = arith.constant dense<0.000000e+00> : vector<160x128xf32>
    %10 = tpu.matmul %7, %9, %cst_6 {dimension_numbers = #tpu.dot_dimension_numbers<[1], [0], [0], [1], [0, 0, 1, 1], [], []>} : vector<160x128xbf16>, vector<128x128xbf16>, vector<160x128xf32> -> vector<160x128xf32>
    %11 = arith.addf %5, %10 : vector<160x128xf32>
    %12 = vector.extract_strided_slice %4 {offsets = [0, 1, 0], sizes = [10, 16, 128], strides = [1, 1, 1]} : vector<12x18x128xbf16> to vector<10x16x128xbf16>
    %13 = vector.shape_cast %12 : vector<10x16x128xbf16> to vector<160x128xbf16>
    %c0_7 = arith.constant 0 : index
    %c1 = arith.constant 1 : index
    %c0_8 = arith.constant 0 : index
    %c0_9 = arith.constant 0 : index
    %14 = vector.load %arg3[%c0_7, %c1, %c0_8, %c0_9] : memref<3x3x128x128xbf16, #tpu.memory_space<vmem>>, vector<1x1x128x128xbf16>
    %15 = vector.shape_cast %14 : vector<1x1x128x128xbf16> to vector<128x128xbf16>
    %cst_10 = arith.constant dense<0.000000e+00> : vector<160x128xf32>
    %16 = tpu.matmul %13, %15, %cst_10 {dimension_numbers = #tpu.dot_dimension_numbers<[1], [0], [0], [1], [0, 0, 1, 1], [], []>} : vector<160x128xbf16>, vector<128x128xbf16>, vector<160x128xf32> -> vector<160x128xf32>
    %17 = arith.addf %11, %16 : vector<160x128xf32>
    %18 = vector.extract_strided_slice %4 {offsets = [0, 2, 0], sizes = [10, 16, 128], strides = [1, 1, 1]} : vector<12x18x128xbf16> to vector<10x16x128xbf16>
    %19 = vector.shape_cast %18 : vector<10x16x128xbf16> to vector<160x128xbf16>
    %c0_11 = arith.constant 0 : index
    %c2 = arith.constant 2 : index
    %c0_12 = arith.constant 0 : index
    %c0_13 = arith.constant 0 : index
    %20 = vector.load %arg3[%c0_11, %c2, %c0_12, %c0_13] : memref<3x3x128x128xbf16, #tpu.memory_space<vmem>>, vector<1x1x128x128xbf16>
    %21 = vector.shape_cast %20 : vector<1x1x128x128xbf16> to vector<128x128xbf16>
    %cst_14 = arith.constant dense<0.000000e+00> : vector<160x128xf32>
    %22 = tpu.matmul %19, %21, %cst_14 {dimension_numbers = #tpu.dot_dimension_numbers<[1], [0], [0], [1], [0, 0, 1, 1], [], []>} : vector<160x128xbf16>, vector<128x128xbf16>, vector<160x128xf32> -> vector<160x128xf32>
    %23 = arith.addf %17, %22 : vector<160x128xf32>
    %24 = vector.extract_strided_slice %4 {offsets = [1, 0, 0], sizes = [10, 16, 128], strides = [1, 1, 1]} : vector<12x18x128xbf16> to vector<10x16x128xbf16>
    %25 = vector.shape_cast %24 : vector<10x16x128xbf16> to vector<160x128xbf16>
    %c1_15 = arith.constant 1 : index
    %c0_16 = arith.constant 0 : index
    %c0_17 = arith.constant 0 : index
    %c0_18 = arith.constant 0 : index
    %26 = vector.load %arg3[%c1_15, %c0_16, %c0_17, %c0_18] : memref<3x3x128x128xbf16, #tpu.memory_space<vmem>>, vector<1x1x128x128xbf16>
    %27 = vector.shape_cast %26 : vector<1x1x128x128xbf16> to vector<128x128xbf16>
    %cst_19 = arith.constant dense<0.000000e+00> : vector<160x128xf32>
    %28 = tpu.matmul %25, %27, %cst_19 {dimension_numbers = #tpu.dot_dimension_numbers<[1], [0], [0], [1], [0, 0, 1, 1], [], []>} : vector<160x128xbf16>, vector<128x128xbf16>, vector<160x128xf32> -> vector<160x128xf32>
    %29 = arith.addf %23, %28 : vector<160x128xf32>
    %30 = vector.extract_strided_slice %4 {offsets = [1, 1, 0], sizes = [10, 16, 128], strides = [1, 1, 1]} : vector<12x18x128xbf16> to vector<10x16x128xbf16>
    %31 = vector.shape_cast %30 : vector<10x16x128xbf16> to vector<160x128xbf16>
    %c1_20 = arith.constant 1 : index
    %c1_21 = arith.constant 1 : index
    %c0_22 = arith.constant 0 : index
    %c0_23 = arith.constant 0 : index
    %32 = vector.load %arg3[%c1_20, %c1_21, %c0_22, %c0_23] : memref<3x3x128x128xbf16, #tpu.memory_space<vmem>>, vector<1x1x128x128xbf16>
    %33 = vector.shape_cast %32 : vector<1x1x128x128xbf16> to vector<128x128xbf16>
    %cst_24 = arith.constant dense<0.000000e+00> : vector<160x128xf32>
    %34 = tpu.matmul %31, %33, %cst_24 {dimension_numbers = #tpu.dot_dimension_numbers<[1], [0], [0], [1], [0, 0, 1, 1], [], []>} : vector<160x128xbf16>, vector<128x128xbf16>, vector<160x128xf32> -> vector<160x128xf32>
    %35 = arith.addf %29, %34 : vector<160x128xf32>
    %36 = vector.extract_strided_slice %4 {offsets = [1, 2, 0], sizes = [10, 16, 128], strides = [1, 1, 1]} : vector<12x18x128xbf16> to vector<10x16x128xbf16>
    %37 = vector.shape_cast %36 : vector<10x16x128xbf16> to vector<160x128xbf16>
    %c1_25 = arith.constant 1 : index
    %c2_26 = arith.constant 2 : index
    %c0_27 = arith.constant 0 : index
    %c0_28 = arith.constant 0 : index
    %38 = vector.load %arg3[%c1_25, %c2_26, %c0_27, %c0_28] : memref<3x3x128x128xbf16, #tpu.memory_space<vmem>>, vector<1x1x128x128xbf16>
    %39 = vector.shape_cast %38 : vector<1x1x128x128xbf16> to vector<128x128xbf16>
    %cst_29 = arith.constant dense<0.000000e+00> : vector<160x128xf32>
    %40 = tpu.matmul %37, %39, %cst_29 {dimension_numbers = #tpu.dot_dimension_numbers<[1], [0], [0], [1], [0, 0, 1, 1], [], []>} : vector<160x128xbf16>, vector<128x128xbf16>, vector<160x128xf32> -> vector<160x128xf32>
    %41 = arith.addf %35, %40 : vector<160x128xf32>
    %42 = vector.extract_strided_slice %4 {offsets = [2, 0, 0], sizes = [10, 16, 128], strides = [1, 1, 1]} : vector<12x18x128xbf16> to vector<10x16x128xbf16>
    %43 = vector.shape_cast %42 : vector<10x16x128xbf16> to vector<160x128xbf16>
    %c2_30 = arith.constant 2 : index
    %c0_31 = arith.constant 0 : index
    %c0_32 = arith.constant 0 : index
    %c0_33 = arith.constant 0 : index
    %44 = vector.load %arg3[%c2_30, %c0_31, %c0_32, %c0_33] : memref<3x3x128x128xbf16, #tpu.memory_space<vmem>>, vector<1x1x128x128xbf16>
    %45 = vector.shape_cast %44 : vector<1x1x128x128xbf16> to vector<128x128xbf16>
    %cst_34 = arith.constant dense<0.000000e+00> : vector<160x128xf32>
    %46 = tpu.matmul %43, %45, %cst_34 {dimension_numbers = #tpu.dot_dimension_numbers<[1], [0], [0], [1], [0, 0, 1, 1], [], []>} : vector<160x128xbf16>, vector<128x128xbf16>, vector<160x128xf32> -> vector<160x128xf32>
    %47 = arith.addf %41, %46 : vector<160x128xf32>
    %48 = vector.extract_strided_slice %4 {offsets = [2, 1, 0], sizes = [10, 16, 128], strides = [1, 1, 1]} : vector<12x18x128xbf16> to vector<10x16x128xbf16>
    %49 = vector.shape_cast %48 : vector<10x16x128xbf16> to vector<160x128xbf16>
    %c2_35 = arith.constant 2 : index
    %c1_36 = arith.constant 1 : index
    %c0_37 = arith.constant 0 : index
    %c0_38 = arith.constant 0 : index
    %50 = vector.load %arg3[%c2_35, %c1_36, %c0_37, %c0_38] : memref<3x3x128x128xbf16, #tpu.memory_space<vmem>>, vector<1x1x128x128xbf16>
    %51 = vector.shape_cast %50 : vector<1x1x128x128xbf16> to vector<128x128xbf16>
    %cst_39 = arith.constant dense<0.000000e+00> : vector<160x128xf32>
    %52 = tpu.matmul %49, %51, %cst_39 {dimension_numbers = #tpu.dot_dimension_numbers<[1], [0], [0], [1], [0, 0, 1, 1], [], []>} : vector<160x128xbf16>, vector<128x128xbf16>, vector<160x128xf32> -> vector<160x128xf32>
    %53 = arith.addf %47, %52 : vector<160x128xf32>
    %54 = vector.extract_strided_slice %4 {offsets = [2, 2, 0], sizes = [10, 16, 128], strides = [1, 1, 1]} : vector<12x18x128xbf16> to vector<10x16x128xbf16>
    %55 = vector.shape_cast %54 : vector<10x16x128xbf16> to vector<160x128xbf16>
    %c2_40 = arith.constant 2 : index
    %c2_41 = arith.constant 2 : index
    %c0_42 = arith.constant 0 : index
    %c0_43 = arith.constant 0 : index
    %56 = vector.load %arg3[%c2_40, %c2_41, %c0_42, %c0_43] : memref<3x3x128x128xbf16, #tpu.memory_space<vmem>>, vector<1x1x128x128xbf16>
    %57 = vector.shape_cast %56 : vector<1x1x128x128xbf16> to vector<128x128xbf16>
    %cst_44 = arith.constant dense<0.000000e+00> : vector<160x128xf32>
    %58 = tpu.matmul %55, %57, %cst_44 {dimension_numbers = #tpu.dot_dimension_numbers<[1], [0], [0], [1], [0, 0, 1, 1], [], []>} : vector<160x128xbf16>, vector<128x128xbf16>, vector<160x128xf32> -> vector<160x128xf32>
    %59 = arith.addf %53, %58 : vector<160x128xf32>
    %c0_45 = arith.constant 0 : index
    %c0_46 = arith.constant 0 : index
    %60 = vector.load %arg5[%c0_45, %c0_46] : memref<1x128xf32, #tpu.memory_space<vmem>>, vector<1x128xf32>
    %61 = vector.broadcast %60 : vector<1x128xf32> to vector<160x128xf32>
    %62 = arith.addf %59, %61 : vector<160x128xf32>
    %cst_47 = arith.constant 0.000000e+00 : f32
    %63 = vector.broadcast %cst_47 : f32 to vector<160x128xf32>
    %64 = arith.maximumf %62, %63 : vector<160x128xf32>
    %65 = arith.truncf %64 : vector<160x128xf32> to vector<160x128xbf16>
    %66 = vector.shape_cast %65 : vector<160x128xbf16> to vector<10x16x128xbf16>
    %c0_48 = arith.constant 0 : index
    %c1_49 = arith.constant 1 : index
    %c0_50 = arith.constant 0 : index
    %67 = vector.load %arg8[%c0_48, %c1_49, %c0_50] : memref<10x18x128xbf16, #tpu.memory_space<vmem>>, vector<10x16x128xbf16>
    tpu.vector_store %arg8[%c0_48, %c1_49, %c0_50], %66 {strides = array<i32>} : memref<10x18x128xbf16, #tpu.memory_space<vmem>>, vector<10x16x128xbf16>,
    %cst_51 = arith.constant 0.000000e+00 : bf16
    %68 = vector.broadcast %cst_51 : bf16 to vector<10x1x128xbf16>
    %c0_52 = arith.constant 0 : index
    %c0_53 = arith.constant 0 : index
    %c0_54 = arith.constant 0 : index
    %69 = vector.load %arg8[%c0_52, %c0_53, %c0_54] : memref<10x18x128xbf16, #tpu.memory_space<vmem>>, vector<10x1x128xbf16>
    tpu.vector_store %arg8[%c0_52, %c0_53, %c0_54], %68 {strides = array<i32>} : memref<10x18x128xbf16, #tpu.memory_space<vmem>>, vector<10x1x128xbf16>,
    %c0_55 = arith.constant 0 : index
    %c17 = arith.constant 17 : index
    %c0_56 = arith.constant 0 : index
    %70 = vector.load %arg8[%c0_55, %c17, %c0_56] : memref<10x18x128xbf16, #tpu.memory_space<vmem>>, vector<10x1x128xbf16>
    tpu.vector_store %arg8[%c0_55, %c17, %c0_56], %68 {strides = array<i32>} : memref<10x18x128xbf16, #tpu.memory_space<vmem>>, vector<10x1x128xbf16>,
    %cst_57 = arith.constant 0.000000e+00 : bf16
    %71 = vector.broadcast %cst_57 : bf16 to vector<1x18x128xbf16>
    %c0_i32 = arith.constant 0 : i32
    %72 = arith.cmpi eq, %arg1, %c0_i32 : i32
    %73 = arith.extui %72 : i1 to i32
    %c0_i32_58 = arith.constant 0 : i32
    %74 = arith.cmpi ne, %73, %c0_i32_58 : i32
    scf.if %74 {
      %c0_140 = arith.constant 0 : index
      %c0_141 = arith.constant 0 : index
      %c0_142 = arith.constant 0 : index
      %146 = vector.load %arg8[%c0_140, %c0_141, %c0_142] : memref<10x18x128xbf16, #tpu.memory_space<vmem>>, vector<1x18x128xbf16>
      tpu.vector_store %arg8[%c0_140, %c0_141, %c0_142], %71 {strides = array<i32>} : memref<10x18x128xbf16, #tpu.memory_space<vmem>>, vector<1x18x128xbf16>,
    } else {
    }
    %c1_i32 = arith.constant 1 : i32
    %75 = arith.cmpi eq, %arg1, %c1_i32 : i32
    %76 = arith.extui %75 : i1 to i32
    %c0_i32_59 = arith.constant 0 : i32
    %77 = arith.cmpi ne, %76, %c0_i32_59 : i32
    scf.if %77 {
      %c9 = arith.constant 9 : index
      %c0_140 = arith.constant 0 : index
      %c0_141 = arith.constant 0 : index
      %146 = vector.load %arg8[%c9, %c0_140, %c0_141] : memref<10x18x128xbf16, #tpu.memory_space<vmem>>, vector<1x18x128xbf16>
      tpu.vector_store %arg8[%c9, %c0_140, %c0_141], %71 {strides = array<i32>} : memref<10x18x128xbf16, #tpu.memory_space<vmem>>, vector<1x18x128xbf16>,
    } else {
    }
    %cst_60 = arith.constant 0.000000e+00 : f32
    %78 = vector.broadcast %cst_60 : f32 to vector<128x128xf32>
    %c0_61 = arith.constant 0 : index
    %c0_62 = arith.constant 0 : index
    %c0_63 = arith.constant 0 : index
    %79 = vector.load %arg8[%c0_61, %c0_62, %c0_63] : memref<10x18x128xbf16, #tpu.memory_space<vmem>>, vector<8x16x128xbf16>
    %80 = vector.shape_cast %79 : vector<8x16x128xbf16> to vector<128x128xbf16>
    %c0_64 = arith.constant 0 : index
    %c0_65 = arith.constant 0 : index
    %c0_66 = arith.constant 0 : index
    %c0_67 = arith.constant 0 : index
    %81 = vector.load %arg4[%c0_64, %c0_65, %c0_66, %c0_67] : memref<3x3x128x128xbf16, #tpu.memory_space<vmem>>, vector<1x1x128x128xbf16>
    %82 = vector.shape_cast %81 : vector<1x1x128x128xbf16> to vector<128x128xbf16>
    %cst_68 = arith.constant dense<0.000000e+00> : vector<128x128xf32>
    %83 = tpu.matmul %80, %82, %cst_68 {dimension_numbers = #tpu.dot_dimension_numbers<[1], [0], [0], [1], [0, 0, 1, 1], [], []>} : vector<128x128xbf16>, vector<128x128xbf16>, vector<128x128xf32> -> vector<128x128xf32>
    %84 = arith.addf %78, %83 : vector<128x128xf32>
    %c0_69 = arith.constant 0 : index
    %c1_70 = arith.constant 1 : index
    %c0_71 = arith.constant 0 : index
    %85 = vector.load %arg8[%c0_69, %c1_70, %c0_71] : memref<10x18x128xbf16, #tpu.memory_space<vmem>>, vector<8x16x128xbf16>
    %86 = vector.shape_cast %85 : vector<8x16x128xbf16> to vector<128x128xbf16>
    %c0_72 = arith.constant 0 : index
    %c1_73 = arith.constant 1 : index
    %c0_74 = arith.constant 0 : index
    %c0_75 = arith.constant 0 : index
    %87 = vector.load %arg4[%c0_72, %c1_73, %c0_74, %c0_75] : memref<3x3x128x128xbf16, #tpu.memory_space<vmem>>, vector<1x1x128x128xbf16>
    %88 = vector.shape_cast %87 : vector<1x1x128x128xbf16> to vector<128x128xbf16>
    %cst_76 = arith.constant dense<0.000000e+00> : vector<128x128xf32>
    %89 = tpu.matmul %86, %88, %cst_76 {dimension_numbers = #tpu.dot_dimension_numbers<[1], [0], [0], [1], [0, 0, 1, 1], [], []>} : vector<128x128xbf16>, vector<128x128xbf16>, vector<128x128xf32> -> vector<128x128xf32>
    %90 = arith.addf %84, %89 : vector<128x128xf32>
    %c0_77 = arith.constant 0 : index
    %c2_78 = arith.constant 2 : index
    %c0_79 = arith.constant 0 : index
    %91 = vector.load %arg8[%c0_77, %c2_78, %c0_79] : memref<10x18x128xbf16, #tpu.memory_space<vmem>>, vector<8x16x128xbf16>
    %92 = vector.shape_cast %91 : vector<8x16x128xbf16> to vector<128x128xbf16>
    %c0_80 = arith.constant 0 : index
    %c2_81 = arith.constant 2 : index
    %c0_82 = arith.constant 0 : index
    %c0_83 = arith.constant 0 : index
    %93 = vector.load %arg4[%c0_80, %c2_81, %c0_82, %c0_83] : memref<3x3x128x128xbf16, #tpu.memory_space<vmem>>, vector<1x1x128x128xbf16>
    %94 = vector.shape_cast %93 : vector<1x1x128x128xbf16> to vector<128x128xbf16>
    %cst_84 = arith.constant dense<0.000000e+00> : vector<128x128xf32>
    %95 = tpu.matmul %92, %94, %cst_84 {dimension_numbers = #tpu.dot_dimension_numbers<[1], [0], [0], [1], [0, 0, 1, 1], [], []>} : vector<128x128xbf16>, vector<128x128xbf16>, vector<128x128xf32> -> vector<128x128xf32>
    %96 = arith.addf %90, %95 : vector<128x128xf32>
    %c1_85 = arith.constant 1 : index
    %c0_86 = arith.constant 0 : index
    %c0_87 = arith.constant 0 : index
    %97 = vector.load %arg8[%c1_85, %c0_86, %c0_87] : memref<10x18x128xbf16, #tpu.memory_space<vmem>>, vector<8x16x128xbf16>
    %98 = vector.shape_cast %97 : vector<8x16x128xbf16> to vector<128x128xbf16>
    %c1_88 = arith.constant 1 : index
    %c0_89 = arith.constant 0 : index
    %c0_90 = arith.constant 0 : index
    %c0_91 = arith.constant 0 : index
    %99 = vector.load %arg4[%c1_88, %c0_89, %c0_90, %c0_91] : memref<3x3x128x128xbf16, #tpu.memory_space<vmem>>, vector<1x1x128x128xbf16>
    %100 = vector.shape_cast %99 : vector<1x1x128x128xbf16> to vector<128x128xbf16>
    %cst_92 = arith.constant dense<0.000000e+00> : vector<128x128xf32>
    %101 = tpu.matmul %98, %100, %cst_92 {dimension_numbers = #tpu.dot_dimension_numbers<[1], [0], [0], [1], [0, 0, 1, 1], [], []>} : vector<128x128xbf16>, vector<128x128xbf16>, vector<128x128xf32> -> vector<128x128xf32>
    %102 = arith.addf %96, %101 : vector<128x128xf32>
    %c1_93 = arith.constant 1 : index
    %c1_94 = arith.constant 1 : index
    %c0_95 = arith.constant 0 : index
    %103 = vector.load %arg8[%c1_93, %c1_94, %c0_95] : memref<10x18x128xbf16, #tpu.memory_space<vmem>>, vector<8x16x128xbf16>
    %104 = vector.shape_cast %103 : vector<8x16x128xbf16> to vector<128x128xbf16>
    %c1_96 = arith.constant 1 : index
    %c1_97 = arith.constant 1 : index
    %c0_98 = arith.constant 0 : index
    %c0_99 = arith.constant 0 : index
    %105 = vector.load %arg4[%c1_96, %c1_97, %c0_98, %c0_99] : memref<3x3x128x128xbf16, #tpu.memory_space<vmem>>, vector<1x1x128x128xbf16>
    %106 = vector.shape_cast %105 : vector<1x1x128x128xbf16> to vector<128x128xbf16>
    %cst_100 = arith.constant dense<0.000000e+00> : vector<128x128xf32>
    %107 = tpu.matmul %104, %106, %cst_100 {dimension_numbers = #tpu.dot_dimension_numbers<[1], [0], [0], [1], [0, 0, 1, 1], [], []>} : vector<128x128xbf16>, vector<128x128xbf16>, vector<128x128xf32> -> vector<128x128xf32>
    %108 = arith.addf %102, %107 : vector<128x128xf32>
    %c1_101 = arith.constant 1 : index
    %c2_102 = arith.constant 2 : index
    %c0_103 = arith.constant 0 : index
    %109 = vector.load %arg8[%c1_101, %c2_102, %c0_103] : memref<10x18x128xbf16, #tpu.memory_space<vmem>>, vector<8x16x128xbf16>
    %110 = vector.shape_cast %109 : vector<8x16x128xbf16> to vector<128x128xbf16>
    %c1_104 = arith.constant 1 : index
    %c2_105 = arith.constant 2 : index
    %c0_106 = arith.constant 0 : index
    %c0_107 = arith.constant 0 : index
    %111 = vector.load %arg4[%c1_104, %c2_105, %c0_106, %c0_107] : memref<3x3x128x128xbf16, #tpu.memory_space<vmem>>, vector<1x1x128x128xbf16>
    %112 = vector.shape_cast %111 : vector<1x1x128x128xbf16> to vector<128x128xbf16>
    %cst_108 = arith.constant dense<0.000000e+00> : vector<128x128xf32>
    %113 = tpu.matmul %110, %112, %cst_108 {dimension_numbers = #tpu.dot_dimension_numbers<[1], [0], [0], [1], [0, 0, 1, 1], [], []>} : vector<128x128xbf16>, vector<128x128xbf16>, vector<128x128xf32> -> vector<128x128xf32>
    %114 = arith.addf %108, %113 : vector<128x128xf32>
    %c2_109 = arith.constant 2 : index
    %c0_110 = arith.constant 0 : index
    %c0_111 = arith.constant 0 : index
    %115 = vector.load %arg8[%c2_109, %c0_110, %c0_111] : memref<10x18x128xbf16, #tpu.memory_space<vmem>>, vector<8x16x128xbf16>
    %116 = vector.shape_cast %115 : vector<8x16x128xbf16> to vector<128x128xbf16>
    %c2_112 = arith.constant 2 : index
    %c0_113 = arith.constant 0 : index
    %c0_114 = arith.constant 0 : index
    %c0_115 = arith.constant 0 : index
    %117 = vector.load %arg4[%c2_112, %c0_113, %c0_114, %c0_115] : memref<3x3x128x128xbf16, #tpu.memory_space<vmem>>, vector<1x1x128x128xbf16>
    %118 = vector.shape_cast %117 : vector<1x1x128x128xbf16> to vector<128x128xbf16>
    %cst_116 = arith.constant dense<0.000000e+00> : vector<128x128xf32>
    %119 = tpu.matmul %116, %118, %cst_116 {dimension_numbers = #tpu.dot_dimension_numbers<[1], [0], [0], [1], [0, 0, 1, 1], [], []>} : vector<128x128xbf16>, vector<128x128xbf16>, vector<128x128xf32> -> vector<128x128xf32>
    %120 = arith.addf %114, %119 : vector<128x128xf32>
    %c2_117 = arith.constant 2 : index
    %c1_118 = arith.constant 1 : index
    %c0_119 = arith.constant 0 : index
    %121 = vector.load %arg8[%c2_117, %c1_118, %c0_119] : memref<10x18x128xbf16, #tpu.memory_space<vmem>>, vector<8x16x128xbf16>
    %122 = vector.shape_cast %121 : vector<8x16x128xbf16> to vector<128x128xbf16>
    %c2_120 = arith.constant 2 : index
    %c1_121 = arith.constant 1 : index
    %c0_122 = arith.constant 0 : index
    %c0_123 = arith.constant 0 : index
    %123 = vector.load %arg4[%c2_120, %c1_121, %c0_122, %c0_123] : memref<3x3x128x128xbf16, #tpu.memory_space<vmem>>, vector<1x1x128x128xbf16>
    %124 = vector.shape_cast %123 : vector<1x1x128x128xbf16> to vector<128x128xbf16>
    %cst_124 = arith.constant dense<0.000000e+00> : vector<128x128xf32>
    %125 = tpu.matmul %122, %124, %cst_124 {dimension_numbers = #tpu.dot_dimension_numbers<[1], [0], [0], [1], [0, 0, 1, 1], [], []>} : vector<128x128xbf16>, vector<128x128xbf16>, vector<128x128xf32> -> vector<128x128xf32>
    %126 = arith.addf %120, %125 : vector<128x128xf32>
    %c2_125 = arith.constant 2 : index
    %c2_126 = arith.constant 2 : index
    %c0_127 = arith.constant 0 : index
    %127 = vector.load %arg8[%c2_125, %c2_126, %c0_127] : memref<10x18x128xbf16, #tpu.memory_space<vmem>>, vector<8x16x128xbf16>
    %128 = vector.shape_cast %127 : vector<8x16x128xbf16> to vector<128x128xbf16>
    %c2_128 = arith.constant 2 : index
    %c2_129 = arith.constant 2 : index
    %c0_130 = arith.constant 0 : index
    %c0_131 = arith.constant 0 : index
    %129 = vector.load %arg4[%c2_128, %c2_129, %c0_130, %c0_131] : memref<3x3x128x128xbf16, #tpu.memory_space<vmem>>, vector<1x1x128x128xbf16>
    %130 = vector.shape_cast %129 : vector<1x1x128x128xbf16> to vector<128x128xbf16>
    %cst_132 = arith.constant dense<0.000000e+00> : vector<128x128xf32>
    %131 = tpu.matmul %128, %130, %cst_132 {dimension_numbers = #tpu.dot_dimension_numbers<[1], [0], [0], [1], [0, 0, 1, 1], [], []>} : vector<128x128xbf16>, vector<128x128xbf16>, vector<128x128xf32> -> vector<128x128xf32>
    %132 = arith.addf %126, %131 : vector<128x128xf32>
    %133 = vector.extract_strided_slice %4 {offsets = [2, 1, 0], sizes = [8, 16, 128], strides = [1, 1, 1]} : vector<12x18x128xbf16> to vector<8x16x128xbf16>
    %134 = vector.shape_cast %133 : vector<8x16x128xbf16> to vector<128x128xbf16>
    %135 = arith.extf %134 : vector<128x128xbf16> to vector<128x128xf32>
    %c0_133 = arith.constant 0 : index
    %c0_134 = arith.constant 0 : index
    %136 = vector.load %arg6[%c0_133, %c0_134] : memref<1x128xf32, #tpu.memory_space<vmem>>, vector<1x128xf32>
    %137 = vector.broadcast %136 : vector<1x128xf32> to vector<128x128xf32>
    %138 = arith.addf %132, %137 : vector<128x128xf32>
    %139 = arith.addf %138, %135 : vector<128x128xf32>
    %cst_135 = arith.constant 0.000000e+00 : f32
    %140 = vector.broadcast %cst_135 : f32 to vector<128x128xf32>
    %141 = arith.maximumf %139, %140 : vector<128x128xf32>
    %142 = vector.shape_cast %141 : vector<128x128xf32> to vector<8x16x128xf32>
    %c0_136 = arith.constant 0 : index
    %c0_137 = arith.constant 0 : index
    %c0_138 = arith.constant 0 : index
    %c0_139 = arith.constant 0 : index
    %143 = vector.load %arg7[%c0_136, %c0_137, %c0_138, %c0_139] : memref<1x8x16x128xf32, #tpu.memory_space<vmem>>, vector<1x8x16x128xf32>
    %144 = vector.shape_cast %143 : vector<1x8x16x128xf32> to vector<8x16x128xf32>
    %145 = vector.shape_cast %142 : vector<8x16x128xf32> to vector<1x8x16x128xf32>
    tpu.vector_store %arg7[%c0_136, %c0_137, %c0_138, %c0_139], %145 {strides = array<i32>} : memref<1x8x16x128xf32, #tpu.memory_space<vmem>>, vector<1x8x16x128xf32>,
    return
  }
  func.func @transform_0(%arg0: i32, %arg1: i32) -> (i32, i32, i32, i32) {
    %c0_i32 = arith.constant 0 : i32
    %c0_i32_0 = arith.constant 0 : i32
    %c0_i32_1 = arith.constant 0 : i32
    %c0_i32_2 = arith.constant 0 : i32
    return %arg0, %c0_i32, %c0_i32_0, %c0_i32_1 : i32, i32, i32, i32
  }
  func.func @transform_1(%arg0: i32, %arg1: i32) -> (i32, i32, i32, i32) {
    %c0_i32 = arith.constant 0 : i32
    %c0_i32_0 = arith.constant 0 : i32
    %c0_i32_1 = arith.constant 0 : i32
    %c0_i32_2 = arith.constant 0 : i32
    %c0_i32_3 = arith.constant 0 : i32
    return %c0_i32, %c0_i32_0, %c0_i32_1, %c0_i32_2 : i32, i32, i32, i32
  }
  func.func @transform_2(%arg0: i32, %arg1: i32) -> (i32, i32, i32, i32) {
    %c0_i32 = arith.constant 0 : i32
    %c0_i32_0 = arith.constant 0 : i32
    %c0_i32_1 = arith.constant 0 : i32
    %c0_i32_2 = arith.constant 0 : i32
    %c0_i32_3 = arith.constant 0 : i32
    return %c0_i32, %c0_i32_0, %c0_i32_1, %c0_i32_2 : i32, i32, i32, i32
  }
  func.func @transform_3(%arg0: i32, %arg1: i32) -> (i32, i32) {
    %c0_i32 = arith.constant 0 : i32
    %c0_i32_0 = arith.constant 0 : i32
    %c0_i32_1 = arith.constant 0 : i32
    return %c0_i32, %c0_i32_0 : i32, i32
  }
  func.func @transform_4(%arg0: i32, %arg1: i32) -> (i32, i32) {
    %c0_i32 = arith.constant 0 : i32
    %c0_i32_0 = arith.constant 0 : i32
    %c0_i32_1 = arith.constant 0 : i32
    return %c0_i32, %c0_i32_0 : i32, i32
  }
  func.func @transform_5(%arg0: i32, %arg1: i32) -> (i32, i32, i32, i32) {
    %c0_i32 = arith.constant 0 : i32
    %c0_i32_0 = arith.constant 0 : i32
    %c0_i32_1 = arith.constant 0 : i32
    return %arg0, %arg1, %c0_i32, %c0_i32_0 : i32, i32, i32, i32
  }
}

</mosaic_0001>

<bundles_post_ra>
// kernel: tpu_custom_call.1
= control target key start
LH: loop header
LB: loop body
LE: loop exit
PB: predicated region body
PF: predicated region fallthrough
CT: control target
= control target key end

     0   :  { %s9999_s0 = inlined_call_operand.vmem [shape: bf16[2,20,18,128], index: 0, kind: input, shape index: {}]   ;;  %s10000_s1 = inlined_call_operand.vmem [shape: bf16[3,3,128,128], index: 1, kind: input, shape index: {}]   ;;  %s10001_s2 = inlined_call_operand.hbm [shape: bf16[3,3,128,128], index: 2, kind: input, shape index: {}]   ;;  %s10002_s3 = inlined_call_operand.vmem [shape: f32[1,128], index: 3, kind: input, shape index: {}]   ;;  %s10003_s4 = inlined_call_operand.vmem [shape: f32[1,128], index: 4, kind: input, shape index: {}]   ;;  %s10004_s5 = inlined_call_operand.hbm [shape: f32[2,16,16,128], index: 5, kind: output, shape index: {}]  }
   0x1   :  { %10032 = sst [smem:[#allocation41_spill]] %s10001_s2 }
   0x2   :  { %10 = vsyncpa [#allocation4], 0 }
   0x3   :  { %11 = vsyncpa [#allocation5], 0 }
   0x4   :  { %13 = vsyncpa [#allocation5 + $0x1], 0  ;;  %s7937_s18 = smov 0   ;;  %s7939_s19 = smov 0  }
   0x5   :  { %s7941_s20 = smov 0   ;;  %s7943_s21 = smov 0  }
   0x6   :  { %s7945_s22 = smov 0   ;;  %s7947_s23 = smov 0  }
   0x7   :  { %s7949_s24 = smov 0   ;;  %s7951_s25 = smov 0  }
   0x8 LB: > { %s6107_s26 = sadd.s32 4294967295, %s7897_s25   ;;  %s6108_s27 = sadd.s32 4294967294, %s7897_s25   ;;  %s7897_s25 = sphi %s7951_s25, %s19_s25   ;;  %s7893_s24 = sphi %s7949_s24, %s10160_s24   ;;  %s7889_s23 = sphi %s7947_s23, %s10159_s23   ;;  %s7885_s22 = sphi %s7945_s22, %s10158_s22   ;;  %s7881_s21 = sphi %s7943_s21, %s10157_s21   ;;  %s7877_s20 = sphi %s7941_s20, %s10156_s20   ;;  %s7873_s19 = sphi %s7939_s19, %s10155_s19   ;;  %s7869_s18 = sphi %s7937_s18, %s10154_s18  }
   0x9   : > { %s28_s28 = sadd.s32 1, %s7889_s23  ;;  %s31_s29 = sadd.s32 1, %s7893_s24 }
   0xa   : > { %p29_p0 = scmp.ge.s32.totalorder %s28_s28, 2  ;;  %s150_s30 = sadd.s32 1, %s7877_s20 }
   0xb   : > { %p160_p1 = scmp.ne.s32.totalorder %s7877_s20, %s7873_s19  ;;  %p161_p2 = scmp.eq.s32.totalorder %s6107_s26, 3 }
   0xc   : > { %s10162_s28 = smov (%p29_p0, %s28_s28), 0  ;;  %s10164_s29 = smov (!%p29_p0, %s31_s29), %s7893_s24 }
   0xd   : > { %s146_s6 = ssub.s32 %s7889_s23, %s10162_s28  ;;  %p7989_p3 = por %p161_p2, %p160_p1 }
   0xe   : > { %p33_p4 = scmp.ge.s32.totalorder %s10164_s29, 2  ;;  %p166_p5 = scmp.ne.s32.totalorder %s7873_s19, %s7869_s18 }
   0xf   : > { %p167_p6 = scmp.eq.s32.totalorder %s6108_s27, 3  ;;  %p6109_p7 = scmp.ge.s32.totalorder %s7897_s25, 1 }
  0x10   : > { %s10166_s29 = smov (%p33_p4, %s10164_s29), 0  ;;  %p174_p9 = scmp.lt.s32.totalorder %s7897_s25, 5 }
  0x11   : > { %p7998_p8 = por %p167_p6, %p166_p5  ;;  %s145_s9 = ssub.s32 %s7893_s24, %s10166_s29 }
  0x12   : > { %s147_s10 = sor.u32 %s146_s6, %s145_s9  ;;  %p8005_p10 = pnand %p6109_p7, %p174_p9 }
  0x13   : > { %p148_p11 = scmp.eq.s32.totalorder %s147_s10, 0  ;;  %p8009_p12 = scmp.eq.s32.totalorder %s6107_s26, 0 }
  0x14   : > { %p7513_p13 = pneg %p8005_p10  ;;  %s7899_s14 = smov [#allocation3]  }
  0x15   : > { %s8016_s13 = scalar_select %p148_p11, %s7877_s20, %s150_s30  }
  0x16   : > { %s189_s15 = sshll.u32 %s7899_s14, 4  ;;  %p8020_p0 = pnand %p8009_p12, %p7513_p13  ;;  %s190_s15 = int_to_ptr.vmem [resolvable:$true] %s189_s15 }
  0x17   : > { %s7786_s17 = scalar_lea.vmem %s190_s15, 9216  ;;  %p7794_p6 = scmp.lt.s32.totalorder %s190_s15, %s190_s15 }
  0x18   : > { %p7777_p1 = pneg %p8020_p0  ;;  %p7787_p2 = scmp.ne.s32.totalorder %s190_s15, %s7786_s17 }
  0x19   : > { %p7795_p7 = scmp.lt.s32.totalorder %s7786_s17, %s7786_s17 }
  0x1a   : > { %p7789_p4 = pnand %p7787_p2, %p7777_p1 }
  0x1b   : > { %p7796_p9 = por %p7795_p7, %p7794_p6 }
  0x1c   : > { %p7790_p5 = pneg %p7789_p4 }
  0x1e   : > { %p7797_p11 = pnand %p7796_p9, %p7790_p5 }
  0x20   : > { %7800 = shalt.err (!%p7797_p11)
}
  0x21   : > { %s7900_s26 = smov 64   ;;  %s7901_s27 = smov 4  }
  0x22   : > { %s10038_s2 = sld [smem:[#allocation41_spill]] }
  0x24   : > { %219 = sbr.rel (%p8005_p10) target bundleno = 932 (0x3a4), region = 40 }
  0x28   : > { %7516 = dma.hbm_to_vmem [thread:$0]  (!%p8020_p0), %s10038_s2, 9216, %s190_s15, [#allocation4], %s7900_s26, %s7900_s26, %s7901_s27  }
  0x29   : > { %7860 = dma.done.wait (%p8009_p12), [#allocation4], 9216  }
  0x2a   : > { %7862 = vsyncadd (%p8009_p12), [#allocation4], 4294958080  ;;  %s10005_s9 = sand.u32 1, %s7873_s19   ;;  %p247_p13 = scmp.lt.s32.totalorder %s7885_s22, 1  ;;  %v7595_v0 = vld [vmem:[%s10000_s1 + $0x78] sm:$0xff]   ;;  %v7597_v2 = vld [vmem:[%s10000_s1 + $0x70] sm:$0xff]  }
  0x2b   : > { %s8040_s10 = sshll.u32 %s10005_s9, 7  ;;  %v7596_v1 = vld [vmem:[%s10000_s1 + $0x38] sm:$0xff]   ;;  %6894 = vmatprep.subr.bf16.mxu0 %v7595_v0  ;;  %v7598_v3 = vld [vmem:[%s10000_s1 + $0x30] sm:$0xff]   ;;  %v7599_v4 = vld [vmem:[%s10000_s1 + $0x68] sm:$0xff]   ;;  %s6566_s6 = smul.u32 96, %s7881_s21  ;;  %v10039_v39 = vmov 0 }
  0x2c   : > { %s248_s26 = scalar_select %p247_p13, %s7885_s22, 1  ;;  %6930 = vmatprep.subr.bf16.mxu1 %v7596_v1  ;;  %6895 = vmatpush3.bf16.msra.mxu0 %v7595_v0  ;;  %v7600_v5 = vld [vmem:[%s10000_s1 + $0x28] sm:$0xff]   ;;  %v7601_v6 = vld [vmem:[%s10000_s1 + $0x60] sm:$0xff]   ;;  %vm310_vm0 = vsmask.f32 3328  ;;  %v7603_v8 = vld [vmem:[%s10000_s1 + $0x58] sm:$0xff]  }
  0x2d   : > { %6931 = vmatpush3.bf16.msra.mxu1 %v7596_v1  ;;  %6896 = vmatprep.subr.bf16.mxu0 %v7597_v2  ;;  %v7602_v7 = vld [vmem:[%s10000_s1 + $0x20] sm:$0xff]   ;;  %vm311_vm1 = vsmask.f32 7440  ;;  %v7604_v9 = vld [vmem:[%s10000_s1 + $0x18] sm:$0xff]   ;;  %v7605_v10 = vld [vmem:[%s10000_s1 + $0x50] sm:$0xff]   ;;  %vm1002_vm3 = vcmask 1042432  }
  0x2e   : > { %6932 = vmatprep.subr.bf16.mxu1 %v7598_v3  ;;  %s7506_s16 = smul.u32 240, %s248_s26  ;;  %v7606_v11 = vld [vmem:[%s10000_s1 + $0x10] sm:$0xff]   ;;  %v7607_v20 = vld [vmem:[%s10000_s1 + $0x48] sm:$0xff]   ;;  %v7609_v38 = vld [vmem:[%s10000_s1 + $0x40] sm:$0xff]   ;;  %vm1003_vm4 = vcmask 1046532   ;;  %vm2903_vm6 = vcmask 1043456  }
  0x2f   : > { %v7608_v33 = vld [vmem:[%s10000_s1 + $0x8] sm:$0xff]   ;;  %vm8127_vm2 = vmor %vm310_vm0, %vm311_vm1  ;;  %v7610_v54 = vld [vmem:[%s10000_s1] sm:$0xff]   ;;  %vm2904_vm7 = vsmask.f32 7938  ;;  %vm2700_vm8 = vsmask.f32 256 }
  0x30   : > { %6897 = vmatpush3.bf16.msra.mxu0 %v7597_v2  ;;  %s251_s2 = scalar_lea.vmem %s9999_s0, %s7506_s16  ;;  %v10040_v39 = vsel %vm8127_vm2, 4294967295, %v10039_v39  ;;  %vm8441_vm5 = vmor %vm1002_vm3, %vm1003_vm4  ;;  %vm2910_vm9 = vcmask 1040384   ;;  %vm2701_vm10 = vsmask.f32 4368  ;;  %p6388_p10 = scmp.ne.s32.totalorder %s7881_s21, 0 }
  0x31   : > { %6933 = vmatpush3.bf16.msra.mxu1 %v7598_v3  ;;  %6898 = vmatprep.subr.bf16.mxu0 %v7599_v4  ;;  %s8078_s17 = scalar_lea.vmem %s251_s2, %s6566_s6  ;;  %10041 = vst [vmem:[#allocation9_spill] sm:$0xff] %v10040_v39  ;;  %vm9090_vm11 = vmand %vm2903_vm6, %vm2904_vm7  ;;  %s9254_s2 = scalar_lea.vmem [#allocation6], %s8040_s10 }
  0x32   : > { %6934 = vmatprep.subr.bf16.mxu1 %v7600_v5  ;;  %v8087_v12 = vld [vmem:[%s8078_s17] sm:$0xf]  ;;  %v8090_v13 = vld [vmem:[%s8078_s17 + $0x4] sm:$0xf]  ;;  %v8093_v14 = vld [vmem:[%s8078_s17 + $0x8] sm:$0x1] }
  0x33   : > { %v314_v15 = vshrl.u32 %v8087_v12, 16  ;;  %v317_v16 = vshll.u32 %v8087_v12, 16  ;;  %v323_v17 = vshll.u32 %v8090_v13, 16  ;;  %v327_v18 = vshrl.u32 %v8090_v13, 16  ;;  %v8100_v19 = vld [vmem:[%s8078_s17 + $0xc] sm:$0xf]  ;;  %vm9098_vm12 = vmand %vm2910_vm9, %vm2700_vm8 }
  0x34   : > { %6899 = vmatpush3.bf16.msra.mxu0 %v7599_v4  ;;  %v333_v21 = vshll.u32 %v8093_v14, 16  ;;  %v6153_v22 = vcombine.low %v8087_v12, %v8090_v13  ;;  %v8109_v23 = vld [vmem:[%s8078_s17 + $0x10] sm:$0xf]  ;;  %v8112_v24 = vld [vmem:[%s8078_s17 + $0x14] sm:$0x1]  ;;  %v338_v30 = vshrl.u32 %v8100_v19, 16  ;;  %vm9106_vm13 = vmor %vm2700_vm8, %vm2701_vm10 }
  0x35   : > { %6935 = vmatpush3.bf16.msra.mxu1 %v7600_v5  ;;  %6900 = vmatprep.subr.bf16.mxu0 %v7601_v6  ;;  %v316_v25 = vrot.slane %v314_v15, 4  ;;  %v319_v26 = vrot.slane %v317_v16, 5  ;;  %v325_v27 = vrot.slane %v323_v17, 5  ;;  %v329_v28 = vrot.slane %v327_v18, 4  ;;  %v8133_v48 = vld [vmem:[%s8078_s17 + $0x18] sm:$0xf]  ;;  %vm9142_vm14 = vmand %vm2910_vm9, %vm2904_vm7 }
  0x36   : > { %6936 = vmatprep.subr.bf16.mxu1 %v7602_v7  ;;  %v335_v29 = vrot.slane %v333_v21, 5  ;;  %v341_v31 = vshll.u32 %v8100_v19, 16  ;;  %v347_v32 = vshll.u32 %v8109_v23, 16  ;;  %6946 = vmatprep.mubr.bf16.mxu1 %v6153_v22  ;;  %v351_v36 = vshrl.u32 %v8109_v23, 16  ;;  %v8136_v50 = vld [vmem:[%s8078_s17 + $0x1c] sm:$0xf] }
  0x37   : > { %v320_v34 = vor.u32 %v319_v26, %v316_v25  ;;  %v330_v35 = vor.u32 %v329_v28, %v325_v27  ;;  %v357_v37 = vshll.u32 %v8112_v24, 16  ;;  %v340_v41 = vrot.slane %v338_v30, 4  ;;  %v8139_v51 = vld [vmem:[%s8078_s17 + $0x20] sm:$0x1]  ;;  %v8152_v59 = vld [vmem:[%s8078_s17 + $0x24] sm:$0xf] }
  0x38   : > { %6901 = vmatpush3.bf16.msra.mxu0 %v7601_v6  ;;  %v343_v42 = vrot.slane %v341_v31, 5  ;;  %v349_v43 = vrot.slane %v347_v32, 5  ;;  %v353_v46 = vrot.slane %v351_v36, 4  ;;  %v362_v52 = vshrl.u32 %v8133_v48, 16  ;;  %v8155_v60 = vld [vmem:[%s8078_s17 + $0x28] sm:$0xf] }
  0x39   : > { %6937 = vmatpush3.bf16.msra.mxu1 %v7602_v7  ;;  %6902 = vmatprep.subr.bf16.mxu0 %v7603_v8  ;;  %v321_v44 = vrot.slane %v320_v34, 4  ;;  %v331_v45 = vrot.slane %v330_v35, 4  ;;  %v359_v47 = vrot.slane %v357_v37, 5  ;;  %v365_v53 = vshll.u32 %v8133_v48, 16  ;;  %v8158_v1 = vld [vmem:[%s8078_s17 + $0x2c] sm:$0x1] }
  0x3a   : > { %6938 = vmatprep.subr.bf16.mxu1 %v7604_v9  ;;  %v344_v49 = vor.u32 %v343_v42, %v340_v41  ;;  %v354_v57 = vor.u32 %v353_v46, %v349_v43  ;;  %v371_v58 = vshll.u32 %v8136_v50, 16  ;;  %v364_v63 = vrot.slane %v362_v52, 4  ;;  %v7618_v18 = vld [vmem:[%s10000_s1 + $0xf8] sm:$0xff]   ;;  %v7614_v30 = vld [vmem:[%s10000_s1 + $0xb0] sm:$0xff]  }
  0x3b   : > { %v326_v55 = vsel %vm8127_vm2, %v321_v44, %v325_v27  ;;  %v336_v56 = vsel %vm8127_vm2, %v331_v45, %v335_v29  ;;  %v367_v0 = vrot.slane %v365_v53, 5  ;;  %v375_v4 = vshrl.u32 %v8136_v50, 16  ;;  %v8199_v35 = vld [vmem:[%s8078_s17 + $0x30] sm:$0xf]  ;;  %v8202_v36 = vld [vmem:[%s8078_s17 + $0x34] sm:$0xf] }
  0x3c   : > { %6903 = vmatpush3.bf16.msra.mxu0 %v7603_v8  ;;  %v6135_v61 = vcombine.low %v326_v55, %v336_v56  ;;  %v345_v62 = vrot.slane %v344_v49, 4  ;;  %v355_v2 = vrot.slane %v354_v57, 4  ;;  %v373_v3 = vrot.slane %v371_v58, 5  ;;  %v7613_v8 = vld [vmem:[%s10000_s1 + $0xb8] sm:$0xff]   ;;  %v7617_v58 = vld [vmem:[%s10000_s1 + $0xa8] sm:$0xff]  }
  0x3d   : > { %6939 = vmatpush3.bf16.msra.mxu1 %v7604_v9  ;;  %6904 = vmatprep.subr.bf16.mxu0 %v7605_v10  ;;  %v381_v5 = vshll.u32 %v8139_v51, 16  ;;  %v8166_v7 = vcombine.low %v8100_v19, %v8109_v23  ;;  %v368_v9 = vor.u32 %v367_v0, %v364_v63  ;;  %v377_v15 = vrot.slane %v375_v4, 4  ;;  %v8208_v44 = vld [vmem:[%s8078_s17 + $0x38] sm:$0x1]  ;;  %v8222_v56 = vld [vmem:[%s8078_s17 + $0x3c] sm:$0xf] }
  0x3e   : > { %6940 = vmatprep.subr.bf16.mxu1 %v7606_v11  ;;  %v350_v6 = vsel %vm8127_vm2, %v345_v62, %v349_v43  ;;  %6910 = vmatprep.mubr.bf16.mxu0 %v6135_v61  ;;  %v389_v17 = vshll.u32 %v8152_v59, 16  ;;  %v395_v25 = vshll.u32 %v8155_v60, 16  ;;  %v399_v28 = vshrl.u32 %v8155_v60, 16  ;;  %v7619_v43 = vld [vmem:[%s10000_s1 + $0xf0] sm:$0xff]   ;;  %v8233_v0 = vld [vmem:[%s8078_s17 + $0x40] sm:$0xf] }
  0x3f   : > { %v383_v16 = vrot.slane %v381_v5, 5  ;;  %v369_v21 = vrot.slane %v368_v9, 4  ;;  %v378_v26 = vor.u32 %v377_v15, %v373_v3  ;;  %v405_v29 = vshll.u32 %v8158_v1, 16 }
  0x40   : > { %6905 = vmatpush3.bf16.msra.mxu0 %v7605_v10  ;;  %v386_v10 = vshrl.u32 %v8152_v59, 16  ;;  %v391_v27 = vrot.slane %v389_v17, 5  ;;  %v8192_v32 = vcombine.low %v8133_v48, %v8136_v50  ;;  %v8196_v34 = vcombine.low %v8152_v59, %v8155_v60 }
  0x41   : > { %6941 = vmatpush3.bf16.msra.mxu1 %v7606_v11  ;;  %6906 = vmatprep.subr.bf16.mxu0 %v7607_v20  ;;  %v360_v11 = vsel %vm8127_vm2, %v355_v2, %v359_v47  ;;  %v8188_v31 = vsel %vm8127_vm2, %v369_v21, %v373_v3  ;;  %v379_v37 = vrot.slane %v378_v26, 4  ;;  %v401_v41 = vrot.slane %v399_v28, 4 }
  0x42   : > { %6942 = vmatprep.subr.bf16.mxu1 %v7608_v33  ;;  %v388_v22 = vrot.slane %v386_v10, 4  ;;  %10042 = vst [vmem:[#allocation10_spill] sm:$0xff] %v8188_v31  ;;  %v407_v42 = vrot.slane %v405_v29, 5  ;;  %v410_v45 = vshrl.u32 %v8199_v35, 16  ;;  %v413_v46 = vshll.u32 %v8199_v35, 16  ;;  %v7625_v29 = vld [vmem:[%s10000_s1 + $0xe0] sm:$0xff]  }
  0x43   : > { %v419_v47 = vshll.u32 %v8202_v36, 16  ;;  %v423_v49 = vshrl.u32 %v8202_v36, 16  ;;  %v8218_v52 = vsel %vm8127_vm2, %v379_v37, %v383_v16  ;;  %v429_v55 = vshll.u32 %v8208_v44, 16 }
  0x44   : > { %6907 = vmatpush3.bf16.msra.mxu0 %v7607_v20  ;;  %v8178_v20 = vcombine.low %v350_v6, %v360_v11  ;;  %10043 = vst [vmem:[#allocation11_spill] sm:$0xff] %v8218_v52  ;;  %v8226_v57 = vcombine.low %v8188_v31, %v8218_v52  ;;  %v412_v61 = vrot.slane %v410_v45, 4  ;;  %v415_v62 = vrot.slane %v413_v46, 5  ;;  %v8240_v6 = vld [vmem:[%s8078_s17 + $0x44] sm:$0x1] }
  0x45   : > { %6943 = vmatpush3.bf16.msra.mxu1 %v7608_v33  ;;  %6908 = vmatprep.subr.bf16.mxu0 %v7609_v38  ;;  %v397_v33 = vrot.slane %v395_v25, 5  ;;  %v421_v63 = vrot.slane %v419_v47, 5  ;;  %v425_v4 = vrot.slane %v423_v49, 4  ;;  %v431_v5 = vrot.slane %v429_v55, 5  ;;  %v7621_v11 = vld [vmem:[%s10000_s1 + $0xa0] sm:$0xff]  }
  0x46   : > { %6944 = vmatprep.subr.bf16.mxu1 %v7610_v54  ;;  %v416_v9 = vor.u32 %v415_v62, %v412_v61  ;;  %v8248_v10 = vcombine.low %v8199_v35, %v8202_v36  ;;  %v434_v15 = vshrl.u32 %v8222_v56, 16  ;;  %v437_v16 = vshll.u32 %v8222_v56, 16  ;;  %v8282_v46 = vld [vmem:[%s8078_s17 + $0x48] sm:$0xf]  ;;  %v8285_v47 = vld [vmem:[%s8078_s17 + $0x4c] sm:$0xf] }
  0x47   : > { %v443_v21 = vshll.u32 %v8233_v0, 16  ;;  %v8276_v45 = vcombine.low %v8222_v56, %v8233_v0  ;;  %v8288_v49 = vld [vmem:[%s8078_s17 + $0x50] sm:$0x1]  ;;  %v458_v61 = vshrl.u32 %v8282_v46, 16  ;;  %v8297_v62 = vld [vmem:[%s8078_s17 + $0x54] sm:$0xf] }
  0x48   : > { %6909 = vmatpush3.bf16.msra.mxu0 %v7609_v38  ;;  %v392_v38 = vor.u32 %v391_v27, %v388_v22  ;;  %v447_v22 = vshrl.u32 %v8233_v0, 16  ;;  %v417_v26 = vrot.slane %v416_v9, 4  ;;  %v436_v27 = vrot.slane %v434_v15, 4  ;;  %v8310_v9 = vld [vmem:[%s8078_s17 + $0x5c] sm:$0x1] }
  0x49   : > { %6945 = vmatpush3.bf16.msra.mxu1 %v7610_v54  ;;  %6966 = vmatprep.subr.bf16.mxu0 %v7613_v8  ;;  %v402_v54 = vor.u32 %v401_v41, %v397_v33  ;;  %v439_v28 = vrot.slane %v437_v16, 5  ;;  %v7629_v15 = vld [vmem:[%s10000_s1 + $0xd8] sm:$0xff]  }
  0x4a   : > { %7002 = vmatprep.subr.bf16.mxu1 %v7618_v18  ;;  %v393_v53 = vrot.slane %v392_v38, 4  ;;  %v449_v37 = vrot.slane %v447_v22, 4  ;;  %v453_v38 = vshll.u32 %v8240_v6, 16  ;;  %v8272_v41 = vsel %vm8127_vm2, %v417_v26, %v421_v63 }
  0x4b   : > { %6911 = vmatmul.mubr.bf16.vlgmr.msra.gmra.mxu0 %v8178_v20  ;;  %v403_v3 = vrot.slane %v402_v54, 4  ;;  %10046 = vst [vmem:[#allocation14_spill] sm:$0xff] %v8272_v41  ;;  %v477_v22 = vshll.u32 %v8288_v49, 16 }
  0x4c   : > { %6947 = vmatmul.mubr.bf16.vlgmr.msra.gmra.mxu1 %v8166_v7  ;;  %6967 = vmatpush3.bf16.msra.mxu0 %v7613_v8  ;;  %v8237_v2 = vsel %vm8127_vm2, %v393_v53, %v397_v33  ;;  %v7623_v8 = vld [vmem:[%s10000_s1 + $0xe8] sm:$0xff]   ;;  %v445_v33 = vrot.slane %v443_v21, 5  ;;  %v455_v55 = vrot.slane %v453_v38, 5  ;;  %v471_v21 = vshrl.u32 %v8285_v47, 16 }
  0x4d   : > { %6968 = vmatprep.subr.bf16.mxu0 %v7614_v30  ;;  %6950 = vmatprep.mubr.bf16.mxu1 %v8192_v32  ;;  %10044 = vst [vmem:[#allocation12_spill] sm:$0xff] %v8237_v2  ;;  %v8257_v17 = vsel %vm8127_vm2, %v403_v3, %v407_v42  ;;  %v440_v42 = vor.u32 %v439_v28, %v436_v27  ;;  %v479_v38 = vrot.slane %v477_v22, 5 }
  0x4e   : > { %7003 = vmatpush3.bf16.msra.mxu1 %v7618_v18  ;;  %6914 = vmatprep.mubr.bf16.mxu0 %v8226_v57  ;;  %10045 = vst [vmem:[#allocation13_spill] sm:$0xff] %v8257_v17  ;;  %v426_v18 = vor.u32 %v425_v4, %v421_v63  ;;  %v8263_v25 = vcombine.low %v8237_v2, %v8257_v17  ;;  %v8300_v63 = vld [vmem:[%s8078_s17 + $0x58] sm:$0xf]  ;;  %v461_v4 = vshll.u32 %v8282_v46, 16 }
  0x4f   : > { %7004 = vmatprep.subr.bf16.mxu1 %v7619_v43  ;;  %v450_v54 = vor.u32 %v449_v37, %v445_v33  ;;  %v473_v37 = vrot.slane %v471_v21, 4 }
  0x50   : > { %6969 = vmatpush3.bf16.msra.mxu0 %v7614_v30  ;;  %v427_v30 = vrot.slane %v426_v18, 4  ;;  %v460_v18 = vrot.slane %v458_v61, 4  ;;  %v463_v27 = vrot.slane %v461_v4, 5 }
  0x51   : > { %6970 = vmatprep.subr.bf16.mxu0 %v7617_v58  ;;  %v451_v16 = vrot.slane %v450_v54, 4 }
  0x52   : > { %7005 = vmatpush3.bf16.msra.mxu1 %v7619_v43  ;;  %v7624_v43 = vld [vmem:[%s10000_s1 + $0x98] sm:$0xff]   ;;  %v8293_v53 = vsel %vm8127_vm2, %v427_v30, %v431_v5  ;;  %v467_v5 = vshll.u32 %v8285_v47, 16  ;;  %v8324_v30 = vcombine.low %v8282_v46, %v8285_v47  ;;  %v464_v61 = vor.u32 %v463_v27, %v460_v18  ;;  %v7631_v27 = vld [vmem:[%s10000_s1 + $0xd0] sm:$0xff]  }
  0x53   : > { %6915 = vmatmul.mubr.bf16.gmra.mxu0 %v8263_v25  ;;  %7006 = vmatprep.subr.bf16.mxu1 %v7623_v8  ;;  %10047 = vst [vmem:[#allocation15_spill] sm:$0xff] %v8293_v53  ;;  %v8304_v3 = vcombine.low %v8272_v41, %v8293_v53  ;;  %v8345_v18 = vcombine.low %v8297_v62, %v8300_v63  ;;  %v8364_v41 = vld [vmem:[%s8078_s17 + $0x64] sm:$0xf] }
  0x54   : > { %6951 = vmatmul.mubr.bf16.gmra.mxu1 %v8196_v34  ;;  %6971 = vmatpush3.bf16.msra.mxu0 %v7617_v58  ;;  %v441_v58 = vrot.slane %v440_v42, 4  ;;  %v469_v28 = vrot.slane %v467_v5, 5  ;;  %v482_v42 = vshrl.u32 %v8297_v62, 16  ;;  %v495_v5 = vshrl.u32 %v8300_v63, 16 }
  0x55   : > { %10048 = vst [vmem:[#allocation16_spill] sm:$0xff] %v8304_v3  ;;  %6954 = vmatprep.mubr.bf16.mxu1 %v8248_v10  ;;  %6972 = vmatprep.subr.bf16.mxu0 %v7621_v11  ;;  %v465_v21 = vrot.slane %v464_v61, 4 }
  0x56   : > { %7007 = vmatpush3.bf16.msra.mxu1 %v7623_v8  ;;  %6918 = vmatprep.mubr.bf16.mxu0 %v8304_v3  ;;  %v8320_v26 = vsel %vm8127_vm2, %v441_v58, %v445_v33  ;;  %v8328_v8 = vsel %vm8127_vm2, %v451_v16, %v455_v55  ;;  %v7628_v33 = vld [vmem:[%s10000_s1 + $0x90] sm:$0xff]   ;;  %v485_v58 = vshll.u32 %v8297_v62, 16  ;;  %v491_v55 = vshll.u32 %v8300_v63, 16  ;;  %v8423_v3 = vld [vmem:[%s10000_s1 + $0x138] sm:$0xff]  }
  0x57   : > { %10049 = vst [vmem:[#allocation17_spill] sm:$0xff] %v8320_v26  ;;  %7008 = vmatprep.subr.bf16.mxu1 %v7625_v29  ;;  %10050 = vst [vmem:[#allocation18_spill] sm:$0xff] %v8328_v8  ;;  %v8336_v54 = vcombine.low %v8320_v26, %v8328_v8  ;;  %v474_v4 = vor.u32 %v473_v37, %v469_v28  ;;  %v501_v16 = vshll.u32 %v8310_v9, 16 }
  0x58   : > { %6973 = vmatpush3.bf16.msra.mxu0 %v7621_v11  ;;  %v484_v11 = vrot.slane %v482_v42, 4  ;;  %v487_v22 = vrot.slane %v485_v58, 5  ;;  %v493_v40 = vrot.slane %v491_v55, 5  ;;  %v497_v42 = vrot.slane %v495_v5, 4  ;;  %v8355_v58 = vld [vmem:[%s8078_s17 + $0x60] sm:$0xf] }
  0x59   : > { %10051 = vst [vmem:[#allocation19_spill] sm:$0xff] %v8336_v54  ;;  %6974 = vmatprep.subr.bf16.mxu0 %v7624_v43  ;;  %v475_v37 = vrot.slane %v474_v4, 4  ;;  %v503_v61 = vrot.slane %v501_v16, 5  ;;  %v8360_v53 = vsel %vm8127_vm2, %v465_v21, %v469_v28  ;;  %v506_v4 = vshrl.u32 %v8355_v58, 16  ;;  %v8378_v21 = vld [vmem:[%s8078_s17 + $0x6c] sm:$0xf] }
  0x5a   : > { %7009 = vmatpush3.bf16.msra.mxu1 %v7625_v29  ;;  %v7630_v29 = vld [vmem:[%s10000_s1 + $0x88] sm:$0xff]   ;;  %10052 = vst [vmem:[#allocation20_spill] sm:$0xff] %v8360_v53  ;;  %v488_v8 = vor.u32 %v487_v22, %v484_v11  ;;  %v509_v5 = vshll.u32 %v8355_v58, 16  ;;  %v498_v55 = vor.u32 %v497_v42, %v493_v40  ;;  %v515_v28 = vshll.u32 %v8364_v41, 16  ;;  %v8381_v22 = vld [vmem:[%s8078_s17 + $0x70] sm:$0xf] }
  0x5b   : > { %6919 = vmatmul.mubr.bf16.gmra.mxu0 %v8336_v54  ;;  %7010 = vmatprep.subr.bf16.mxu1 %v7629_v15  ;;  %v8373_v16 = vsel %vm8127_vm2, %v475_v37, %v479_v38  ;;  %v519_v11 = vshrl.u32 %v8364_v41, 16  ;;  %v508_v17 = vrot.slane %v506_v4, 4  ;;  %v8388_v38 = vld [vmem:[%s8078_s17 + $0x74] sm:$0x1] }
  0x5c   : > { %6955 = vmatmul.mubr.bf16.gmra.mxu1 %v8276_v45  ;;  %6975 = vmatpush3.bf16.msra.mxu0 %v7624_v43  ;;  %v8367_v43 = vld [vmem:[%s8078_s17 + $0x68] sm:$0x1]  ;;  %10053 = vst [vmem:[#allocation21_spill] sm:$0xff] %v8373_v16  ;;  %v8385_v26 = vcombine.low %v8360_v53, %v8373_v16  ;;  %v489_v52 = vrot.slane %v488_v8, 4  ;;  %v511_v31 = vrot.slane %v509_v5, 5  ;;  %v499_v37 = vrot.slane %v498_v55, 4 }
  0x5d   : > { %6958 = vmatprep.mubr.bf16.mxu1 %v8324_v30  ;;  %6976 = vmatprep.subr.bf16.mxu0 %v7628_v33  ;;  %v517_v42 = vrot.slane %v515_v28, 5  ;;  %v521_v2 = vrot.slane %v519_v11, 4  ;;  %v525_v54 = vshll.u32 %v8367_v43, 16  ;;  %v7635_v16 = vld [vmem:[%s10000_s1 + $0x80] sm:$0xff]   ;;  %v8404_v55 = vcombine.low %v8355_v58, %v8364_v41 }
  0x5e   : > { %7011 = vmatpush3.bf16.msra.mxu1 %v7629_v15  ;;  %10054 = vst [vmem:[#allocation22_spill] sm:$0xff] %v8385_v26  ;;  %v7634_v15 = vld [vmem:[%s10000_s1 + $0xc8] sm:$0xff]   ;;  %6922 = vmatprep.mubr.bf16.mxu0 %v8385_v26  ;;  %v8400_v8 = vsel %vm8127_vm2, %v489_v52, %v493_v40  ;;  %v512_v4 = vor.u32 %v511_v31, %v508_v17  ;;  %v7636_v5 = vld [vmem:[%s10000_s1 + $0xc0] sm:$0xff]   ;;  %v533_v40 = vshll.u32 %v8378_v21, 16  ;;  %v539_v26 = vshll.u32 %v8381_v22, 16 }
  0x5f   : > { %7012 = vmatprep.subr.bf16.mxu1 %v7631_v27  ;;  %10055 = vst [vmem:[#allocation23_spill] sm:$0xff] %v8400_v8  ;;  %v8412_v28 = vsel %vm8127_vm2, %v499_v37, %v503_v61  ;;  %v522_v11 = vor.u32 %v521_v2, %v517_v42  ;;  %v527_v53 = vrot.slane %v525_v54, 5  ;;  %v549_v61 = vshll.u32 %v8388_v38, 16 }
  0x60   : > { %6977 = vmatpush3.bf16.msra.mxu0 %v7628_v33  ;;  %v530_v33 = vshrl.u32 %v8378_v21, 16  ;;  %10056 = vst [vmem:[#allocation24_spill] sm:$0xff] %v8412_v28  ;;  %v8417_v31 = vcombine.low %v8400_v8, %v8412_v28  ;;  %v513_v52 = vrot.slane %v512_v4, 4  ;;  %v535_v54 = vrot.slane %v533_v40, 5 }
  0x61   : > { %6978 = vmatprep.subr.bf16.mxu0 %v7630_v29  ;;  %v523_v2 = vrot.slane %v522_v11, 4  ;;  %v541_v4 = vrot.slane %v539_v26, 5  ;;  %v10059_v28 = vmov 0  ;;  %v7640_v26 = vld [vmem:[%s10000_s1 + $0x178] sm:$0xff]  }
  0x62   : > { %7013 = vmatpush3.bf16.msra.mxu1 %v7631_v27  ;;  %v532_v17 = vrot.slane %v530_v33, 4  ;;  %v543_v27 = vshrl.u32 %v8381_v22, 16  ;;  %v8431_v37 = vsel %vm8127_vm2, %v513_v52, %v517_v42  ;;  %v1007_v33 = vrot.slane %v8090_v13, 5 }
  0x63   : > { %7014 = vmatprep.subr.bf16.mxu1 %v7634_v15  ;;  %6923 = vmatmul.mubr.bf16.gmra.mxu0 %v8417_v31  ;;  %10057 = vst [vmem:[#allocation25_spill] sm:$0xff] %v8431_v37  ;;  %v8437_v11 = vsel %vm8127_vm2, %v523_v2, %v527_v53  ;;  %v10060_v28 = vsel %vm8441_vm5, 4294967295, %v10059_v28  ;;  %v8451_v13 = vcombine.low %v8378_v21, %v8381_v22  ;;  %v1014_v2 = vrot.slane %v8109_v23, 5 }
  0x64   : > { %6959 = vmatmul.mubr.bf16.gmra.mxu1 %v8345_v18  ;;  %6979 = vmatpush3.bf16.msra.mxu0 %v7630_v29  ;;  %10058 = vst [vmem:[#allocation26_spill] sm:$0xff] %v8437_v11  ;;  %v536_v29 = vor.u32 %v535_v54, %v532_v17  ;;  %v545_v40 = vrot.slane %v543_v27, 4  ;;  %10061 = vst [vmem:[#allocation27_spill] sm:$0xff] %v10060_v28  ;;  %v8447_v42 = vcombine.low %v8431_v37, %v8437_v11 }
  0x65   : > { %6962 = vmatprep.mubr.bf16.mxu1 %v8404_v55  ;;  %6980 = vmatprep.subr.bf16.mxu0 %v7635_v16  ;;  %v1009_v53 = vrot.slane %v1007_v33, 4  ;;  %v551_v17 = vrot.slane %v549_v61, 5  ;;  %v10062_v54 = vrot.slane %v8087_v12, 9  ;;  %v10063_v11 = vrot.slane %v8093_v14, 5 }
  0x66   : > { %7015 = vmatpush3.bf16.msra.mxu1 %v7634_v15  ;;  %v537_v15 = vrot.slane %v536_v29, 4  ;;  %v546_v52 = vor.u32 %v545_v40, %v541_v4  ;;  %6926 = vmatprep.mubr.bf16.mxu0 %v8447_v42  ;;  %v1021_v29 = vrot.slane %v8136_v50, 5  ;;  %v1017_v12 = vrot.slane %v8112_v24, 5 }
  0x67   : > { %7016 = vmatprep.subr.bf16.mxu1 %v7636_v5  ;;  %v1008_v27 = vsel %vm8441_vm5, %v10062_v54, %v1007_v33  ;;  %v1011_v37 = vsel %vm8441_vm5, %v1009_v53, %v10063_v11  ;;  %v6172_v61 = vrot.slane %v8100_v19, 9  ;;  %v6173_v33 = vrot.slane %v8133_v48, 9  ;;  %v7638_v54 = vld [vmem:[%s10000_s1 + $0x130] sm:$0xff]  }
  0x68   : > { %6981 = vmatpush3.bf16.msra.mxu0 %v7635_v16  ;;  %v8470_v16 = vsel %vm8127_vm2, %v537_v15, %v541_v4  ;;  %v547_v23 = vrot.slane %v546_v52, 4  ;;  %v1024_v14 = vrot.slane %v8139_v51, 5  ;;  %v6197_v50 = vcombine.low %v1008_v27, %v1011_v37 }
  0x69   : > { %7038 = vmatprep.subr.bf16.mxu0 %v8423_v3  ;;  %10064 = vst [vmem:[#allocation28_spill] sm:$0xff] %v8470_v16  ;;  %v1016_v4 = vrot.slane %v1014_v2, 4  ;;  %v1023_v40 = vrot.slane %v1021_v29, 4  ;;  %v1015_v19 = vsel %vm8441_vm5, %v6172_v61, %v1014_v2  ;;  %v1028_v48 = vrot.slane %v8155_v60, 5 }
  0x6a   : > { %7017 = vmatpush3.bf16.msra.mxu1 %v7636_v5  ;;  %v8478_v11 = vsel %vm8127_vm2, %v547_v23, %v551_v17  ;;  %v1022_v51 = vsel %vm8441_vm5, %v6173_v33, %v1021_v29  ;;  %v1035_v53 = vrot.slane %v8202_v36, 5  ;;  %v6174_v60 = vrot.slane %v8152_v59, 9  ;;  %v7643_v59 = vld [vmem:[%s10000_s1 + $0x168] sm:$0xff]   ;;  %v7642_v33 = vld [vmem:[%s10000_s1 + $0x120] sm:$0xff]  }
  0x6b   : > { %7074 = vmatprep.subr.bf16.mxu1 %v7640_v26  ;;  %10065 = vst [vmem:[#allocation29_spill] sm:$0xff] %v8478_v11  ;;  %v8483_v5 = vcombine.low %v8470_v16, %v8478_v11  ;;  %v1018_v24 = vsel %vm8441_vm5, %v1016_v4, %v1017_v12  ;;  %v1025_v37 = vsel %vm8441_vm5, %v1023_v40, %v1024_v14  ;;  %v1030_v17 = vrot.slane %v1028_v48, 4  ;;  %v7645_v12 = vld [vmem:[%s10000_s1 + $0x160] sm:$0xff]  }
  0x6c   : > { %6963 = vmatmul.mubr.bf16.gmra.mxu1 %v8451_v13  ;;  %v8500_v15 = vcombine.low %v1015_v19, %v1018_v24  ;;  %v8503_v52 = vcombine.low %v1022_v51, %v1025_v37  ;;  %v1031_v2 = vrot.slane %v8158_v1, 5  ;;  %v6175_v36 = vrot.slane %v8199_v35, 9 }
  0x6d   : > { %7018 = vmatprep.mubr.bf16.mxu1 %v8166_v7  ;;  %6927 = vmatmul.mubr.bf16.gmra.mxu0 %v8483_v5  ;;  %v7641_v7 = vld [vmem:[%s10000_s1 + $0x170] sm:$0xff]   ;;  %v1037_v27 = vrot.slane %v1035_v53, 4  ;;  %v1038_v29 = vrot.slane %v8208_v44, 5  ;;  %v1029_v1 = vsel %vm8441_vm5, %v6174_v60, %v1028_v48  ;;  %v7639_v44 = vld [vmem:[%s10000_s1 + $0x128] sm:$0xff]   ;;  %v1049_v61 = vrot.slane %v8285_v47, 5 }
  0x6e   : > { %6982 = vmatprep.mubr.bf16.mxu0 %v6197_v50  ;;  %v1032_v35 = vsel %vm8441_vm5, %v1030_v17, %v1031_v2  ;;  %v1036_v23 = vsel %vm8441_vm5, %v6175_v36, %v1035_v53  ;;  %v6176_v14 = vrot.slane %v8222_v56, 9  ;;  %v1045_v50 = vrot.slane %v8240_v6, 5  ;;  %v7647_v56 = vld [vmem:[%s10000_s1 + $0x158] sm:$0xff]   ;;  %v7646_v17 = vld [vmem:[%s10000_s1 + $0x110] sm:$0xff]  }
  0x6f   : > { %v6177_v19 = vrot.slane %v8282_v46, 9  ;;  %v1051_v47 = vrot.slane %v1049_v61, 4  ;;  %v1052_v24 = vrot.slane %v8288_v49, 5  ;;  %v1056_v48 = vrot.slane %v8300_v63, 5  ;;  %v7644_v49 = vld [vmem:[%s10000_s1 + $0x118] sm:$0xff]   ;;  %v7649_v2 = vld [vmem:[%s10000_s1 + $0x150] sm:$0xff]  }
  0x70   : > { %v1063_v53 = vrot.slane %v8364_v41, 5  ;;  %v1059_v63 = vrot.slane %v8310_v9, 5  ;;  %v1066_v36 = vrot.slane %v8367_v43, 5 }
  0x71   : > { %v1050_v51 = vsel %vm8441_vm5, %v6177_v19, %v1049_v61  ;;  %v1053_v37 = vsel %vm8441_vm5, %v1051_v47, %v1052_v24  ;;  %v7654_v19 = vld [vmem:[%s10000_s1 + $0x1b8] sm:$0xff]   ;;  %v7658_v24 = vld [vmem:[%s10000_s1 + $0x1f0] sm:$0xff]  }
  0x72   : > { %v8577_v41 = vcombine.low %v1050_v51, %v1053_v37  ;;  %v1065_v9 = vrot.slane %v1063_v53, 4 }
  0x74   : > { %7019 = vmatmul.mubr.bf16.vlgmr.msra.gmra.mxu1 %v8192_v32 }
  0x75   : > { %7022 = vmatprep.mubr.bf16.mxu1 %v8196_v34  ;;  %7075 = vmatpush3.bf16.msra.mxu1 %v7640_v26  ;;  %v1042_v26 = vrot.slane %v8233_v0, 5  ;;  %v8535_v0 = vcombine.low %v1029_v1, %v1032_v35  ;;  %v1067_v1 = vsel %vm8441_vm5, %v1065_v9, %v1066_v36 }
  0x76   : > { %7076 = vmatprep.subr.bf16.mxu1 %v7641_v7  ;;  %6983 = vmatmul.mubr.bf16.vlgmr.msra.gmra.mxu0 %v8500_v15 }
  0x77   : > { %7039 = vmatpush3.bf16.msra.mxu0 %v8423_v3  ;;  %6986 = vmatprep.mubr.bf16.mxu0 %v8503_v52  ;;  %v1039_v3 = vsel %vm8441_vm5, %v1037_v27, %v1038_v29  ;;  %v1044_v40 = vrot.slane %v1042_v26, 4  ;;  %v1043_v6 = vsel %vm8441_vm5, %v6176_v14, %v1042_v26  ;;  %v1070_v27 = vrot.slane %v8381_v22, 5  ;;  %v7651_v29 = vld [vmem:[%s10000_s1 + $0x148] sm:$0xff]   ;;  %v7657_v14 = vld [vmem:[%s10000_s1 + $0x1f8] sm:$0xff]  }
  0x78   : > { %7040 = vmatprep.subr.bf16.mxu0 %v7638_v54  ;;  %v8543_v4 = vcombine.low %v1036_v23, %v1039_v3  ;;  %v6180_v26 = vrot.slane %v8378_v21, 9  ;;  %v8606_v23 = vld [vmem:[%s8078_s17 + $0x7c] sm:$0xf]  ;;  %v7653_v3 = vld [vmem:[%s10000_s1 + $0x140] sm:$0xff]  }
  0x79   : > { %7077 = vmatpush3.bf16.msra.mxu1 %v7641_v7  ;;  %v1046_v46 = vsel %vm8441_vm5, %v1044_v40, %v1045_v50  ;;  %v6178_v7 = vrot.slane %v8297_v62, 9  ;;  %v6179_v62 = vrot.slane %v8355_v58, 9  ;;  %v1072_v61 = vrot.slane %v1070_v27, 4  ;;  %v7652_v21 = vld [vmem:[%s10000_s1 + $0x100] sm:$0xff]  }
  0x7a   : > { %7078 = vmatprep.subr.bf16.mxu1 %v7643_v59  ;;  %v8567_v60 = vcombine.low %v1043_v6, %v1046_v46  ;;  %v7662_v6 = vld [vmem:[%s10000_s1 + $0x1e0] sm:$0xff]  }
  0x7b   : > { %7041 = vmatpush3.bf16.msra.mxu0 %v7638_v54  ;;  %v1058_v54 = vrot.slane %v1056_v48, 4  ;;  %v1057_v58 = vsel %vm8441_vm5, %v6178_v7, %v1056_v48  ;;  %v1064_v22 = vsel %vm8441_vm5, %v6179_v62, %v1063_v53  ;;  %v7659_v46 = vld [vmem:[%s10000_s1 + $0x1a0] sm:$0xff]   ;;  %v10066_v48 = vld [vmem:[#allocation16_spill] sm:$0xff]  ;;  %v1531_v53 = vshrl.u32 %v8606_v23, 16  ;;  %v10067_v7 = vld [vmem:[#allocation19_spill] sm:$0xff] }
  0x7c   : > { %7023 = vmatmul.mubr.bf16.gmra.mxu1 %v8248_v10  ;;  %7042 = vmatprep.subr.bf16.mxu0 %v7639_v44 }
  0x7d   : > { %7026 = vmatprep.mubr.bf16.mxu1 %v8276_v45  ;;  %7079 = vmatpush3.bf16.msra.mxu1 %v7643_v59  ;;  %v1060_v43 = vsel %vm8441_vm5, %v1058_v54, %v1059_v63  ;;  %v7648_v59 = vld [vmem:[%s10000_s1 + $0x108] sm:$0xff]   ;;  %v1527_v63 = vshll.u32 %v8606_v23, 16  ;;  %v1533_v36 = vrot.slane %v1531_v53, 4  ;;  %v7674_v53 = vld [vmem:[%s10000_s1 + $0x218] sm:$0xff]  }
  0x7e   : > { %6987 = vmatmul.mubr.bf16.gmra.mxu0 %v8535_v0  ;;  %7080 = vmatprep.subr.bf16.mxu1 %v7645_v12  ;;  %v8599_v35 = vcombine.low %v1057_v58, %v1060_v43  ;;  %v1746_v58 = vrot.slane %v8606_v23, 5  ;;  %v10068_v43 = vld [vmem:[#allocation22_spill] sm:$0xff] }
  0x7f   : > { %7043 = vmatpush3.bf16.msra.mxu0 %v7639_v44  ;;  %6990 = vmatprep.mubr.bf16.mxu0 %v8543_v4  ;;  %v8603_v44 = vld [vmem:[%s8078_s17 + $0x78] sm:$0xf]  ;;  %v1529_v9 = vrot.slane %v1527_v63, 5 }
  0x80   : > { %7044 = vmatprep.subr.bf16.mxu0 %v7642_v33  ;;  %v8630_v40 = vcombine.low %v8603_v44, %v8606_v23  ;;  %v1518_v51 = vshrl.u32 %v8603_v44, 16  ;;  %v1521_v37 = vshll.u32 %v8603_v44, 16  ;;  %v6265_v23 = vrot.slane %v8603_v44, 9 }
  0x81   : > { %7081 = vmatpush3.bf16.msra.mxu1 %v7645_v12  ;;  %v8612_v12 = vcombine.low %v1064_v22, %v1067_v1  ;;  %v1534_v1 = vor.u32 %v1533_v36, %v1529_v9 }
  0x82   : > { %7082 = vmatprep.subr.bf16.mxu1 %v7647_v56  ;;  %v1520_v54 = vrot.slane %v1518_v51, 4  ;;  %v1523_v62 = vrot.slane %v1521_v37, 5  ;;  %v1747_v44 = vsel %vm8441_vm5, %v6265_v23, %v1746_v58  ;;  %v8733_v51 = vld [vmem:[%s8078_s17 + $0x84] sm:$0xf] }
  0x83   : > { %7045 = vmatpush3.bf16.msra.mxu0 %v7642_v33  ;;  %v1073_v33 = vrot.slane %v8388_v38, 5  ;;  %v1071_v38 = vsel %vm8441_vm5, %v6180_v26, %v1070_v27  ;;  %v7663_v27 = vld [vmem:[%s10000_s1 + $0x190] sm:$0xff]  }
  0x84   : > { %7027 = vmatmul.mubr.bf16.gmra.mxu1 %v8324_v30  ;;  %7046 = vmatprep.subr.bf16.mxu0 %v7644_v49  ;;  %v1524_v22 = vor.u32 %v1523_v62, %v1520_v54  ;;  %v293_v54 = vld [vmem:[%s8078_s17 + $0x8c] sm:$0x1] }
  0x85   : > { %7030 = vmatprep.mubr.bf16.mxu1 %v8345_v18  ;;  %7083 = vmatpush3.bf16.msra.mxu1 %v7647_v56  ;;  %v1074_v50 = vsel %vm8441_vm5, %v1072_v61, %v1073_v33  ;;  %v7655_v56 = vld [vmem:[%s10000_s1 + $0x1b0] sm:$0xff]   ;;  %v1748_v61 = vrot.slane %v1746_v58, 4 }
  0x86   : > { %6991 = vmatmul.mubr.bf16.gmra.mxu0 %v8567_v60  ;;  %7084 = vmatprep.subr.bf16.mxu1 %v7649_v2  ;;  %v8635_v47 = vcombine.low %v1071_v38, %v1074_v50  ;;  %v1535_v38 = vrot.slane %v1534_v1, 4 }
  0x87   : > { %7047 = vmatpush3.bf16.msra.mxu0 %v7644_v49  ;;  %6994 = vmatprep.mubr.bf16.mxu0 %v8577_v41  ;;  %v7664_v49 = vld [vmem:[%s10000_s1 + $0x1d8] sm:$0xff]  }
  0x88   : > { %7048 = vmatprep.subr.bf16.mxu0 %v7646_v17 }
  0x89   : > { %7085 = vmatpush3.bf16.msra.mxu1 %v7649_v2  ;;  %v7666_v2 = vld [vmem:[%s10000_s1 + $0x1d0] sm:$0xff]  }
  0x8a   : > { %7086 = vmatprep.subr.bf16.mxu1 %v7651_v29 }
  0x8b   : > { %7049 = vmatpush3.bf16.msra.mxu0 %v7646_v17  ;;  %v7661_v17 = vld [vmem:[%s10000_s1 + $0x198] sm:$0xff]  }
  0x8c   : > { %7031 = vmatmul.mubr.bf16.gmra.mxu1 %v8404_v55  ;;  %7050 = vmatprep.subr.bf16.mxu0 %v7648_v59 }
  0x8d   : > { %7034 = vmatprep.mubr.bf16.mxu1 %v8451_v13  ;;  %7087 = vmatpush3.bf16.msra.mxu1 %v7651_v29  ;;  %v290_v29 = vld [vmem:[%s8078_s17 + $0x80] sm:$0x1] }
  0x8e   : > { %6995 = vmatmul.mubr.bf16.gmra.mxu0 %v8599_v35  ;;  %7088 = vmatprep.subr.bf16.mxu1 %v7653_v3  ;;  %v1537_v26 = vshll.u32 %v290_v29, 16  ;;  %v1749_v33 = vrot.slane %v290_v29, 5 }
  0x8f   : > { %6998 = vmatprep.mubr.bf16.mxu0 %v8612_v12  ;;  %7051 = vmatpush3.bf16.msra.mxu0 %v7648_v59  ;;  %v7667_v59 = vld [vmem:[%s10000_s1 + $0x1c8] sm:$0xff]  }
  0x90   : > { %7052 = vmatprep.subr.bf16.mxu0 %v7652_v21  ;;  %v1539_v50 = vrot.slane %v1537_v26, 5 }
  0x91   : > { %7089 = vmatpush3.bf16.msra.mxu1 %v7653_v3  ;;  %v7665_v3 = vld [vmem:[%s10000_s1 + $0x188] sm:$0xff]  }
  0x92   : > { %7146 = vmatprep.subr.bf16.mxu1 %v7657_v14 }
  0x93   : > { %7053 = vmatpush3.bf16.msra.mxu0 %v7652_v21  ;;  %v7669_v21 = vld [vmem:[%s10000_s1 + $0x1c0] sm:$0xff]  }
  0x94   : > { %7035 = vmatmul.mubr.bf16.gmra.mxu1 %v8630_v40  ;;  %7110 = vmatprep.subr.bf16.mxu0 %v7654_v19 }
  0x95   : > { %7090 = vmatprep.mubr.bf16.mxu1 %v8500_v15  ;;  %v7660_v15 = vld [vmem:[%s10000_s1 + $0x1e8] sm:$0xff]  }
  0x96   : > { %6999 = vmatmul.mubr.bf16.gmra.mxu0 %v8635_v47 }
  0x97   : > { %7054 = vmatprep.mubr.bf16.mxu0 %v8178_v20  ;;  %v7656_v20 = vld [vmem:[%s10000_s1 + $0x1a8] sm:$0xff]  }
  0x9c   : > { %7091 = vmatmul.mubr.bf16.vlgmr.msra.gmra.mxu1 %v8503_v52 }
  0x9d   : > { %7094 = vmatprep.mubr.bf16.mxu1 %v8535_v0  ;;  %7147 = vmatpush3.bf16.msra.mxu1 %v7657_v14  ;;  %v1525_v14 = vrot.slane %v1524_v22, 4 }
  0x9e   : > { %7148 = vmatprep.subr.bf16.mxu1 %v7658_v24  ;;  %7055 = vmatmul.mubr.bf16.vlgmr.msra.gmra.mxu0 %v8226_v57 }
  0x9f   : > { %7111 = vmatpush3.bf16.msra.mxu0 %v7654_v19  ;;  %7058 = vmatprep.mubr.bf16.mxu0 %v8263_v25  ;;  %v1750_v19 = vsel %vm8441_vm5, %v1748_v61, %v1749_v33 }
  0xa0   : > { %7112 = vmatprep.subr.bf16.mxu0 %v7655_v56 }
  0xa1   : > { %7149 = vmatpush3.bf16.msra.mxu1 %v7658_v24  ;;  %v7668_v24 = vld [vmem:[%s10000_s1 + $0x180] sm:$0xff]  }
  0xa2   : > { %7150 = vmatprep.subr.bf16.mxu1 %v7660_v15 }
  0xa3   : > { %7113 = vmatpush3.bf16.msra.mxu0 %v7655_v56  ;;  %v1530_v56 = vsel %vm8127_vm2, %v1525_v14, %v1529_v9  ;;  %v2177_v9 = vshll.u32 %v293_v54, 16 }
  0xa4   : > { %7095 = vmatmul.mubr.bf16.gmra.mxu1 %v8543_v4  ;;  %7114 = vmatprep.subr.bf16.mxu0 %v7656_v20 }
  0xa5   : > { %7098 = vmatprep.mubr.bf16.mxu1 %v8567_v60  ;;  %7151 = vmatpush3.bf16.msra.mxu1 %v7660_v15  ;;  %v1540_v15 = vsel %vm8127_vm2, %v1535_v38, %v1539_v50 }
  0xa6   : > { %7059 = vmatmul.mubr.bf16.gmra.mxu0 %v10066_v48  ;;  %7152 = vmatprep.subr.bf16.mxu1 %v7662_v6 }
  0xa7   : > { %7115 = vmatpush3.bf16.msra.mxu0 %v7656_v20  ;;  %7062 = vmatprep.mubr.bf16.mxu0 %v10067_v7  ;;  %v8714_v20 = vcombine.low %v1747_v44, %v1750_v19 }
  0xa8   : > { %7116 = vmatprep.subr.bf16.mxu0 %v7659_v46 }
  0xa9   : > { %7153 = vmatpush3.bf16.msra.mxu1 %v7662_v6  ;;  %v7670_v6 = vld [vmem:[%s10000_s1 + $0x238] sm:$0xff]  }
  0xaa   : > { %7154 = vmatprep.subr.bf16.mxu1 %v7664_v49 }
  0xab   : > { %7117 = vmatpush3.bf16.msra.mxu0 %v7659_v46  ;;  %v6256_v46 = vcombine.low %v1530_v56, %v1540_v15 }
  0xac   : > { %7099 = vmatmul.mubr.bf16.gmra.mxu1 %v8577_v41  ;;  %7118 = vmatprep.subr.bf16.mxu0 %v7661_v17 }
  0xad   : > { %7102 = vmatprep.mubr.bf16.mxu1 %v8599_v35  ;;  %7155 = vmatpush3.bf16.msra.mxu1 %v7664_v49  ;;  %v7671_v49 = vld [vmem:[%s10000_s1 + $0x230] sm:$0xff]  }
  0xae   : > { %7063 = vmatmul.mubr.bf16.gmra.mxu0 %v10068_v43  ;;  %7156 = vmatprep.subr.bf16.mxu1 %v7666_v2 }
  0xaf   : > { %7119 = vmatpush3.bf16.msra.mxu0 %v7661_v17  ;;  %7066 = vmatprep.mubr.bf16.mxu0 %v8417_v31 }
  0xb0   : > { %7120 = vmatprep.subr.bf16.mxu0 %v7663_v27 }
  0xb1   : > { %7157 = vmatpush3.bf16.msra.mxu1 %v7666_v2 }
  0xb2   : > { %7158 = vmatprep.subr.bf16.mxu1 %v7667_v59 }
  0xb3   : > { %7121 = vmatpush3.bf16.msra.mxu0 %v7663_v27 }
  0xb4   : > { %7103 = vmatmul.mubr.bf16.gmra.mxu1 %v8612_v12  ;;  %7122 = vmatprep.subr.bf16.mxu0 %v7665_v3 }
  0xb5   : > { %7106 = vmatprep.mubr.bf16.mxu1 %v8635_v47  ;;  %7159 = vmatpush3.bf16.msra.mxu1 %v7667_v59  ;;  %v2389_v59 = vrot.slane %v293_v54, 5 }
  0xb6   : > { %7067 = vmatmul.mubr.bf16.gmra.mxu0 %v8447_v42  ;;  %7160 = vmatprep.subr.bf16.mxu1 %v7669_v21 }
  0xb7   : > { %7070 = vmatprep.mubr.bf16.mxu0 %v8483_v5  ;;  %7123 = vmatpush3.bf16.msra.mxu0 %v7665_v3 }
  0xb8   : > { %7124 = vmatprep.subr.bf16.mxu0 %v7668_v24 }
  0xb9   : > { %7161 = vmatpush3.bf16.msra.mxu1 %v7669_v21 }
  0xbb   : > { %7125 = vmatpush3.bf16.msra.mxu0 %v7668_v24 }
  0xbc   : > { %7107 = vmatmul.mubr.bf16.gmra.mxu1 %v8714_v20  ;;  %7182 = vmatprep.subr.bf16.mxu0 %v7670_v6 }
  0xbd   : > { %7162 = vmatprep.mubr.bf16.mxu1 %v8226_v57  ;;  %v7672_v57 = vld [vmem:[%s10000_s1 + $0x228] sm:$0xff]  }
  0xbe   : > { %7071 = vmatmul.mubr.bf16.gmra.mxu0 %v6256_v46 }
  0xbf   : > { %7126 = vmatprep.mubr.bf16.mxu0 %v8192_v32  ;;  %v8736_v32 = vld [vmem:[%s8078_s17 + $0x88] sm:$0xf] }
  0xc0   : > { %v2167_v37 = vshll.u32 %v8736_v32, 16 }
  0xc2   : > { %v2169_v17 = vrot.slane %v2167_v37, 5 }
  0xc4   : > { %7163 = vmatmul.mubr.bf16.vlgmr.msra.gmra.mxu1 %v8263_v25  ;;  %v2161_v25 = vshll.u32 %v8733_v51, 16 }
  0xc5   : > { %7166 = vmatprep.mubr.bf16.mxu1 %v10066_v48  ;;  %v2171_v48 = vshrl.u32 %v8736_v32, 16 }
  0xc6   : > { %7127 = vmatmul.mubr.bf16.vlgmr.msra.gmra.mxu0 %v8196_v34  ;;  %v7673_v34 = vld [vmem:[%s10000_s1 + $0x220] sm:$0xff]   ;;  %v2163_v63 = vrot.slane %v2161_v25, 5 }
  0xc7   : > { %7183 = vmatpush3.bf16.msra.mxu0 %v7670_v6  ;;  %7130 = vmatprep.mubr.bf16.mxu0 %v8248_v10  ;;  %v2158_v10 = vshrl.u32 %v8733_v51, 16  ;;  %v2173_v2 = vrot.slane %v2171_v48, 4 }
  0xc8   : > { %7184 = vmatprep.subr.bf16.mxu0 %v7671_v49 }
  0xc9   : > { %v2174_v62 = vor.u32 %v2173_v2, %v2169_v17 }
  0xcb   : > { %7185 = vmatpush3.bf16.msra.mxu0 %v7671_v49  ;;  %v2175_v27 = vrot.slane %v2174_v62, 4 }
  0xcc   : > { %7167 = vmatmul.mubr.bf16.gmra.mxu1 %v10067_v7  ;;  %7186 = vmatprep.subr.bf16.mxu0 %v7672_v57  ;;  %v2160_v7 = vrot.slane %v2158_v10, 4 }
  0xcd   : > { %7170 = vmatprep.mubr.bf16.mxu1 %v10068_v43 }
  0xce   : > { %7131 = vmatmul.mubr.bf16.gmra.mxu0 %v8276_v45  ;;  %v7675_v45 = vld [vmem:[%s10000_s1 + $0x210] sm:$0xff]  }
  0xcf   : > { %7187 = vmatpush3.bf16.msra.mxu0 %v7672_v57  ;;  %7134 = vmatprep.mubr.bf16.mxu0 %v8324_v30  ;;  %v2164_v30 = vor.u32 %v2163_v63, %v2160_v7 }
  0xd0   : > { %7188 = vmatprep.subr.bf16.mxu0 %v7673_v34 }
  0xd1   : > { %v2165_v36 = vrot.slane %v2164_v30, 4 }
  0xd3   : > { %7189 = vmatpush3.bf16.msra.mxu0 %v7673_v34  ;;  %v2170_v29 = vsel %vm8127_vm2, %v2165_v36, %v2169_v17 }
  0xd4   : > { %7171 = vmatmul.mubr.bf16.gmra.mxu1 %v8417_v31  ;;  %7190 = vmatprep.subr.bf16.mxu0 %v7674_v53  ;;  %v7676_v31 = vld [vmem:[%s10000_s1 + $0x208] sm:$0xff]  }
  0xd5   : > { %7174 = vmatprep.mubr.bf16.mxu1 %v8447_v42  ;;  %v2179_v42 = vrot.slane %v2177_v9, 5 }
  0xd6   : > { %7135 = vmatmul.mubr.bf16.gmra.mxu0 %v8345_v18 }
  0xd7   : > { %7191 = vmatpush3.bf16.msra.mxu0 %v7674_v53  ;;  %7138 = vmatprep.mubr.bf16.mxu0 %v8404_v55  ;;  %v2180_v18 = vsel %vm8127_vm2, %v2175_v27, %v2179_v42  ;;  %v7678_v55 = vld [vmem:[%s10000_s1 + $0x200] sm:$0xff]  }
  0xd8   : > { %7192 = vmatprep.subr.bf16.mxu0 %v7675_v45  ;;  %v6332_v58 = vcombine.low %v2170_v29, %v2180_v18 }
  0xdb   : > { %7193 = vmatpush3.bf16.msra.mxu0 %v7675_v45 }
  0xdc   : > { %7175 = vmatmul.mubr.bf16.gmra.mxu1 %v8483_v5  ;;  %7194 = vmatprep.subr.bf16.mxu0 %v7676_v31  ;;  %v6307_v5 = vcombine.low %v8733_v51, %v8736_v32 }
  0xdd   : > { %7178 = vmatprep.mubr.bf16.mxu1 %v6256_v46 }
  0xde   : > { %7139 = vmatmul.mubr.bf16.gmra.mxu0 %v8451_v13  ;;  %v2386_v13 = vrot.slane %v8736_v32, 5 }
  0xdf   : > { %7142 = vmatprep.mubr.bf16.mxu0 %v8630_v40  ;;  %7195 = vmatpush3.bf16.msra.mxu0 %v7676_v31  ;;  %v6341_v40 = vrot.slane %v8733_v51, 9 }
  0xe0   : > { %7196 = vmatprep.subr.bf16.mxu0 %v7678_v55  ;;  %v2388_v43 = vrot.slane %v2386_v13, 4 }
  0xe3   : > { %7197 = vmatpush3.bf16.msra.mxu0 %v7678_v55 }
  0xe4   : > { %7179 = vmatmul.mubr.bf16.gmra.mxu1 %v6332_v58 }
  0xe6   : > { %7143 = vmatmul.mubr.bf16.gmra.mxu0 %v6307_v5 }
  0xe7   : > { %7198 = vmatprep.mubr.bf16.mxu0 %v8503_v52  ;;  %v2387_v52 = vsel %vm8441_vm5, %v6341_v40, %v2386_v13 }
  0xee   : > { %7199 = vmatmul.mubr.bf16.vlgmr.msra.gmra.mxu0 %v8535_v0  ;;  %v2390_v0 = vsel %vm8441_vm5, %v2388_v43, %v2389_v59 }
  0xef   : > { %7202 = vmatprep.mubr.bf16.mxu0 %v8543_v4 }
  0xf6   : > { %7203 = vmatmul.mubr.bf16.gmra.mxu0 %v8567_v60  ;;  %v6358_v60 = vcombine.low %v2387_v52, %v2390_v0 }
  0xf7   : > { %7206 = vmatprep.mubr.bf16.mxu0 %v8577_v41 }
  0xfe   : > { %7207 = vmatmul.mubr.bf16.gmra.mxu0 %v8599_v35 }
  0xff   : > { %7210 = vmatprep.mubr.bf16.mxu0 %v8612_v12 }
 0x106   : > { %7211 = vmatmul.mubr.bf16.gmra.mxu0 %v8635_v47 }
 0x107   : > { %7214 = vmatprep.mubr.bf16.mxu0 %v8714_v20 }
 0x10b   : > { %v6912_v4 = vpop.f32.mrf.mxu0 }
 0x10c   : > { %v6948_v41 = vpop.f32.mrf.mxu1 }
 0x10d   : > { %v922_v35 = vadd.f32 %v6948_v41, %v6912_v4  ;;  %v692_v12 = vpop.f32.mrf.mxu0 }
 0x10e   : > { %v913_v22 = vpop.f32.mrf.mxu1  ;;  %7215 = vmatmul.mubr.bf16.gmra.mxu0 %v6358_v60 }
 0x10f   : > { %v914_v1 = vadd.f32 %v913_v22, %v692_v12  ;;  %v6913_v26 = vpop.f32.mrf.mxu0 }
 0x110   : > { %v6949_v3 = vpop.f32.mrf.mxu1 }
 0x111   : > { %v925_v23 = vadd.f32 %v6949_v3, %v6913_v26  ;;  %v695_v47 = vpop.f32.mrf.mxu0 }
 0x112   : > { %v916_v61 = vpop.f32.mrf.mxu1 }
 0x113   : > { %v8790_v33 = vadd.f32 %v916_v61, %v695_v47  ;;  %v6916_v21 = vpop.f32.mrf.mxu0 }
 0x114   : > { %v6952_v14 = vpop.f32.mrf.mxu1 }
 0x115   : > { %v8792_v38 = vadd.f32 %v6952_v14, %v6916_v21  ;;  %v708_v50 = vpop.f32.mrf.mxu0 }
 0x116   : > { %v929_v44 = vpop.f32.mrf.mxu1 }
 0x117   : > { %v8794_v19 = vadd.f32 %v929_v44, %v708_v50  ;;  %v6917_v24 = vpop.f32.mrf.mxu0 }
 0x118   : > { %v6953_v56 = vpop.f32.mrf.mxu1 }
 0x119   : > { %v8796_v15 = vadd.f32 %v6953_v56, %v6917_v24  ;;  %v711_v20 = vpop.f32.mrf.mxu0 }
 0x11a   : > { %v932_v6 = vpop.f32.mrf.mxu1 }
 0x11b   : > { %v8798_v46 = vadd.f32 %v932_v6, %v711_v20  ;;  %v6920_v49 = vpop.f32.mrf.mxu0 }
 0x11c   : > { %v6956_v57 = vpop.f32.mrf.mxu1 }
 0x11d   : > { %v8800_v51 = vadd.f32 %v6956_v57, %v6920_v49  ;;  %v724_v32 = vpop.f32.mrf.mxu0 }
 0x11e   : > { %v945_v34 = vpop.f32.mrf.mxu1 }
 0x11f   : > { %v8802_v10 = vadd.f32 %v945_v34, %v724_v32  ;;  %v6921_v25 = vpop.f32.mrf.mxu0 }
 0x120   : > { %v6957_v48 = vpop.f32.mrf.mxu1 }
 0x121   : > { %v8804_v37 = vadd.f32 %v6957_v48, %v6921_v25  ;;  %v727_v53 = vpop.f32.mrf.mxu0 }
 0x122   : > { %v948_v7 = vpop.f32.mrf.mxu1 }
 0x123   : > { %v8806_v63 = vadd.f32 %v948_v7, %v727_v53  ;;  %v6924_v2 = vpop.f32.mrf.mxu0 }
 0x124   : > { %v6960_v17 = vpop.f32.mrf.mxu1 }
 0x125   : > { %v8808_v54 = vadd.f32 %v6960_v17, %v6924_v2  ;;  %v740_v30 = vpop.f32.mrf.mxu0 }
 0x126   : > { %v961_v45 = vpop.f32.mrf.mxu1 }
 0x127   : > { %v8810_v62 = vadd.f32 %v961_v45, %v740_v30  ;;  %v6925_v31 = vpop.f32.mrf.mxu0 }
 0x128   : > { %v6961_v9 = vpop.f32.mrf.mxu1 }
 0x129   : > { %v8812_v36 = vadd.f32 %v6961_v9, %v6925_v31  ;;  %v743_v42 = vpop.f32.mrf.mxu0 }
 0x12a   : > { %v964_v27 = vpop.f32.mrf.mxu1 }
 0x12b   : > { %v8814_v29 = vadd.f32 %v964_v27, %v743_v42 }
 0x12c   : > { %v6964_v18 = vpop.f32.mrf.mxu1 }
 0x12d   : > { %v6928_v58 = vpop.f32.mrf.mxu0 }
 0x12e   : > { %v977_v55 = vpop.f32.mrf.mxu1  ;;  %v8816_v5 = vadd.f32 %v6964_v18, %v6928_v58 }
 0x12f   : > { %v756_v40 = vpop.f32.mrf.mxu0 }
 0x130   : > { %v6965_v13 = vpop.f32.mrf.mxu1  ;;  %v8818_v43 = vadd.f32 %v977_v55, %v756_v40 }
 0x131   : > { %v6929_v52 = vpop.f32.mrf.mxu0 }
 0x132   : > { %v980_v59 = vpop.f32.mrf.mxu1  ;;  %v8820_v0 = vadd.f32 %v6965_v13, %v6929_v52 }
 0x133   : > { %v759_v60 = vpop.f32.mrf.mxu0 }
 0x134   : > { %v7020_v4 = vpop.f32.mrf.mxu1  ;;  %v8822_v41 = vadd.f32 %v980_v59, %v759_v60 }
 0x136   : > { %v1418_v12 = vpop.f32.mrf.mxu1  ;;  %v6984_v22 = vpop.f32.mrf.mxu0 }
 0x137   : > { %v1295_v26 = vadd.f32 %v6984_v22, %v922_v35 }
 0x138   : > { %v7021_v3 = vpop.f32.mrf.mxu1  ;;  %v1214_v47 = vpop.f32.mrf.mxu0 }
 0x139   : > { %v1293_v61 = vadd.f32 %v1214_v47, %v914_v1  ;;  %v8824_v21 = vadd.f32 %v7020_v4, %v1295_v26 }
 0x13a   : > { %v1421_v14 = vpop.f32.mrf.mxu1  ;;  %v6985_v50 = vpop.f32.mrf.mxu0 }
 0x13b   : > { %v1296_v44 = vadd.f32 %v6985_v50, %v925_v23  ;;  %v8826_v24 = vadd.f32 %v1418_v12, %v1293_v61 }
 0x13c   : > { %v7024_v56 = vpop.f32.mrf.mxu1  ;;  %v1217_v20 = vpop.f32.mrf.mxu0 }
 0x13d   : > { %v1294_v6 = vadd.f32 %v1217_v20, %v8790_v33  ;;  %v8829_v49 = vadd.f32 %v7021_v3, %v1296_v44 }
 0x13e   : > { %v1434_v57 = vpop.f32.mrf.mxu1  ;;  %v6988_v32 = vpop.f32.mrf.mxu0 }
 0x13f   : > { %v1299_v35 = vadd.f32 %v6988_v32, %v8792_v38  ;;  %v8832_v34 = vadd.f32 %v1421_v14, %v1294_v6 }
 0x140   : > { %v7025_v1 = vpop.f32.mrf.mxu1  ;;  %v1230_v25 = vpop.f32.mrf.mxu0 }
 0x141   : > { %v1297_v48 = vadd.f32 %v1230_v25, %v8794_v19  ;;  %v8835_v53 = vadd.f32 %v7024_v56, %v1299_v35 }
 0x142   : > { %v1437_v23 = vpop.f32.mrf.mxu1  ;;  %v6989_v7 = vpop.f32.mrf.mxu0 }
 0x143   : > { %v1300_v17 = vadd.f32 %v6989_v7, %v8796_v15  ;;  %v8838_v2 = vadd.f32 %v1434_v57, %v1297_v48 }
 0x144   : > { %v7028_v33 = vpop.f32.mrf.mxu1  ;;  %v1233_v45 = vpop.f32.mrf.mxu0 }
 0x145   : > { %v1298_v30 = vadd.f32 %v1233_v45, %v8798_v46  ;;  %v8841_v9 = vadd.f32 %v7025_v1, %v1300_v17 }
 0x146   : > { %v1450_v38 = vpop.f32.mrf.mxu1  ;;  %v6992_v31 = vpop.f32.mrf.mxu0 }
 0x147   : > { %v1303_v27 = vadd.f32 %v6992_v31, %v8800_v51  ;;  %v8844_v42 = vadd.f32 %v1437_v23, %v1298_v30 }
 0x148   : > { %v7029_v19 = vpop.f32.mrf.mxu1  ;;  %v1246_v18 = vpop.f32.mrf.mxu0 }
 0x149   : > { %v1301_v55 = vadd.f32 %v1246_v18, %v8802_v10  ;;  %v8847_v58 = vadd.f32 %v7028_v33, %v1303_v27 }
 0x14a   : > { %v1453_v15 = vpop.f32.mrf.mxu1  ;;  %v6993_v13 = vpop.f32.mrf.mxu0 }
 0x14b   : > { %v1304_v40 = vadd.f32 %v6993_v13, %v8804_v37  ;;  %v8850_v59 = vadd.f32 %v1450_v38, %v1301_v55 }
 0x14c   : > { %v7032_v46 = vpop.f32.mrf.mxu1  ;;  %v1249_v52 = vpop.f32.mrf.mxu0 }
 0x14d   : > { %v1302_v4 = vadd.f32 %v1249_v52, %v8806_v63  ;;  %v8853_v60 = vadd.f32 %v7029_v19, %v1304_v40 }
 0x14e   : > { %v1466_v51 = vpop.f32.mrf.mxu1  ;;  %v6996_v12 = vpop.f32.mrf.mxu0 }
 0x14f   : > { %v1307_v22 = vadd.f32 %v6996_v12, %v8808_v54  ;;  %v8856_v26 = vadd.f32 %v1453_v15, %v1302_v4 }
 0x150   : > { %v7033_v10 = vpop.f32.mrf.mxu1  ;;  %v1262_v3 = vpop.f32.mrf.mxu0 }
 0x151   : > { %v1305_v47 = vadd.f32 %v1262_v3, %v8810_v62  ;;  %v8859_v61 = vadd.f32 %v7032_v46, %v1307_v22 }
 0x152   : > { %v1469_v37 = vpop.f32.mrf.mxu1  ;;  %v6997_v14 = vpop.f32.mrf.mxu0 }
 0x153   : > { %v1308_v50 = vadd.f32 %v6997_v14, %v8812_v36  ;;  %v8862_v44 = vadd.f32 %v1466_v51, %v1305_v47 }
 0x154   : > { %v7036_v63 = vpop.f32.mrf.mxu1  ;;  %v1265_v56 = vpop.f32.mrf.mxu0 }
 0x155   : > { %v1306_v20 = vadd.f32 %v1265_v56, %v8814_v29  ;;  %v1512_v6 = vadd.f32 %v7033_v10, %v1308_v50 }
 0x156   : > { %v1482_v54 = vpop.f32.mrf.mxu1  ;;  %v7000_v57 = vpop.f32.mrf.mxu0 }
 0x157   : > { %v1311_v32 = vadd.f32 %v7000_v57, %v8816_v5  ;;  %v1510_v35 = vadd.f32 %v1469_v37, %v1306_v20 }
 0x158   : > { %v7037_v1 = vpop.f32.mrf.mxu1  ;;  %v1278_v62 = vpop.f32.mrf.mxu0 }
 0x159   : > { %v1309_v25 = vadd.f32 %v1278_v62, %v8818_v43  ;;  %v1515_v48 = vadd.f32 %v7036_v63, %v1311_v32 }
 0x15a   : > { %v1485_v23 = vpop.f32.mrf.mxu1  ;;  %v7001_v7 = vpop.f32.mrf.mxu0 }
 0x15b   : > { %v1312_v36 = vadd.f32 %v7001_v7, %v8820_v0  ;;  %v1513_v17 = vadd.f32 %v1482_v54, %v1309_v25 }
 0x15c   : > { %v8868_v33 = vpop.f32.mrf.mxu1  ;;  %v1281_v45 = vpop.f32.mrf.mxu0 }
 0x15d   : > { %v1310_v29 = vadd.f32 %v1281_v45, %v8822_v41  ;;  %v1516_v30 = vadd.f32 %v7037_v1, %v1312_v36 }
 0x15e   : > { %v8871_v38 = vpop.f32.mrf.mxu1  ;;  %v7056_v5 = vpop.f32.mrf.mxu0 }
 0x15f   : > { %v1514_v31 = vadd.f32 %v1485_v23, %v1310_v29  ;;  %v8874_v27 = vadd.f32 %v7056_v5, %v8824_v21 }
 0x160   : > { %v8876_v43 = vpop.f32.mrf.mxu1  ;;  %v1644_v19 = vpop.f32.mrf.mxu0 }
 0x161   : > { %v8879_v18 = vadd.f32 %v1644_v19, %v8826_v24 }
 0x162   : > { %v8881_v0 = vpop.f32.mrf.mxu1  ;;  %v7057_v55 = vpop.f32.mrf.mxu0 }
 0x163   : > { %v8884_v15 = vadd.f32 %v7057_v55, %v8829_v49 }
 0x164   : > { %v8886_v41 = vpop.f32.mrf.mxu1  ;;  %v1647_v13 = vpop.f32.mrf.mxu0 }
 0x165   : > { %v8889_v40 = vadd.f32 %v1647_v13, %v8832_v34 }
 0x166   : > { %v8891_v21 = vpop.f32.mrf.mxu1  ;;  %v7060_v46 = vpop.f32.mrf.mxu0 }
 0x167   : > { %v8894_v52 = vadd.f32 %v7060_v46, %v8835_v53 }
 0x168   : > { %v8896_v24 = vpop.f32.mrf.mxu1  ;;  %v1660_v4 = vpop.f32.mrf.mxu0 }
 0x169   : > { %v8899_v51 = vadd.f32 %v1660_v4, %v8838_v2 }
 0x16a   : > { %v8901_v49 = vpop.f32.mrf.mxu1  ;;  %v7061_v12 = vpop.f32.mrf.mxu0 }
 0x16b   : > { %v8904_v22 = vadd.f32 %v7061_v12, %v8841_v9 }
 0x16c   : > { %v8906_v34 = vpop.f32.mrf.mxu1  ;;  %v1663_v10 = vpop.f32.mrf.mxu0 }
 0x16d   : > { %v8909_v3 = vadd.f32 %v1663_v10, %v8844_v42 }
 0x16e   : > { %v8911_v53 = vpop.f32.mrf.mxu1  ;;  %v7064_v47 = vpop.f32.mrf.mxu0 }
 0x16f   : > { %v8914_v37 = vadd.f32 %v7064_v47, %v8847_v58 }
 0x170   : > { %v8916_v2 = vpop.f32.mrf.mxu1  ;;  %v1676_v14 = vpop.f32.mrf.mxu0 }
 0x171   : > { %v8919_v50 = vadd.f32 %v1676_v14, %v8850_v59 }
 0x172   : > { %v8921_v9 = vpop.f32.mrf.mxu1  ;;  %v7065_v63 = vpop.f32.mrf.mxu0 }
 0x173   : > { %v8924_v56 = vadd.f32 %v7065_v63, %v8853_v60 }
 0x174   : > { %v8926_v42 = vpop.f32.mrf.mxu1  ;;  %v1679_v20 = vpop.f32.mrf.mxu0 }
 0x175   : > { %v8929_v54 = vadd.f32 %v1679_v20, %v8856_v26 }
 0x176   : > { %v8931_v58 = vpop.f32.mrf.mxu1  ;;  %v7068_v57 = vpop.f32.mrf.mxu0 }
 0x177   : > { %v8934_v32 = vadd.f32 %v7068_v57, %v8859_v61 }
 0x178   : > { %v8936_v59 = vpop.f32.mrf.mxu1  ;;  %v1692_v1 = vpop.f32.mrf.mxu0 }
 0x179   : > { %v8939_v62 = vadd.f32 %v1692_v1, %v8862_v44 }
 0x17a   : > { %v8941_v60 = vpop.f32.mrf.mxu1  ;;  %v7069_v25 = vpop.f32.mrf.mxu0 }
 0x17b   : > { %v8943_v23 = vadd.f32 %v7069_v25, %v1512_v6 }
 0x17c   : > { %v8945_v7 = vpop.f32.mrf.mxu1  ;;  %v1695_v26 = vpop.f32.mrf.mxu0 }
 0x17d   : > { %v8947_v36 = vadd.f32 %v1695_v26, %v1510_v35 }
 0x17e   : > { %v8949_v45 = vpop.f32.mrf.mxu1  ;;  %v7072_v61 = vpop.f32.mrf.mxu0 }
 0x17f   : > { %v8951_v29 = vadd.f32 %v7072_v61, %v1515_v48 }
 0x180   : > { %v8953_v5 = vpop.f32.mrf.mxu1  ;;  %v1708_v19 = vpop.f32.mrf.mxu0 }
 0x181   : > { %v8955_v44 = vadd.f32 %v1708_v19, %v1513_v17 }
 0x182   : > { %v8957_v55 = vpop.f32.mrf.mxu1  ;;  %v7073_v13 = vpop.f32.mrf.mxu0 }
 0x183   : > { %10069 = vst [vmem:[#allocation16_spill] sm:$0xff] %v8957_v55  ;;  %v8959_v6 = vadd.f32 %v7073_v13, %v1516_v30  ;;  %v1937_v55 = vadd.f32 %v8891_v21, %v8899_v51 }
 0x184   : > { %v8961_v46 = vpop.f32.mrf.mxu1  ;;  %v1711_v4 = vpop.f32.mrf.mxu0 }
 0x185   : > { %v8963_v35 = vadd.f32 %v1711_v4, %v1514_v31 }
 0x186   : > { %v8965_v12 = vpop.f32.mrf.mxu1  ;;  %v7128_v10 = vpop.f32.mrf.mxu0 }
 0x187   : > { %10070 = vst [vmem:[#allocation19_spill] sm:$0xff] %v8965_v12  ;;  %v1933_v12 = vadd.f32 %v8871_v38, %v8879_v18  ;;  %v1943_v38 = vadd.f32 %v8906_v34, %v8914_v37  ;;  %v1944_v18 = vadd.f32 %v8916_v2, %v8924_v56  ;;  %v1951_v37 = vadd.f32 %v8945_v7, %v8951_v29  ;;  %v9042_v29 = vld [vmem:[%s10002_s3] ss:$0 sm:$0xff] }
 0x188   : > { %v8967_v48 = vpop.f32.mrf.mxu1  ;;  %v2058_v47 = vpop.f32.mrf.mxu0 }
 0x189   : > { %10071 = vst [vmem:[#allocation22_spill] sm:$0xff] %v8967_v48  ;;  %v2137_v21 = vadd.f32 %v2058_v47, %v1933_v12 }
 0x18a   : > { %v8969_v14 = vpop.f32.mrf.mxu1  ;;  %v7129_v17 = vpop.f32.mrf.mxu0 }
 0x18b   : > { %10072 = vst [vmem:[#allocation30_spill] sm:$0xff] %v8969_v14 }
 0x18c   : > { %v8971_v63 = vpop.f32.mrf.mxu1  ;;  %v2061_v20 = vpop.f32.mrf.mxu0 }
 0x18d   : > { %10073 = vst [vmem:[#allocation31_spill] sm:$0xff] %v8971_v63 }
 0x18e   : > { %v8973_v57 = vpop.f32.mrf.mxu1  ;;  %v7132_v30 = vpop.f32.mrf.mxu0 }
 0x18f   : > { %10074 = vst [vmem:[#allocation32_spill] sm:$0xff] %v8973_v57 }
 0x190   : > { %v8975_v1 = vpop.f32.mrf.mxu1  ;;  %v2074_v25 = vpop.f32.mrf.mxu0 }
 0x191   : > { %10075 = vst [vmem:[#allocation33_spill] sm:$0xff] %v8975_v1 }
 0x192   : > { %v8977_v31 = vpop.f32.mrf.mxu1  ;;  %v7133_v26 = vpop.f32.mrf.mxu0  ;;  %v10086_v7 = vld [vmem:[#allocation30_spill] sm:$0xff] }
 0x193   : > { %10076 = vst [vmem:[#allocation34_spill] sm:$0xff] %v8977_v31 }
 0x194   : > { %v8979_v61 = vpop.f32.mrf.mxu1  ;;  %v2077_v19 = vpop.f32.mrf.mxu0 }
 0x195   : > { %10077 = vst [vmem:[#allocation35_spill] sm:$0xff] %v8979_v61  ;;  %v1935_v61 = vadd.f32 %v8868_v33, %v8874_v27  ;;  %v1938_v33 = vadd.f32 %v8901_v49, %v8909_v3  ;;  %v1945_v49 = vadd.f32 %v8931_v58, %v8939_v62  ;;  %v2141_v3 = vadd.f32 %v2074_v25, %v1937_v55  ;;  %v10083_v58 = vld [vmem:[#allocation16_spill] sm:$0xff] }
 0x196   : > { %v8981_v13 = vpop.f32.mrf.mxu1  ;;  %v7136_v4 = vpop.f32.mrf.mxu0  ;;  %v10088_v55 = vld [vmem:[#allocation32_spill] sm:$0xff] }
 0x197   : > { %10078 = vst [vmem:[#allocation36_spill] sm:$0xff] %v8981_v13  ;;  %v2142_v56 = vadd.f32 %v2077_v19, %v1938_v33 }
 0x198   : > { %v2090_v11 = vpop.f32.mrf.mxu0  ;;  %v8983_v16 = vpop.f32.mrf.mxu1 }
 0x199   : > { %10079 = vst [vmem:[#allocation37_spill] sm:$0xff] %v8983_v16  ;;  %v1936_v16 = vadd.f32 %v8876_v43, %v8884_v15  ;;  %v1941_v43 = vadd.f32 %v8911_v53, %v8919_v50  ;;  %v2139_v15 = vadd.f32 %v7128_v10, %v1935_v61  ;;  %v1946_v53 = vadd.f32 %v8941_v60, %v8947_v36  ;;  %v10085_v60 = vld [vmem:[#allocation22_spill] sm:$0xff] }
 0x19a   : > { %v7137_v8 = vpop.f32.mrf.mxu0  ;;  %v8985_v39 = vpop.f32.mrf.mxu1  ;;  %v1952_v50 = vadd.f32 %v8953_v5, %v8959_v6  ;;  %v10087_v5 = vld [vmem:[#allocation31_spill] sm:$0xff]  ;;  %v2367_v6 = vadd.f32 %v10088_v55, %v2141_v3 }
 0x19b   : > { %10080 = vst [vmem:[#allocation38_spill] sm:$0xff] %v8985_v39  ;;  %v1934_v39 = vadd.f32 %v8881_v0, %v8889_v40  ;;  %v1942_v0 = vadd.f32 %v8921_v9, %v8929_v54  ;;  %v1947_v40 = vadd.f32 %v8926_v42, %v8934_v32  ;;  %v2365_v9 = vadd.f32 %v8961_v46, %v2139_v15 }
 0x19c   : > { %v2093_v28 = vpop.f32.mrf.mxu0  ;;  %v8987_v1 = vpop.f32.mrf.mxu1  ;;  %v2147_v42 = vadd.f32 %v7136_v4, %v1943_v38  ;;  %v1950_v32 = vadd.f32 %v10083_v58, %v8963_v35  ;;  %v2145_v46 = vadd.f32 %v2090_v11, %v1941_v43  ;;  %v10089_v35 = vld [vmem:[#allocation33_spill] sm:$0xff]  ;;  %v10091_v25 = vld [vmem:[#allocation35_spill] sm:$0xff] }
 0x19d   : > { %10081 = vst [vmem:[#allocation39_spill] sm:$0xff] %v8987_v1  ;;  %v1939_v1 = vadd.f32 %v8886_v41, %v8894_v52  ;;  %v2140_v52 = vadd.f32 %v7129_v17, %v1936_v16  ;;  %v1949_v16 = vadd.f32 %v8949_v45, %v8955_v44  ;;  %v2146_v47 = vadd.f32 %v2093_v28, %v1942_v0 }
 0x19e   : > { %v7140_v57 = vpop.f32.mrf.mxu0  ;;  %v8989_v48 = vpop.f32.mrf.mxu1  ;;  %v10092_v28 = vld [vmem:[#allocation36_spill] sm:$0xff] }
 0x19f   : > { %10082 = vst [vmem:[#allocation40_spill] sm:$0xff] %v8989_v48  ;;  %v1940_v48 = vadd.f32 %v8896_v24, %v8904_v22  ;;  %v2138_v24 = vadd.f32 %v2061_v20, %v1934_v39  ;;  %v1948_v22 = vadd.f32 %v8936_v59, %v8943_v23  ;;  %v2143_v34 = vadd.f32 %v7132_v30, %v1939_v1  ;;  %v10084_v59 = vld [vmem:[#allocation19_spill] sm:$0xff]  ;;  %v10090_v30 = vld [vmem:[#allocation34_spill] sm:$0xff] }
 0x1a0   : > { %v2106_v63 = vpop.f32.mrf.mxu0  ;;  %v9015_v41 = vpop.f32.mrf.mxu1  ;;  %v2363_v62 = vadd.f32 %v10084_v59, %v2137_v21  ;;  %v2366_v23 = vadd.f32 %v10085_v60, %v2140_v52  ;;  %v2151_v17 = vadd.f32 %v7140_v57, %v1947_v40  ;;  %v9050_v1 = vadd.f32 %v10090_v30, %v2142_v56  ;;  %v10093_v40 = vld [vmem:[#allocation37_spill] sm:$0xff] }
 0x1a1   : > { %v2144_v39 = vadd.f32 %v7133_v26, %v1940_v48  ;;  %v2364_v36 = vadd.f32 %v10086_v7, %v2138_v24  ;;  %v2369_v44 = vadd.f32 %v10087_v5, %v2143_v34  ;;  %v2148_v48 = vadd.f32 %v7137_v8, %v1944_v18 }
 0x1a2   : > { %v7141_v14 = vpop.f32.mrf.mxu0  ;;  %v2335_v54 = vpop.f32.mrf.mxu1  ;;  %v9053_v26 = vadd.f32 %v10091_v25, %v2147_v42  ;;  %v2149_v4 = vadd.f32 %v2106_v63, %v1945_v49  ;;  %v9057_v57 = vadd.f32 %v10092_v28, %v2145_v46  ;;  %v10094_v52 = vld [vmem:[#allocation38_spill] sm:$0xff]  ;;  %v2919_v28 = vld [vmem:[#allocation2 + $0x14] sm:$0x1] }
 0x1a3   : > { %v9047_v10 = vadd.f32 %v10089_v35, %v2144_v39  ;;  %v2152_v33 = vadd.f32 %v7141_v14, %v1948_v22  ;;  %v9061_v21 = vadd.f32 %v10093_v40, %v2148_v48  ;;  %v9064_v24 = vadd.f32 %v10094_v52, %v2146_v47 }
 0x1a4   : > { %v2109_v31 = vpop.f32.mrf.mxu0  ;;  %v7180_v61 = vpop.f32.mrf.mxu1  ;;  %v10095_v14 = vld [vmem:[#allocation39_spill] sm:$0xff] }
 0x1a5   : > { %v2150_v38 = vadd.f32 %v2109_v31, %v1946_v53  ;;  %v9067_v63 = vadd.f32 %v10095_v14, %v2151_v17 }
 0x1a6   : > { %v7144_v13 = vpop.f32.mrf.mxu0  ;;  %v2348_v49 = vpop.f32.mrf.mxu1 }
 0x1a7   : > { %v2155_v43 = vadd.f32 %v7144_v13, %v1951_v37  ;;  %v10096_v37 = vld [vmem:[#allocation40_spill] sm:$0xff]  ;;  %v9076_v56 = vadd.f32 %v2335_v54, %v2150_v38 }
 0x1a8   : > { %v2122_v27 = vpop.f32.mrf.mxu0  ;;  %v9071_v39 = vadd.f32 %v10096_v37, %v2149_v4 }
 0x1a9   : > { %v2153_v31 = vadd.f32 %v2122_v27, %v1949_v16  ;;  %v9078_v42 = vadd.f32 %v7180_v61, %v2155_v43 }
 0x1aa   : > { %v9019_v51 = vpop.f32.mrf.mxu0 }
 0x1ab   : > { %v9081_v27 = vadd.f32 %v9019_v51, %v1952_v50  ;;  %v9083_v60 = vadd.f32 %v2348_v49, %v2153_v31  ;;  %v2915_v50 = vld [vmem:[#allocation2 + $0xc] sm:$0xf] }
 0x1ac   : > { %v2125_v2 = vpop.f32.mrf.mxu0 }
 0x1ae   : > { %v7200_v45 = vpop.f32.mrf.mxu0 }
 0x1af   : > { %v2575_v12 = vadd.f32 %v7200_v45, %v2365_v9  ;;  %v9074_v9 = vadd.f32 %v9015_v41, %v2152_v33 }
 0x1b0   : > { %v2494_v20 = vpop.f32.mrf.mxu0 }
 0x1b1   : > { %v2602_v19 = vadd.f32 %v9042_v29, %v2575_v12  ;;  %v2573_v11 = vadd.f32 %v2494_v20, %v2363_v62  ;;  %v2906_v20 = vld [vmem:[#allocation2] sm:$0xf] }
 0x1b2   : > { %v7201_v8 = vpop.f32.mrf.mxu0 }
 0x1b3   : > { %v2622_v18 = vmax.f32 %v2602_v19, 0.0  ;;  %v2600_v0 = vadd.f32 %v9042_v29, %v2573_v11  ;;  %v2576_v15 = vadd.f32 %v7201_v8, %v2366_v23  ;;  %v9085_v23 = vadd.f32 %v2125_v2, %v1950_v32 }
 0x1b4   : > { %v2497_v13 = vpop.f32.mrf.mxu0 }
 0x1b5   : > { %v6569_v22 = vpack.c.bf16 %v2622_v18, %v2622_v18  ;;  %v2620_v34 = vmax.f32 %v2600_v0, 0.0  ;;  %v2603_v3 = vadd.f32 %v9042_v29, %v2576_v15  ;;  %v2574_v53 = vadd.f32 %v2497_v13, %v2364_v36 }
 0x1b6   : > { %v7204_v58 = vpop.f32.mrf.mxu0 }
 0x1b7   : > { %v2721_v16 = vshrl.u32 %v6569_v22, 16  ;;  %v6567_v59 = vpack.c.bf16 %v2620_v34, %v2620_v34  ;;  %v2623_v62 = vmax.f32 %v2603_v3, 0.0  ;;  %v2601_v7 = vadd.f32 %v9042_v29, %v2574_v53 }
 0x1b8   : > { %v2579_v36 = vadd.f32 %v7204_v58, %v2369_v44  ;;  %v2510_v41 = vpop.f32.mrf.mxu0  ;;  %v2724_v54 = vshll.u32 %v6569_v22, 16 }
 0x1b9   : > { %v2723_v45 = vrot.slane %v2721_v16, 7  ;;  %v2704_v5 = vshrl.u32 %v6567_v59, 16  ;;  %v6570_v55 = vpack.c.bf16 %v2623_v62, %v2623_v62  ;;  %v2707_v46 = vshll.u32 %v6567_v59, 16  ;;  %v2912_v59 = vld [vmem:[#allocation2 + $0x8] sm:$0x1] }
 0x1ba   : > { %v2621_v12 = vmax.f32 %v2601_v7, 0.0  ;;  %v2606_v2 = vadd.f32 %v9042_v29, %v2579_v36  ;;  %v2577_v32 = vadd.f32 %v2510_v41, %v2367_v6  ;;  %v7205_v35 = vpop.f32.mrf.mxu0 }
 0x1bb   : > { %v2726_v48 = vor.u32 %v2724_v54, %v2723_v45  ;;  %v2727_v44 = vrot.slane %v2723_v45, 4  ;;  %v2706_v47 = vrot.slane %v2704_v5, 7  ;;  %v2729_v17 = vshrl.u32 %v6570_v55, 16  ;;  %v2929_v5 = vld [vmem:[#allocation2 + $0x24] sm:$0xf] }
 0x1bc   : > { %v2732_v30 = vshll.u32 %v6570_v55, 16  ;;  %v6568_v25 = vpack.c.bf16 %v2621_v12, %v2621_v12  ;;  %v2626_v61 = vmax.f32 %v2606_v2, 0.0  ;;  %v2604_v19 = vadd.f32 %v9042_v29, %v2577_v32  ;;  %v2513_v11 = vpop.f32.mrf.mxu0 }
 0x1bd   : > { %v2916_v6 = vsel %vm9090_vm11, %v2726_v48, %v2915_v50  ;;  %v2709_v33 = vor.u32 %v2707_v46, %v2706_v47  ;;  %v2710_v38 = vrot.slane %v2706_v47, 4  ;;  %v2731_v43 = vrot.slane %v2729_v17, 7 }
 0x1be   : > { %2917 = vst [vmem:[#allocation2 + $0xc] sm:$0xf] %v2916_v6  ;;  %v2712_v18 = vshrl.u32 %v6568_v25, 16  ;;  %v2715_v0 = vshll.u32 %v6568_v25, 16  ;;  %v6573_v15 = vpack.c.bf16 %v2626_v61, %v2626_v61  ;;  %v2624_v40 = vmax.f32 %v2604_v19, 0.0  ;;  %v7208_v52 = vpop.f32.mrf.mxu0 }
 0x1bf   : > { %v2907_v14 = vsel %vm9090_vm11, %v2709_v33, %v2906_v20  ;;  %v2734_v31 = vor.u32 %v2732_v30, %v2731_v43  ;;  %v2736_v13 = vrot.slane %v2731_v43, 4  ;;  %v2580_v49 = vadd.f32 %v7205_v35, %v9047_v10  ;;  %v2922_v61 = vld [vmem:[#allocation2 + $0x18] sm:$0xf] }
 0x1c0   : > { %2908 = vst [vmem:[#allocation2] sm:$0xf] %v2907_v14  ;;  %v2714_v22 = vrot.slane %v2712_v18, 7  ;;  %v2755_v34 = vshrl.u32 %v6573_v15, 16  ;;  %v2758_v3 = vshll.u32 %v6573_v15, 16  ;;  %v6571_v53 = vpack.c.bf16 %v2624_v40, %v2624_v40  ;;  %v2526_v37 = vpop.f32.mrf.mxu0 }
 0x1c1   : > { %v2735_v58 = vsel %vm9106_vm13, %v2727_v44, %v2734_v31  ;;  %v2920_v16 = vsel %vm9098_vm12, %v2736_v13, %v2919_v28  ;;  %v2607_v62 = vadd.f32 %v9042_v29, %v2580_v49  ;;  %v2578_v7 = vadd.f32 %v2513_v11, %v9050_v1 }
 0x1c2   : > { %2918 = vst [vmem:[#allocation2 + $0x10] sm:$0xf] %v2735_v58  ;;  %2921 = vst [vmem:[#allocation2 + $0x14] sm:$0x1] %v2920_v16  ;;  %v2717_v10 = vor.u32 %v2715_v0, %v2714_v22  ;;  %v2719_v36 = vrot.slane %v2714_v22, 4  ;;  %v9119_v41 = vrot.slane %v2755_v34, 7  ;;  %v7209_v54 = vpop.f32.mrf.mxu0  ;;  %v2583_v12 = vadd.f32 %v7208_v52, %v9053_v26 }
 0x1c3   : > { %v2738_v45 = vshrl.u32 %v6571_v53, 16  ;;  %v2741_v55 = vshll.u32 %v6571_v53, 16  ;;  %v2627_v50 = vmax.f32 %v2607_v62, 0.0  ;;  %v2605_v46 = vadd.f32 %v9042_v29, %v2578_v7 }
 0x1c4   : > { %v2718_v2 = vsel %vm9106_vm13, %v2710_v38, %v2717_v10  ;;  %v2913_v1 = vsel %vm9098_vm12, %v2719_v36, %v2912_v59  ;;  %v2760_v32 = vor.u32 %v2758_v3, %v9119_v41  ;;  %v2761_v35 = vrot.slane %v9119_v41, 4  ;;  %v2529_v48 = vpop.f32.mrf.mxu0  ;;  %v2933_v3 = vld [vmem:[#allocation2 + $0x2c] sm:$0x1] }
 0x1c5   : > { %v2981_v44 = vld [vmem:[#allocation2 + $0xc] sm:$0x1]  ;;  %2909 = vst [vmem:[#allocation2 + $0x4] sm:$0xf] %v2718_v2  ;;  %2914 = vst [vmem:[#allocation2 + $0x8] sm:$0x1] %v2913_v1  ;;  %v6574_v17 = vpack.c.bf16 %v2627_v50, %v2627_v50  ;;  %v2610_v26 = vadd.f32 %v9042_v29, %v2583_v12  ;;  %v2581_v19 = vadd.f32 %v2526_v37, %v9057_v57 }
 0x1c6   : > { %v9129_v47 = vrot.slane %v2738_v45, 7  ;;  %v2625_v20 = vmax.f32 %v2605_v46, 0.0  ;;  %v2982_v30 = vsel %vm9098_vm12, 0, %v2981_v44  ;;  %v2930_v25 = vsel %vm9090_vm11, %v2760_v32, %v2929_v5  ;;  %v9138_v6 = vpop.f32.mrf.mxu0  ;;  %v2926_v46 = vld [vmem:[#allocation2 + $0x20] sm:$0x1] }
 0x1c7   : > { %v2584_v11 = vadd.f32 %v7209_v54, %v9061_v21  ;;  %2983 = vst [vmem:[#allocation2 + $0xc] sm:$0x1] %v2982_v30  ;;  %v2978_v38 = vld [vmem:[#allocation2] sm:$0x1]  ;;  %2931 = vst [vmem:[#allocation2 + $0x24] sm:$0xf] %v2930_v25  ;;  %v2608_v40 = vadd.f32 %v9042_v29, %v2581_v19  ;;  %v2582_v22 = vadd.f32 %v2529_v48, %v9064_v24 }
 0x1c8   : > { %v2743_v43 = vor.u32 %v2741_v55, %v9129_v47  ;;  %v2744_v28 = vrot.slane %v9129_v47, 4  ;;  %v2763_v18 = vshrl.u32 %v6574_v17, 16  ;;  %v2766_v0 = vshll.u32 %v6574_v17, 16  ;;  %v2542_v52 = vpop.f32.mrf.mxu0  ;;  %v2943_v17 = vld [vmem:[#allocation2 + $0x3c] sm:$0xf] }
 0x1c9   : > { %v2979_v57 = vsel %vm9098_vm12, 0, %v2978_v38  ;;  %v6572_v21 = vpack.c.bf16 %v2625_v20, %v2625_v20  ;;  %v2630_v15 = vmax.f32 %v2610_v26, 0.0  ;;  %v3012_v14 = vld [vmem:[#allocation2 + $0x14] sm:$0x1]  ;;  %v2611_v49 = vadd.f32 %v9042_v29, %v2584_v11 }
 0x1ca   : > { %2980 = vst [vmem:[#allocation2] sm:$0x1] %v2979_v57  ;;  %v2923_v31 = vsel %vm9090_vm11, %v2743_v43, %v2922_v61  ;;  %v2765_v13 = vrot.slane %v2763_v18, 7  ;;  %v3013_v34 = vsel %vm9142_vm14, 0, %v3012_v14  ;;  %v2628_v62 = vmax.f32 %v2608_v40, 0.0  ;;  %v7213_v10 = vpop.f32.mrf.mxu0 }
 0x1cb   : > { %2924 = vst [vmem:[#allocation2 + $0x18] sm:$0xf] %v2923_v31  ;;  %v2746_v53 = vshrl.u32 %v6572_v21, 16  ;;  %v2749_v37 = vshll.u32 %v6572_v21, 16  ;;  %v6577_v58 = vpack.c.bf16 %v2630_v15, %v2630_v15  ;;  %3014 = vst [vmem:[#allocation2 + $0x14] sm:$0x1] %v3013_v34  ;;  %v2609_v24 = vadd.f32 %v9042_v29, %v2582_v22 }
 0x1cc   : > { %v2768_v16 = vor.u32 %v2766_v0, %v2765_v13  ;;  %v2770_v59 = vrot.slane %v2765_v13, 4  ;;  %v2631_v7 = vmax.f32 %v2611_v49, 0.0  ;;  %v3009_v36 = vld [vmem:[#allocation2 + $0x8] sm:$0x1]  ;;  %v6575_v12 = vpack.c.bf16 %v2628_v62, %v2628_v62  ;;  %v2545_v30 = vpop.f32.mrf.mxu0  ;;  %v2936_v40 = vld [vmem:[#allocation2 + $0x30] sm:$0xf]  ;;  %v7181_v62 = vpop.f32.mrf.mxu1 }
 0x1cd   : > { %v2748_v41 = vrot.slane %v2746_v53, 7  ;;  %v2789_v45 = vshrl.u32 %v6577_v58, 16  ;;  %v2792_v54 = vshll.u32 %v6577_v58, 16  ;;  %v3010_v5 = vsel %vm9142_vm14, 0, %v3009_v36  ;;  %v2940_v36 = vld [vmem:[#allocation2 + $0x38] sm:$0x1] }
 0x1ce   : > { %v2769_v55 = vsel %vm9106_vm13, %v2761_v35, %v2768_v16  ;;  %v2934_v50 = vsel %vm9098_vm12, %v2770_v59, %v2933_v3  ;;  %3011 = vst [vmem:[#allocation2 + $0x8] sm:$0x1] %v3010_v5  ;;  %v2987_v2 = vld [vmem:[#allocation2 + $0x24] sm:$0x1]  ;;  %v6578_v44 = vpack.c.bf16 %v2631_v7, %v2631_v7  ;;  %v2772_v20 = vshrl.u32 %v6575_v12, 16  ;;  %v7216_v34 = vpop.f32.mrf.mxu0 }
 0x1cf   : > { %2932 = vst [vmem:[#allocation2 + $0x28] sm:$0xf] %v2769_v55  ;;  %2935 = vst [vmem:[#allocation2 + $0x2c] sm:$0x1] %v2934_v50  ;;  %v2751_v1 = vor.u32 %v2749_v37, %v2748_v41  ;;  %v2753_v32 = vrot.slane %v2748_v41, 4  ;;  %v2791_v48 = vrot.slane %v2789_v45, 7  ;;  %v2585_v14 = vadd.f32 %v2542_v52, %v9071_v39 }
 0x1d0   : > { %v2988_v47 = vsel %vm9098_vm12, 0, %v2987_v2  ;;  %v2775_v26 = vshll.u32 %v6575_v12, 16  ;;  %v2629_v35 = vmax.f32 %v2609_v24, 0.0  ;;  %v2774_v43 = vrot.slane %v2772_v20, 7  ;;  %v2947_v3 = vld [vmem:[#allocation2 + $0x44] sm:$0x1]  ;;  %v2558_v55 = vpop.f32.mrf.mxu0  ;;  %v2351_v20 = vpop.f32.mrf.mxu1 }
 0x1d1   : > { %2989 = vst [vmem:[#allocation2 + $0x24] sm:$0x1] %v2988_v47  ;;  %v2752_v25 = vsel %vm9106_vm13, %v2744_v28, %v2751_v1  ;;  %v2927_v61 = vsel %vm9098_vm12, %v2753_v32, %v2926_v46  ;;  %v2794_v19 = vor.u32 %v2792_v54, %v2791_v48  ;;  %v2795_v11 = vrot.slane %v2791_v48, 4 }
 0x1d2   : > { %v2984_v38 = vld [vmem:[#allocation2 + $0x18] sm:$0x1]  ;;  %2925 = vst [vmem:[#allocation2 + $0x1c] sm:$0xf] %v2752_v25  ;;  %2928 = vst [vmem:[#allocation2 + $0x20] sm:$0x1] %v2927_v61  ;;  %v6576_v57 = vpack.c.bf16 %v2629_v35, %v2629_v35  ;;  %v2587_v28 = vadd.f32 %v9138_v6, %v9067_v63  ;;  %v2777_v31 = vor.u32 %v2775_v26, %v2774_v43 }
 0x1d3   : > { %v2797_v18 = vshrl.u32 %v6578_v44, 16  ;;  %v2800_v0 = vshll.u32 %v6578_v44, 16  ;;  %v2985_v21 = vsel %vm9098_vm12, 0, %v2984_v38  ;;  %v2944_v15 = vsel %vm9090_vm11, %v2794_v19, %v2943_v17  ;;  %v2957_v61 = vld [vmem:[#allocation2 + $0x54] sm:$0xf] }
 0x1d4   : > { %2986 = vst [vmem:[#allocation2 + $0x18] sm:$0x1] %v2985_v21  ;;  %2945 = vst [vmem:[#allocation2 + $0x3c] sm:$0xf] %v2944_v15  ;;  %v2778_v13 = vrot.slane %v2774_v43, 4  ;;  %v2780_v22 = vshrl.u32 %v6576_v57, 16  ;;  %v2614_v37 = vadd.f32 %v9042_v29, %v2587_v28  ;;  %v2612_v58 = vadd.f32 %v9042_v29, %v2585_v14 }
 0x1d5   : > { %v2799_v49 = vrot.slane %v2797_v18, 7  ;;  %v2783_v53 = vshll.u32 %v6576_v57, 16  ;;  %v2588_v16 = vadd.f32 %v7213_v10, %v9074_v9  ;;  %v2937_v63 = vsel %vm9090_vm11, %v2777_v31, %v2936_v40 }
 0x1d6   : > { %v3018_v59 = vld [vmem:[#allocation2 + $0x2c] sm:$0x1]  ;;  %v2782_v52 = vrot.slane %v2780_v22, 7  ;;  %2938 = vst [vmem:[#allocation2 + $0x30] sm:$0xf] %v2937_v63  ;;  %v2634_v41 = vmax.f32 %v2614_v37, 0.0  ;;  %v2586_v1 = vadd.f32 %v2545_v30, %v9076_v56  ;;  %v2591_v47 = vadd.f32 %v7216_v34, %v9078_v42  ;;  %v7217_v42 = vpop.f32.mrf.mxu0 }
 0x1d7   : > { %v2802_v39 = vor.u32 %v2800_v0, %v2799_v49  ;;  %v2804_v6 = vrot.slane %v2799_v49, 4  ;;  %v3019_v7 = vsel %vm9142_vm14, 0, %v3018_v59  ;;  %v2632_v45 = vmax.f32 %v2612_v58, 0.0  ;;  %v2950_v0 = vld [vmem:[#allocation2 + $0x48] sm:$0xf] }
 0x1d8   : > { %v2615_v54 = vadd.f32 %v9042_v29, %v2588_v16  ;;  %3020 = vst [vmem:[#allocation2 + $0x2c] sm:$0x1] %v3019_v7  ;;  %v2785_v24 = vor.u32 %v2783_v53, %v2782_v52  ;;  %v2787_v5 = vrot.slane %v2782_v52, 4  ;;  %v6581_v46 = vpack.c.bf16 %v2634_v41, %v2634_v41  ;;  %v2961_v59 = vld [vmem:[#allocation2 + $0x5c] sm:$0x1] }
 0x1d9   : > { %v2803_v9 = vsel %vm9106_vm13, %v2795_v11, %v2802_v39  ;;  %v2948_v10 = vsel %vm9098_vm12, %v2804_v6, %v2947_v3  ;;  %v3015_v50 = vld [vmem:[#allocation2 + $0x20] sm:$0x1]  ;;  %v6579_v12 = vpack.c.bf16 %v2632_v45, %v2632_v45  ;;  %v2382_v17 = vadd.f32 %v7181_v62, %v9081_v27 }
 0x1da   : > { %2946 = vst [vmem:[#allocation2 + $0x40] sm:$0xf] %v2803_v9  ;;  %2949 = vst [vmem:[#allocation2 + $0x44] sm:$0x1] %v2948_v10  ;;  %v2635_v2 = vmax.f32 %v2615_v54, 0.0  ;;  %v3016_v32 = vsel %vm9142_vm14, 0, %v3015_v50  ;;  %v2786_v48 = vsel %vm9106_vm13, %v2778_v13, %v2785_v24  ;;  %v2941_v44 = vsel %vm9098_vm12, %v2787_v5, %v2940_v36  ;;  %v2561_v36 = vpop.f32.mrf.mxu0 }
 0x1db   : > { %3017 = vst [vmem:[#allocation2 + $0x20] sm:$0x1] %v3016_v32  ;;  %v2993_v26 = vld [vmem:[#allocation2 + $0x3c] sm:$0x1]  ;;  %2939 = vst [vmem:[#allocation2 + $0x34] sm:$0xf] %v2786_v48  ;;  %v2613_v11 = vadd.f32 %v9042_v29, %v2586_v1  ;;  %v2618_v38 = vadd.f32 %v9042_v29, %v2591_v47  ;;  %v2589_v57 = vadd.f32 %v2558_v55, %v9083_v60 }
 0x1dc   : > { %2942 = vst [vmem:[#allocation2 + $0x38] sm:$0x1] %v2941_v44  ;;  %v2823_v35 = vshrl.u32 %v6581_v46, 16  ;;  %v2826_v56 = vshll.u32 %v6581_v46, 16  ;;  %v2806_v30 = vshrl.u32 %v6579_v12, 16  ;;  %v2994_v25 = vsel %vm9098_vm12, 0, %v2993_v26 }
 0x1dd   : > { %v6582_v19 = vpack.c.bf16 %v2635_v2, %v2635_v2  ;;  %2995 = vst [vmem:[#allocation2 + $0x3c] sm:$0x1] %v2994_v25  ;;  %v2809_v18 = vshll.u32 %v6579_v12, 16  ;;  %v2380_v21 = vadd.f32 %v2351_v20, %v9085_v23  ;;  %v2990_v15 = vld [vmem:[#allocation2 + $0x30] sm:$0x1]  ;;  %v2633_v28 = vmax.f32 %v2613_v11, 0.0 }
 0x1de   : > { %v2825_v27 = vrot.slane %v2823_v35, 7  ;;  %v2808_v43 = vrot.slane %v2806_v30, 7  ;;  %v2638_v14 = vmax.f32 %v2618_v38, 0.0  ;;  %v2991_v31 = vsel %vm9098_vm12, 0, %v2990_v15  ;;  %v2954_v50 = vld [vmem:[#allocation2 + $0x50] sm:$0x1] }
 0x1df   : > { %v2831_v40 = vshrl.u32 %v6582_v19, 16  ;;  %v2592_v22 = vadd.f32 %v7217_v42, %v2382_v17  ;;  %2992 = vst [vmem:[#allocation2 + $0x30] sm:$0x1] %v2991_v31  ;;  %v2834_v53 = vshll.u32 %v6582_v19, 16  ;;  %v6580_v37 = vpack.c.bf16 %v2633_v28, %v2633_v28  ;;  %v2971_v47 = vld [vmem:[#allocation2 + $0x6c] sm:$0xf] }
 0x1e0   : > { %v2828_v13 = vor.u32 %v2826_v56, %v2825_v27  ;;  %v2811_v49 = vor.u32 %v2809_v18, %v2808_v43  ;;  %v6585_v58 = vpack.c.bf16 %v2638_v14, %v2638_v14  ;;  %v2616_v63 = vadd.f32 %v9042_v29, %v2589_v57  ;;  %v2964_v18 = vld [vmem:[#allocation2 + $0x60] sm:$0xf]  ;;  %v2975_v31 = vld [vmem:[#allocation2 + $0x74] sm:$0x1] }
 0x1e1   : > { %v3024_v34 = vld [vmem:[#allocation2 + $0x44] sm:$0x1]  ;;  %v2833_v3 = vrot.slane %v2831_v40, 7  ;;  %v2829_v6 = vrot.slane %v2825_v27, 4  ;;  %v2814_v7 = vshrl.u32 %v6580_v37, 16  ;;  %v2817_v45 = vshll.u32 %v6580_v37, 16 }
 0x1e2   : > { %v3025_v60 = vsel %vm9142_vm14, 0, %v3024_v34  ;;  %v2958_v23 = vsel %vm9090_vm11, %v2828_v13, %v2957_v61  ;;  %v2951_v16 = vsel %vm9090_vm11, %v2811_v49, %v2950_v0  ;;  %v2857_v54 = vshrl.u32 %v6585_v58, 16 }
 0x1e3   : > { %3026 = vst [vmem:[#allocation2 + $0x44] sm:$0x1] %v3025_v60  ;;  %v3021_v39 = vld [vmem:[#allocation2 + $0x38] sm:$0x1]  ;;  %2959 = vst [vmem:[#allocation2 + $0x54] sm:$0xf] %v2958_v23  ;;  %v2836_v52 = vor.u32 %v2834_v53, %v2833_v3  ;;  %v2619_v55 = vadd.f32 %v9042_v29, %v2592_v22  ;;  %v2590_v1 = vadd.f32 %v2561_v36, %v2380_v21 }
 0x1e4   : > { %2952 = vst [vmem:[#allocation2 + $0x48] sm:$0xf] %v2951_v16  ;;  %v2838_v62 = vrot.slane %v2833_v3, 4  ;;  %v3022_v41 = vsel %vm9142_vm14, 0, %v3021_v39  ;;  %v2636_v9 = vmax.f32 %v2616_v63, 0.0  ;;  %v2816_v5 = vrot.slane %v2814_v7, 7 }
 0x1e5   : > { %3023 = vst [vmem:[#allocation2 + $0x38] sm:$0x1] %v3022_v41  ;;  %v2837_v10 = vsel %vm9106_vm13, %v2829_v6, %v2836_v52  ;;  %v2859_v46 = vrot.slane %v2857_v54, 7  ;;  %v2860_v12 = vshll.u32 %v6585_v58, 16  ;;  %v2812_v32 = vrot.slane %v2808_v43, 4 }
 0x1e6   : > { %v2962_v24 = vsel %vm9098_vm12, %v2838_v62, %v2961_v59  ;;  %2960 = vst [vmem:[#allocation2 + $0x58] sm:$0xf] %v2837_v10  ;;  %v6583_v2 = vpack.c.bf16 %v2636_v9, %v2636_v9  ;;  %v2819_v48 = vor.u32 %v2817_v45, %v2816_v5  ;;  %v2821_v44 = vrot.slane %v2816_v5, 4  ;;  %v2968_v63 = vld [vmem:[#allocation2 + $0x68] sm:$0x1] }
 0x1e7   : > { %2963 = vst [vmem:[#allocation2 + $0x5c] sm:$0x1] %v2962_v24  ;;  %v2639_v17 = vmax.f32 %v2619_v55, 0.0  ;;  %v2862_v20 = vor.u32 %v2860_v12, %v2859_v46  ;;  %v2617_v25 = vadd.f32 %v9042_v29, %v2590_v1  ;;  %v2863_v49 = vrot.slane %v2859_v46, 4 }
 0x1e8   : > { %v2840_v26 = vshrl.u32 %v6583_v2, 16  ;;  %v2820_v35 = vsel %vm9106_vm13, %v2812_v32, %v2819_v48  ;;  %v2955_v56 = vsel %vm9098_vm12, %v2821_v44, %v2954_v50  ;;  %v2843_v42 = vshll.u32 %v6583_v2, 16 }
 0x1e9   : > { %v6586_v30 = vpack.c.bf16 %v2639_v17, %v2639_v17  ;;  %2953 = vst [vmem:[#allocation2 + $0x4c] sm:$0xf] %v2820_v35  ;;  %2956 = vst [vmem:[#allocation2 + $0x50] sm:$0x1] %v2955_v56  ;;  %v2972_v11 = vsel %vm9090_vm11, %v2862_v20, %v2971_v47  ;;  %v2637_v57 = vmax.f32 %v2617_v25, 0.0 }
 0x1ea   : > { %v2999_v61 = vld [vmem:[#allocation2 + $0x54] sm:$0x1]  ;;  %v2842_v38 = vrot.slane %v2840_v26, 7  ;;  %2973 = vst [vmem:[#allocation2 + $0x6c] sm:$0xf] %v2972_v11 }
 0x1eb   : > { %v2996_v19 = vld [vmem:[#allocation2 + $0x48] sm:$0x1]  ;;  %v3000_v27 = vsel %vm9098_vm12, 0, %v2999_v61  ;;  %v2865_v0 = vshrl.u32 %v6586_v30, 16  ;;  %v2868_v40 = vshll.u32 %v6586_v30, 16  ;;  %v6584_v13 = vpack.c.bf16 %v2637_v57, %v2637_v57 }
 0x1ec   : > { %v2997_v43 = vsel %vm9098_vm12, 0, %v2996_v19  ;;  %3001 = vst [vmem:[#allocation2 + $0x54] sm:$0x1] %v3000_v27  ;;  %v2845_v29 = vor.u32 %v2843_v42, %v2842_v38  ;;  %v2846_v39 = vrot.slane %v2842_v38, 4 }
 0x1ed   : > { %2998 = vst [vmem:[#allocation2 + $0x48] sm:$0x1] %v2997_v43  ;;  %v2867_v15 = vrot.slane %v2865_v0, 7  ;;  %v2848_v3 = vshrl.u32 %v6584_v13, 16  ;;  %v2851_v16 = vshll.u32 %v6584_v13, 16 }
 0x1ee   : > { %v3030_v21 = vld [vmem:[#allocation2 + $0x5c] sm:$0x1]  ;;  %v2965_v14 = vsel %vm9090_vm11, %v2845_v29, %v2964_v18 }
 0x1ef   : > { %v3031_v28 = vsel %vm9142_vm14, 0, %v3030_v21  ;;  %2966 = vst [vmem:[#allocation2 + $0x60] sm:$0xf] %v2965_v14  ;;  %v2870_v22 = vor.u32 %v2868_v40, %v2867_v15  ;;  %v2872_v34 = vrot.slane %v2867_v15, 4  ;;  %v2850_v23 = vrot.slane %v2848_v3, 7 }
 0x1f0   : > { %3032 = vst [vmem:[#allocation2 + $0x5c] sm:$0x1] %v3031_v28  ;;  %v3027_v53 = vld [vmem:[#allocation2 + $0x50] sm:$0x1] }
 0x1f1   : > { %v2871_v37 = vsel %vm9106_vm13, %v2863_v49, %v2870_v22  ;;  %v2976_v58 = vsel %vm9098_vm12, %v2872_v34, %v2975_v31  ;;  %v3028_v60 = vsel %vm9142_vm14, 0, %v3027_v53  ;;  %v3005_v51 = vld [vmem:[#allocation2 + $0x6c] sm:$0x1]  ;;  %v2853_v6 = vor.u32 %v2851_v16, %v2850_v23 }
 0x1f2   : > { %2974 = vst [vmem:[#allocation2 + $0x70] sm:$0xf] %v2871_v37  ;;  %2977 = vst [vmem:[#allocation2 + $0x74] sm:$0x1] %v2976_v58  ;;  %v3006_v59 = vsel %vm9098_vm12, 0, %v3005_v51  ;;  %v2855_v52 = vrot.slane %v2850_v23, 4 }
 0x1f3   : > { %3029 = vst [vmem:[#allocation2 + $0x50] sm:$0x1] %v3028_v60  ;;  %3007 = vst [vmem:[#allocation2 + $0x6c] sm:$0x1] %v3006_v59  ;;  %v2854_v7 = vsel %vm9106_vm13, %v2846_v39, %v2853_v6 }
 0x1f4   : > { %v2969_v36 = vsel %vm9098_vm12, %v2855_v52, %v2968_v63  ;;  %2967 = vst [vmem:[#allocation2 + $0x64] sm:$0xf] %v2854_v7 }
 0x1f5   : > { %2970 = vst [vmem:[#allocation2 + $0x68] sm:$0x1] %v2969_v36 }
 0x1f6   : > { %v3002_v62 = vld [vmem:[#allocation2 + $0x60] sm:$0x1] }
 0x1f7   : > { %v3003_v41 = vsel %vm9098_vm12, 0, %v3002_v62 }
 0x1f8   : > { %3004 = vst [vmem:[#allocation2 + $0x60] sm:$0x1] %v3003_v41 }
 0x1f9   : > { %v3036_v45 = vld [vmem:[#allocation2 + $0x74] sm:$0x1] }
 0x1fa   : > { %v3037_v54 = vsel %vm9142_vm14, 0, %v3036_v45  ;;  %3042 = sbr.rel (%p6388_p10) target bundleno = 514 (0x202), region = 48 }
 0x1fb   : > { %3038 = vst [vmem:[#allocation2 + $0x74] sm:$0x1] %v3037_v54 }
 0x1fc   : > { %v3033_v9 = vld [vmem:[#allocation2 + $0x68] sm:$0x1] }
 0x1fd   : > { %v3034_v10 = vsel %vm9142_vm14, 0, %v3033_v9 }
 0x1fe   : > { %3035 = vst [vmem:[#allocation2 + $0x68] sm:$0x1] %v3034_v10 }
 0x1ff   : > { %v7902_v4 = vmov 0  }
 0x200   : > { %3043 = vst [vmem:[#allocation2] sm:$0xf] %v7902_v4  ;;  %3044 = vst [vmem:[#allocation2 + $0x4] sm:$0xf] %v7902_v4 }
 0x201   : > { %3045 = vst [vmem:[#allocation2 + $0x8] sm:$0x1] %v7902_v4 }
 0x202 PF: > { %p6389_p12 = scmp.ne.s32.totalorder %s7881_s21, 1 }
 0x204   : > { %3049 = sbr.rel (%p6389_p12) target bundleno = 524 (0x20c), region = 52 }
 0x209   : > { %v7903_v8 = vmov 0  }
 0x20a   : > { %3051 = vst [vmem:[#allocation2 + $0x6c] sm:$0xf] %v7903_v8  ;;  %3052 = vst [vmem:[#allocation2 + $0x70] sm:$0xf] %v7903_v8 }
 0x20b   : > { %3053 = vst [vmem:[#allocation2 + $0x74] sm:$0x1] %v7903_v8 }
 0x20c PF: > { %v7679_v33 = vld [vmem:[#allocation3 + $0x78] sm:$0xff]   ;;  %v7680_v24 = vld [vmem:[#allocation3 + $0x70] sm:$0xff]   ;;  %v7681_v5 = vld [vmem:[#allocation3 + $0x68] sm:$0xff]   ;;  %s6587_s14 = sshll.u32 %s7881_s21, 4  ;;  %s6562_s26 = sshll.u32 %s7885_s22, 5 }
 0x20d   : > { %7218 = vmatprep.subr.bf16.mxu1 %v7679_v33  ;;  %v7682_v55 = vld [vmem:[#allocation3 + $0x60] sm:$0xff]   ;;  %v7687_v50 = vld [vmem:[#allocation3 + $0xb8] sm:$0xff]   ;;  %v9258_v46 = vld [vmem:[#allocation2] sm:$0xf]  ;;  %s6014_s15 = sadd.s32 %s6587_s14, %s6562_s26  ;;  %s6017_s22 = sshll.u32 %s9254_s2, 4  ;;  %s9942_s22 = int_to_ptr.vmem [resolvable:$true] %s6017_s22 }
 0x20e   : > { %7219 = vmatpush3.bf16.msra.mxu1 %v7679_v33  ;;  %v9260_v12 = vld [vmem:[#allocation2 + $0x4] sm:$0xf]  ;;  %v9262_v2 = vld [vmem:[#allocation2 + $0x8] sm:$0x1]  ;;  %v7683_v1 = vld [vmem:[#allocation3 + $0x58] sm:$0xff]   ;;  %7282 = vmatprep.subr.bf16.mxu0 %v7687_v50  ;;  %v3095_v32 = vshrl.u32 %v9258_v46, 16 }
 0x20f   : > { %7220 = vmatprep.subr.bf16.mxu1 %v7680_v24  ;;  %v3098_v48 = vshll.u32 %v9258_v46, 16  ;;  %v3104_v44 = vshll.u32 %v9260_v12, 16  ;;  %v3108_v47 = vshrl.u32 %v9260_v12, 16  ;;  %v9268_v17 = vld [vmem:[#allocation2 + $0xc] sm:$0xf]  ;;  %7283 = vmatpush3.bf16.msra.mxu0 %v7687_v50  ;;  %v3114_v20 = vshll.u32 %v9262_v2, 16 }
 0x210   : > { %v9271_v26 = vld [vmem:[#allocation2 + $0x10] sm:$0xf]  ;;  %v9273_v35 = vld [vmem:[#allocation2 + $0x14] sm:$0x1]  ;;  %v3119_v56 = vshrl.u32 %v9268_v17, 16  ;;  %v3097_v30 = vrot.slane %v3095_v32, 4 }
 0x211   : > { %v3100_v25 = vrot.slane %v3098_v48, 5  ;;  %v3106_v61 = vrot.slane %v3104_v44, 5  ;;  %v3110_v19 = vrot.slane %v3108_v47, 4  ;;  %v3116_v11 = vrot.slane %v3114_v20, 5  ;;  %v7689_v57 = vld [vmem:[#allocation3 + $0xb0] sm:$0xff]   ;;  %v7691_v37 = vld [vmem:[#allocation3 + $0xa8] sm:$0xff]  }
 0x212   : > { %7221 = vmatpush3.bf16.msra.mxu1 %v7680_v24  ;;  %v3121_v38 = vrot.slane %v3119_v56, 4  ;;  %v3122_v42 = vshll.u32 %v9268_v17, 16  ;;  %v3128_v27 = vshll.u32 %v9271_v26, 16  ;;  %v3132_v0 = vshrl.u32 %v9271_v26, 16  ;;  %v7684_v40 = vld [vmem:[#allocation3 + $0x50] sm:$0xff]   ;;  %7284 = vmatprep.subr.bf16.mxu0 %v7689_v57  ;;  %v7685_v23 = vld [vmem:[#allocation3 + $0x48] sm:$0xff]  }
 0x213   : > { %7222 = vmatprep.subr.bf16.mxu1 %v7681_v5  ;;  %v3101_v43 = vor.u32 %v3100_v25, %v3097_v30  ;;  %v3111_v18 = vor.u32 %v3110_v19, %v3106_v61  ;;  %v3138_v29 = vshll.u32 %v9273_v35, 16  ;;  %7285 = vmatpush3.bf16.msra.mxu0 %v7689_v57  ;;  %v9287_v58 = vld [vmem:[#allocation2 + $0x18] sm:$0xf]  ;;  %v9289_v60 = vld [vmem:[#allocation2 + $0x1c] sm:$0xf]  ;;  %v3699_v51 = vrot.slane %v9260_v12, 5 }
 0x214   : > { %v3124_v21 = vrot.slane %v3122_v42, 5  ;;  %v9280_v15 = vrot.slane %v3128_v27, 5  ;;  %v3134_v31 = vrot.slane %v3132_v0, 4  ;;  %v9292_v63 = vld [vmem:[#allocation2 + $0x20] sm:$0x1]  ;;  %v3143_v39 = vshrl.u32 %v9287_v58, 16  ;;  %7286 = vmatprep.subr.bf16.mxu0 %v7691_v37 }
 0x215   : > { %v3102_v28 = vrot.slane %v3101_v43, 4  ;;  %v3112_v14 = vrot.slane %v3111_v18, 4  ;;  %v3140_v49 = vrot.slane %v3138_v29, 5  ;;  %v3146_v6 = vshll.u32 %v9287_v58, 16  ;;  %v9299_v41 = vld [vmem:[#allocation2 + $0x24] sm:$0xf] }
 0x216   : > { %7223 = vmatpush3.bf16.msra.mxu1 %v7681_v5  ;;  %v3125_v13 = vor.u32 %v3124_v21, %v3121_v38  ;;  %v3135_v53 = vor.u32 %v3134_v31, %v9280_v15  ;;  %v3152_v62 = vshll.u32 %v9289_v60, 16  ;;  %v3156_v7 = vshrl.u32 %v9289_v60, 16  ;;  %v9301_v9 = vld [vmem:[#allocation2 + $0x28] sm:$0xf]  ;;  %v9303_v10 = vld [vmem:[#allocation2 + $0x2c] sm:$0x1] }
 0x217   : > { %7224 = vmatprep.subr.bf16.mxu1 %v7682_v55  ;;  %v3107_v34 = vsel %vm8127_vm2, %v3102_v28, %v3106_v61  ;;  %v3117_v3 = vsel %vm8127_vm2, %v3112_v14, %v3116_v11  ;;  %v3162_v36 = vshll.u32 %v9292_v63, 16  ;;  %7287 = vmatpush3.bf16.msra.mxu0 %v7691_v37  ;;  %v3145_v45 = vrot.slane %v3143_v39, 4  ;;  %v7693_v5 = vld [vmem:[#allocation3 + $0xa0] sm:$0xff]   ;;  %v7695_v19 = vld [vmem:[#allocation3 + $0x98] sm:$0xff]   ;;  %v7690_v37 = vld [vmem:[#allocation3 + $0x30] sm:$0xff]   ;;  %s6563_s21 = sshll.u32 %s6014_s15, 7 }
 0x218   : > { %v6390_v16 = vcombine.low %v3107_v34, %v3117_v3  ;;  %v3126_v59 = vrot.slane %v3125_v13, 4  ;;  %v3136_v52 = vrot.slane %v3135_v53, 4  ;;  %v3148_v54 = vrot.slane %v3146_v6, 5  ;;  %v7686_v48 = vld [vmem:[#allocation3 + $0x40] sm:$0xff]   ;;  %7288 = vmatprep.subr.bf16.mxu0 %v7693_v5  ;;  %v7688_v11 = vld [vmem:[#allocation3 + $0x38] sm:$0xff]   ;;  %s9940_s12 = scalar_lea.hbm %s10004_s5, %s6563_s21  ;;  %s10153_s27 = sand.u32 1, %s7873_s19  }
 0x219   : > { %v3154_v8 = vrot.slane %v3152_v62, 5  ;;  %v3158_v33 = vrot.slane %v3156_v7, 4  ;;  %v3164_v24 = vrot.slane %v3162_v36, 5  ;;  %v3170_v32 = vshll.u32 %v9299_v41, 16  ;;  %v9320_v57 = vld [vmem:[#allocation2 + $0x30] sm:$0xf] }
 0x21a   : > { %7225 = vmatpush3.bf16.msra.mxu1 %v7682_v55  ;;  %7234 = vmatprep.mubr.bf16.mxu1 %v6390_v16  ;;  %v3131_v4 = vsel %vm8127_vm2, %v3126_v59, %v9280_v15  ;;  %v3141_v55 = vsel %vm8127_vm2, %v3136_v52, %v3140_v49  ;;  %v3149_v50 = vor.u32 %v3148_v54, %v3145_v45  ;;  %v3176_v47 = vshll.u32 %v9301_v9, 16  ;;  %v9327_v28 = vld [vmem:[#allocation2 + $0x38] sm:$0x1]  ;;  %v9333_v53 = vld [vmem:[#allocation2 + $0x3c] sm:$0xf]  ;;  %v7697_v54 = vld [vmem:[#allocation3 + $0x90] sm:$0xff]  }
 0x21b   : > { %7226 = vmatprep.subr.bf16.mxu1 %v7683_v1  ;;  %v3159_v44 = vor.u32 %v3158_v33, %v3154_v8  ;;  %v3180_v20 = vshrl.u32 %v9301_v9, 16  ;;  %v3186_v56 = vshll.u32 %v9303_v10, 16  ;;  %v3172_v61 = vrot.slane %v3170_v32, 5  ;;  %7289 = vmatpush3.bf16.msra.mxu0 %v7693_v5  ;;  %v9336_v6 = vld [vmem:[#allocation2 + $0x40] sm:$0xf]  ;;  %s9948_s30 = scalar_lea.sflag [#allocation5], %s10153_s27 }
 0x21c   : > { %v3150_v30 = vrot.slane %v3149_v50, 4  ;;  %v9315_v42 = vrot.slane %v3176_v47, 5  ;;  %v3702_v43 = vrot.slane %v9262_v2, 5  ;;  %v6391_v18 = vcombine.low %v3131_v4, %v3141_v55  ;;  %7290 = vmatprep.subr.bf16.mxu0 %v7695_v19  ;;  %v9338_v36 = vld [vmem:[#allocation2 + $0x44] sm:$0x1]  ;;  %s7801_s9 = scalar_lea.vmem %s9942_s22, 2048 }
 0x21d   : > { %v3160_v38 = vrot.slane %v3159_v44, 4  ;;  %v3182_v27 = vrot.slane %v3180_v20, 4  ;;  %v3191_v14 = vshrl.u32 %v9320_v57, 16  ;;  %v3194_v31 = vshll.u32 %v9320_v57, 16  ;;  %v7692_v20 = vld [vmem:[#allocation3 + $0x28] sm:$0xff]   ;;  %p7802_p0 = scmp.ne.s32.totalorder %s9942_s22, %s7801_s9  ;;  %s7904_s16 = smov [#allocation6]  }
 0x21e   : > { %7227 = vmatpush3.bf16.msra.mxu1 %v7683_v1  ;;  %v3167_v1 = vshrl.u32 %v9299_v41, 16  ;;  %v3155_v0 = vsel %vm8127_vm2, %v3150_v30, %v3154_v8  ;;  %v3188_v49 = vrot.slane %v3186_v56, 5  ;;  %v3210_v39 = vshll.u32 %v9327_v28, 16  ;;  %s7805_s10 = sshll.u32 %s7904_s16, 4  ;;  %s7806_s10 = int_to_ptr.vmem [resolvable:$false] %s7805_s10 }
 0x21f   : > { %7228 = vmatprep.subr.bf16.mxu1 %v7684_v40  ;;  %v3165_v21 = vsel %vm8127_vm2, %v3160_v38, %v3164_v24  ;;  %v3183_v15 = vor.u32 %v3182_v27, %v9315_v42  ;;  %7291 = vmatpush3.bf16.msra.mxu0 %v7695_v19  ;;  %v3193_v16 = vrot.slane %v3191_v14, 4  ;;  %v3196_v59 = vrot.slane %v3194_v31, 5  ;;  %p7803_p1 = pnand %p7802_p0, %p7989_p3  ;;  %s7807_s6 = scalar_lea.vmem %s7806_s10, 4096 }
 0x220   : > { %v3169_v25 = vrot.slane %v3167_v1, 4  ;;  %v6392_v52 = vcombine.low %v3155_v0, %v3165_v21  ;;  %v3215_v45 = vshrl.u32 %v9333_v53, 16  ;;  %v3212_v33 = vrot.slane %v3210_v39, 5  ;;  %7292 = vmatprep.subr.bf16.mxu0 %v7697_v54  ;;  %v9354_v0 = vld [vmem:[#allocation2 + $0x48] sm:$0xf]  ;;  %v7694_v39 = vld [vmem:[#allocation3 + $0x20] sm:$0xff]   ;;  %p7808_p4 = scmp.lt.s32.totalorder %s9942_s22, %s7806_s10  ;;  %p7809_p5 = scmp.lt.s32.totalorder %s7807_s6, %s7801_s9 }
 0x221   : > { %v3197_v8 = vor.u32 %v3196_v59, %v3193_v16  ;;  %v3218_v24 = vshll.u32 %v9333_v53, 16  ;;  %v3224_v1 = vshll.u32 %v9336_v6, 16  ;;  %v3228_v44 = vshrl.u32 %v9336_v6, 16  ;;  %v9369_v59 = vld [vmem:[#allocation2 + $0x5c] sm:$0x1]  ;;  %p7804_p2 = pneg %p7803_p1 }
 0x222   : > { %7229 = vmatpush3.bf16.msra.mxu1 %v7684_v40  ;;  %v3173_v29 = vor.u32 %v3172_v61, %v3169_v25  ;;  %v9325_v40 = vld [vmem:[#allocation2 + $0x34] sm:$0xf]  ;;  %v3217_v50 = vrot.slane %v3215_v45, 4  ;;  %v3234_v47 = vshll.u32 %v9338_v36, 16  ;;  %v7699_v25 = vld [vmem:[#allocation3 + $0x88] sm:$0xff]   ;;  %v3239_v31 = vshrl.u32 %v9354_v0, 16  ;;  %p7810_p6 = por %p7809_p5, %p7808_p4 }
 0x223   : > { %7230 = vmatprep.subr.bf16.mxu1 %v7685_v23  ;;  %v3200_v34 = vshll.u32 %v9325_v40, 16  ;;  %v3204_v3 = vshrl.u32 %v9325_v40, 16  ;;  %v3198_v32 = vrot.slane %v3197_v8, 4  ;;  %7293 = vmatpush3.bf16.msra.mxu0 %v7697_v54  ;;  %v3226_v30 = vrot.slane %v3224_v1, 5 }
 0x224   : > { %v3174_v13 = vrot.slane %v3173_v29, 4  ;;  %v3230_v38 = vrot.slane %v3228_v44, 4  ;;  %7294 = vmatprep.subr.bf16.mxu0 %v7699_v25  ;;  %v9358_v29 = vld [vmem:[#allocation2 + $0x50] sm:$0x1]  ;;  %p7811_p7 = pnand %p7810_p6, %p7804_p2 }
 0x225   : > { %v3202_v62 = vrot.slane %v3200_v34, 5  ;;  %v3206_v7 = vrot.slane %v3204_v3, 4  ;;  %v3242_v34 = vshll.u32 %v9354_v0, 16  ;;  %v3258_v16 = vshll.u32 %v9358_v29, 16 }
 0x226   : > { %7231 = vmatpush3.bf16.msra.mxu1 %v7685_v23  ;;  %v3184_v23 = vrot.slane %v3183_v15, 4  ;;  %v3179_v4 = vsel %vm8127_vm2, %v3174_v13, %v9315_v42  ;;  %v3236_v42 = vrot.slane %v3234_v47, 5  ;;  %v3231_v14 = vor.u32 %v3230_v38, %v3226_v30  ;;  %v9361_v13 = vld [vmem:[#allocation2 + $0x54] sm:$0xf] }
 0x227   : > { %7232 = vmatprep.subr.bf16.mxu1 %v7686_v48  ;;  %v3207_v55 = vor.u32 %v3206_v7, %v3202_v62  ;;  %v3203_v61 = vsel %vm8127_vm2, %v3198_v32, %v3202_v62  ;;  %7295 = vmatpush3.bf16.msra.mxu0 %v7699_v25  ;;  %v3241_v7 = vrot.slane %v3239_v31, 4  ;;  %v3263_v45 = vshrl.u32 %v9361_v13, 16  ;;  %v7696_v32 = vld [vmem:[#allocation3 + $0x18] sm:$0xff]  }
 0x228   : > { %v3189_v5 = vsel %vm8127_vm2, %v3184_v23, %v3188_v49  ;;  %v9363_v49 = vld [vmem:[#allocation2 + $0x58] sm:$0xf]  ;;  %v3232_v62 = vrot.slane %v3231_v14, 4  ;;  %v3260_v8 = vrot.slane %v3258_v16, 5  ;;  %v3282_v25 = vshll.u32 %v9369_v59, 16 }
 0x229   : > { %v3208_v56 = vrot.slane %v3207_v55, 4  ;;  %v6393_v27 = vcombine.low %v3179_v4, %v3189_v5  ;;  %v3266_v5 = vshll.u32 %v9361_v13, 16  ;;  %v3272_v55 = vshll.u32 %v9363_v49, 16 }
 0x22a   : > { %7233 = vmatpush3.bf16.msra.mxu1 %v7686_v48  ;;  %v3220_v48 = vrot.slane %v3218_v24, 5  ;;  %v3265_v24 = vrot.slane %v3263_v45, 4  ;;  %v3276_v47 = vshrl.u32 %v9363_v49, 16 }
 0x22b   : > { %7250 = vmatprep.subr.bf16.mxu1 %v7688_v11 }
 0x22c   : > { %v3221_v19 = vor.u32 %v3220_v48, %v3217_v50  ;;  %v7701_v50 = vld [vmem:[#allocation3 + $0x80] sm:$0xff]  }
 0x22d   : > { %7235 = vmatmul.mubr.bf16.vlgmr.msra.gmra.mxu1 %v6391_v18  ;;  %v3213_v18 = vsel %vm8127_vm2, %v3208_v56, %v3212_v33  ;;  %v3237_v33 = vsel %vm8127_vm2, %v3232_v62, %v3236_v42  ;;  %v3268_v56 = vrot.slane %v3266_v5, 5  ;;  %7296 = vmatprep.subr.bf16.mxu0 %v7701_v50  ;;  %v3278_v42 = vrot.slane %v3276_v47, 4  ;;  %v7703_v62 = vld [vmem:[#allocation3 + $0x138] sm:$0xff]  }
 0x22e   : > { %7251 = vmatpush3.bf16.msra.mxu1 %v7688_v11  ;;  %7238 = vmatprep.mubr.bf16.mxu1 %v6392_v52  ;;  %v9356_v11 = vld [vmem:[#allocation2 + $0x4c] sm:$0xf]  ;;  %v6394_v21 = vcombine.low %v3203_v61, %v3213_v18  ;;  %v3222_v15 = vrot.slane %v3221_v19, 4  ;;  %v3701_v61 = vrot.slane %v3699_v51, 4  ;;  %v3713_v5 = vrot.slane %v9289_v60, 5 }
 0x22f   : > { %7252 = vmatprep.subr.bf16.mxu1 %v7690_v37  ;;  %v3248_v3 = vshll.u32 %v9356_v11, 16  ;;  %v3252_v23 = vshrl.u32 %v9356_v11, 16  ;;  %7297 = vmatpush3.bf16.msra.mxu0 %v7701_v50  ;;  %v3269_v18 = vor.u32 %v3268_v56, %v3265_v24  ;;  %v3675_v24 = vld [vmem:[#allocation2 + $0x18] sm:$0xe] }
 0x230   : > { %v3227_v52 = vsel %vm8127_vm2, %v3222_v15, %v3226_v30  ;;  %v3274_v30 = vrot.slane %v3272_v55, 5  ;;  %v3703_v31 = vsel %vm8441_vm5, %v3701_v61, %v3702_v43  ;;  %7346 = vmatprep.subr.bf16.mxu0 %v7703_v62  ;;  %v3716_v55 = vrot.slane %v9292_v63, 5 }
 0x231   : > { %v3250_v54 = vrot.slane %v3248_v3, 5  ;;  %v3254_v4 = vrot.slane %v3252_v23, 4  ;;  %v6395_v1 = vcombine.low %v3227_v52, %v3237_v33  ;;  %v7700_v33 = vld [vmem:[#allocation3 + $0x8] sm:$0xff]   ;;  %v3715_v56 = vrot.slane %v3713_v5, 4 }
 0x232   : > { %7253 = vmatpush3.bf16.msra.mxu1 %v7690_v37  ;;  %v3244_v37 = vrot.slane %v3242_v34, 5  ;;  %v3674_v34 = vld [vmem:[#allocation2 + $0xc] sm:$0xe]  ;;  %v3279_v16 = vor.u32 %v3278_v42, %v3274_v30  ;;  %v7702_v42 = vld [vmem:[#allocation3] sm:$0xff]  }
 0x233   : > { %7254 = vmatprep.subr.bf16.mxu1 %v7692_v20  ;;  %v3255_v44 = vor.u32 %v3254_v4, %v3250_v54  ;;  %v6423_v52 = vrot.slane %v3674_v34, 9 }
 0x234   : > { %v3245_v48 = vor.u32 %v3244_v37, %v3241_v7  ;;  %v7698_v7 = vld [vmem:[#allocation3 + $0x10] sm:$0xff]   ;;  %v3270_v37 = vrot.slane %v3269_v18, 4 }
 0x235   : > { %7239 = vmatmul.mubr.bf16.gmra.mxu1 %v6393_v27  ;;  %v3256_v38 = vrot.slane %v3255_v44, 4  ;;  %v3706_v27 = vrot.slane %v9271_v26, 5  ;;  %v6424_v44 = vrot.slane %v3675_v24, 9  ;;  %v3748_v24 = vrot.slane %v9363_v49, 5 }
 0x236   : > { %7255 = vmatpush3.bf16.msra.mxu1 %v7692_v20  ;;  %7242 = vmatprep.mubr.bf16.mxu1 %v6394_v21  ;;  %v3246_v19 = vrot.slane %v3245_v48, 4  ;;  %v3673_v20 = vld [vmem:[#allocation2] sm:$0xe]  ;;  %v3284_v21 = vrot.slane %v3282_v25, 5 }
 0x237   : > { %7256 = vmatprep.subr.bf16.mxu1 %v7694_v39  ;;  %v6422_v15 = vrot.slane %v3673_v20, 9  ;;  %v3261_v23 = vsel %vm8127_vm2, %v3256_v38, %v3260_v8  ;;  %v3708_v43 = vrot.slane %v3706_v27, 4  ;;  %v3709_v8 = vrot.slane %v9273_v35, 5  ;;  %v7707_v35 = vld [vmem:[#allocation3 + $0x130] sm:$0xff]  }
 0x238   : > { %v3251_v3 = vsel %vm8127_vm2, %v3246_v19, %v3250_v54  ;;  %v3707_v54 = vsel %vm8441_vm5, %v6423_v52, %v3706_v27  ;;  %v3714_v63 = vsel %vm8441_vm5, %v6424_v44, %v3713_v5  ;;  %v6406_v19 = vcombine.low %v9258_v46, %v9260_v12  ;;  %v7709_v12 = vld [vmem:[#allocation3 + $0x128] sm:$0xff]   ;;  %v7708_v5 = vld [vmem:[#allocation3 + $0xf0] sm:$0xff]  }
 0x239   : > { %v6396_v45 = vcombine.low %v3251_v3, %v3261_v23  ;;  %v3700_v2 = vsel %vm8441_vm5, %v6422_v15, %v3699_v51  ;;  %v3275_v51 = vsel %vm8127_vm2, %v3270_v37, %v3274_v30  ;;  %v3710_v48 = vsel %vm8441_vm5, %v3708_v43, %v3709_v8  ;;  %v3678_v3 = vld [vmem:[#allocation2 + $0x3c] sm:$0xe]  ;;  %v3679_v43 = vld [vmem:[#allocation2 + $0x48] sm:$0xe] }
 0x23a   : > { %7257 = vmatpush3.bf16.msra.mxu1 %v7694_v39  ;;  %v3280_v39 = vrot.slane %v3279_v16, 4  ;;  %v6430_v4 = vcombine.low %v3700_v2, %v3703_v31  ;;  %v6431_v47 = vcombine.low %v3707_v54, %v3710_v48  ;;  %v3723_v30 = vrot.slane %v9303_v10, 5  ;;  %v7706_v16 = vld [vmem:[#allocation3 + $0xf8] sm:$0xff]  }
 0x23b   : > { %7258 = vmatprep.subr.bf16.mxu1 %v7696_v32  ;;  %v3717_v38 = vsel %vm8441_vm5, %v3715_v56, %v3716_v55  ;;  %v3727_v15 = vrot.slane %v9325_v40, 5  ;;  %v3730_v31 = vrot.slane %v9327_v28, 5  ;;  %v3734_v23 = vrot.slane %v9336_v6, 5 }
 0x23c   : > { %v3285_v50 = vsel %vm8127_vm2, %v3280_v39, %v3284_v21  ;;  %7298 = vmatprep.mubr.bf16.mxu0 %v6430_v4  ;;  %v6432_v20 = vcombine.low %v3714_v63, %v3717_v38  ;;  %v3677_v21 = vld [vmem:[#allocation2 + $0x30] sm:$0xe]  ;;  %v7713_v39 = vld [vmem:[#allocation3 + $0x120] sm:$0xff]   ;;  %v6428_v4 = vrot.slane %v3679_v43, 9  ;;  %v3741_v54 = vrot.slane %v9356_v11, 5 }
 0x23d   : > { %7243 = vmatmul.mubr.bf16.gmra.mxu1 %v6395_v1  ;;  %v3676_v1 = vld [vmem:[#allocation2 + $0x24] sm:$0xe]  ;;  %v6397_v61 = vcombine.low %v3275_v51, %v3285_v50  ;;  %7299 = vmatmul.mubr.bf16.vlgmr.msra.gmra.mxu0 %v6431_v47  ;;  %v6426_v10 = vrot.slane %v3677_v21, 9  ;;  %v3729_v34 = vrot.slane %v3727_v15, 4  ;;  %v3736_v37 = vrot.slane %v3734_v23, 4  ;;  %v7714_v21 = vld [vmem:[#allocation3 + $0xe0] sm:$0xff]  }
 0x23e   : > { %7259 = vmatpush3.bf16.msra.mxu1 %v7696_v32  ;;  %7246 = vmatprep.mubr.bf16.mxu1 %v6396_v45  ;;  %v6425_v25 = vrot.slane %v3676_v1, 9  ;;  %v3720_v32 = vrot.slane %v9301_v9, 5  ;;  %v6427_v45 = vrot.slane %v3678_v3, 9  ;;  %v3744_v8 = vrot.slane %v9358_v29, 5  ;;  %v7712_v47 = vld [vmem:[#allocation3 + $0xe8] sm:$0xff]  }
 0x23f   : > { %7260 = vmatprep.subr.bf16.mxu1 %v7698_v7  ;;  %7347 = vmatpush3.bf16.msra.mxu0 %v7703_v62  ;;  %v3728_v62 = vsel %vm8441_vm5, %v6426_v10, %v3727_v15  ;;  %v3731_v28 = vsel %vm8441_vm5, %v3729_v34, %v3730_v31  ;;  %v6408_v55 = vcombine.low %v9287_v58, %v9289_v60  ;;  %v3743_v29 = vrot.slane %v3741_v54, 4  ;;  %v9444_v63 = vld [vmem:[#allocation2 + $0x10] sm:$0xf] }
 0x240   : > { %v3721_v27 = vsel %vm8441_vm5, %v6425_v25, %v3720_v32  ;;  %v3722_v18 = vrot.slane %v3720_v32, 4  ;;  %7348 = vmatprep.subr.bf16.mxu0 %v7707_v35  ;;  %7302 = vmatprep.mubr.bf16.mxu0 %v6432_v20  ;;  %v6434_v2 = vcombine.low %v3728_v62, %v3731_v28  ;;  %v3735_v51 = vsel %vm8441_vm5, %v6427_v45, %v3734_v23  ;;  %v4206_v25 = vld [vmem:[#allocation2 + $0xc] sm:$0xf] }
 0x241   : > { %v3751_v48 = vrot.slane %v9369_v59, 5  ;;  %v3745_v58 = vsel %vm8441_vm5, %v3743_v29, %v3744_v8  ;;  %v6409_v1 = vcombine.low %v9299_v41, %v9301_v9  ;;  %v9446_v59 = vld [vmem:[#allocation2 + $0x14] sm:$0x1]  ;;  %v4231_v32 = vshrl.u32 %v4206_v25, 16  ;;  %v7719_v41 = vld [vmem:[#allocation3 + $0x110] sm:$0xff]  }
 0x242   : > { %7261 = vmatpush3.bf16.msra.mxu1 %v7698_v7  ;;  %v3724_v46 = vsel %vm8441_vm5, %v3722_v18, %v3723_v30  ;;  %v3737_v7 = vrot.slane %v9338_v36, 5  ;;  %v6407_v36 = vcombine.low %v9268_v17, %v9271_v26  ;;  %v7715_v17 = vld [vmem:[#allocation3 + $0x118] sm:$0xff]   ;;  %v3742_v26 = vsel %vm8441_vm5, %v6428_v4, %v3741_v54  ;;  %v9457_v18 = vld [vmem:[#allocation2 + $0x1c] sm:$0xf]  ;;  %v4212_v29 = vld [vmem:[#allocation2 + $0x24] sm:$0xf] }
 0x243   : > { %7262 = vmatprep.subr.bf16.mxu1 %v7700_v33  ;;  %v6433_v52 = vcombine.low %v3721_v27, %v3724_v46  ;;  %7349 = vmatpush3.bf16.msra.mxu0 %v7707_v35  ;;  %v3750_v35 = vrot.slane %v3748_v24, 4  ;;  %v6436_v56 = vcombine.low %v3742_v26, %v3745_v58  ;;  %v4234_v30 = vshll.u32 %v4206_v25, 16  ;;  %v4209_v27 = vld [vmem:[#allocation2 + $0x18] sm:$0xf]  ;;  %v7718_v8 = vld [vmem:[#allocation3 + $0xd8] sm:$0xff]  }
 0x244   : > { %7350 = vmatprep.subr.bf16.mxu0 %v7709_v12  ;;  %v3738_v50 = vsel %vm8441_vm5, %v3736_v37, %v3737_v7  ;;  %v6410_v38 = vcombine.low %v9320_v57, %v9325_v40  ;;  %v4250_v20 = vshll.u32 %v9446_v59, 16  ;;  %v4233_v15 = vrot.slane %v4231_v32, 4  ;;  %v7721_v7 = vld [vmem:[#allocation3 + $0x108] sm:$0xff]   ;;  %v9472_v58 = vld [vmem:[#allocation2 + $0x28] sm:$0xf] }
 0x245   : > { %7247 = vmatmul.mubr.bf16.gmra.mxu1 %v6397_v61  ;;  %7303 = vmatmul.mubr.bf16.gmra.mxu0 %v6433_v52  ;;  %v6435_v44 = vcombine.low %v3735_v51, %v3738_v50  ;;  %v4240_v61 = vshll.u32 %v9444_v63, 16  ;;  %v4236_v10 = vrot.slane %v4234_v30, 5  ;;  %v4255_v40 = vshrl.u32 %v4209_v27, 16  ;;  %v4215_v25 = vld [vmem:[#allocation2 + $0x30] sm:$0xf] }
 0x246   : > { %7263 = vmatpush3.bf16.msra.mxu1 %v7700_v33  ;;  %7266 = vmatprep.mubr.bf16.mxu1 %v6406_v19  ;;  %v3680_v33 = vld [vmem:[#allocation2 + $0x54] sm:$0xe]  ;;  %v4244_v19 = vshrl.u32 %v9444_v63, 16  ;;  %v4252_v57 = vrot.slane %v4250_v20, 5  ;;  %v4258_v34 = vshll.u32 %v4209_v27, 16  ;;  %v4264_v3 = vshll.u32 %v9457_v18, 16 }
 0x247   : > { %7264 = vmatprep.subr.bf16.mxu1 %v7702_v42  ;;  %7306 = vmatprep.mubr.bf16.mxu0 %v6434_v2  ;;  %v6429_v60 = vrot.slane %v3680_v33, 9  ;;  %v4242_v31 = vrot.slane %v4240_v61, 5  ;;  %v4237_v23 = vor.u32 %v4236_v10, %v4233_v15  ;;  %v4268_v52 = vshrl.u32 %v9457_v18, 16  ;;  %v7727_v30 = vld [vmem:[#allocation3 + $0x1b8] sm:$0xff]  }
 0x248   : > { %7351 = vmatpush3.bf16.msra.mxu0 %v7709_v12  ;;  %v4246_v46 = vrot.slane %v4244_v19, 4  ;;  %v9459_v12 = vld [vmem:[#allocation2 + $0x20] sm:$0x1]  ;;  %v4257_v28 = vrot.slane %v4255_v40, 4  ;;  %v4260_v45 = vrot.slane %v4258_v34, 5  ;;  %v4266_v37 = vrot.slane %v4264_v3, 5 }
 0x249   : > { %7352 = vmatprep.subr.bf16.mxu0 %v7713_v39  ;;  %v3749_v9 = vsel %vm8441_vm5, %v6429_v60, %v3748_v24  ;;  %v4274_v62 = vshll.u32 %v9459_v12, 16  ;;  %v4238_v43 = vrot.slane %v4237_v23, 4  ;;  %v4270_v4 = vrot.slane %v4268_v52, 4  ;;  %v9474_v60 = vld [vmem:[#allocation2 + $0x2c] sm:$0x1] }
 0x24a   : > { %7265 = vmatpush3.bf16.msra.mxu1 %v7702_v42  ;;  %v3752_v42 = vsel %vm8441_vm5, %v3750_v35, %v3751_v48  ;;  %v4261_v54 = vor.u32 %v4260_v45, %v4257_v28  ;;  %v6412_v26 = vcombine.low %v9354_v0, %v9356_v11  ;;  %v4279_v35 = vshrl.u32 %v4212_v29, 16  ;;  %v7731_v23 = vld [vmem:[#allocation3 + $0x1b0] sm:$0xff]   ;;  %v7726_v28 = vld [vmem:[#allocation3 + $0xc0] sm:$0xff]  }
 0x24b   : > { %7314 = vmatprep.subr.bf16.mxu1 %v7706_v16  ;;  %v6437_v2 = vcombine.low %v3749_v9, %v3752_v42  ;;  %v4271_v24 = vor.u32 %v4270_v4, %v4266_v37  ;;  %v4298_v11 = vshll.u32 %v9474_v60, 16  ;;  %v9485_v42 = vld [vmem:[#allocation2 + $0x38] sm:$0x1]  ;;  %v4303_v20 = vshrl.u32 %v4215_v25, 16 }
 0x24c   : > { %7353 = vmatpush3.bf16.msra.mxu0 %v7713_v39  ;;  %v4262_v50 = vrot.slane %v4261_v54, 4  ;;  %v4281_v0 = vrot.slane %v4279_v35, 4  ;;  %v4306_v27 = vshll.u32 %v4215_v25, 16 }
 0x24d   : > { %7267 = vmatmul.mubr.bf16.vlgmr.msra.gmra.mxu1 %v6407_v36  ;;  %7354 = vmatprep.subr.bf16.mxu0 %v7715_v17  ;;  %v4243_v36 = vsel %vm8127_vm2, %v4238_v43, %v4242_v31  ;;  %v4272_v48 = vrot.slane %v4271_v24, 4  ;;  %v4300_v9 = vrot.slane %v4298_v11, 5  ;;  %v4305_v40 = vrot.slane %v4303_v20, 4  ;;  %v4218_v24 = vld [vmem:[#allocation2 + $0x3c] sm:$0xf] }
 0x24e   : > { %7315 = vmatpush3.bf16.msra.mxu1 %v7706_v16  ;;  %7270 = vmatprep.mubr.bf16.mxu1 %v6408_v55  ;;  %v4247_v16 = vor.u32 %v4246_v46, %v4242_v31  ;;  %v7725_v55 = vld [vmem:[#allocation3 + $0x100] sm:$0xff]   ;;  %v4322_v46 = vshll.u32 %v9485_v42, 16  ;;  %v4308_v34 = vrot.slane %v4306_v27, 5  ;;  %v4221_v11 = vld [vmem:[#allocation2 + $0x48] sm:$0xf] }
 0x24f   : > { %7316 = vmatprep.subr.bf16.mxu1 %v7708_v5  ;;  %7307 = vmatmul.mubr.bf16.gmra.mxu0 %v6435_v44  ;;  %v7720_v44 = vld [vmem:[#allocation3 + $0xd0] sm:$0xff]   ;;  %v4351_v20 = vshrl.u32 %v4221_v11, 16  ;;  %v4354_v27 = vshll.u32 %v4221_v11, 16 }
 0x250   : > { %7310 = vmatprep.mubr.bf16.mxu0 %v6436_v56  ;;  %7355 = vmatpush3.bf16.msra.mxu0 %v7715_v17  ;;  %v4248_v39 = vrot.slane %v4247_v16, 4  ;;  %v6411_v17 = vcombine.low %v9333_v53, %v9336_v6  ;;  %v4288_v56 = vshll.u32 %v9472_v58, 16  ;;  %v4292_v53 = vshrl.u32 %v9472_v58, 16 }
 0x251   : > { %7356 = vmatprep.subr.bf16.mxu0 %v7719_v41  ;;  %v4309_v45 = vor.u32 %v4308_v34, %v4305_v40  ;;  %v4324_v54 = vrot.slane %v4322_v46, 5  ;;  %v4356_v40 = vrot.slane %v4354_v27, 5 }
 0x252   : > { %7317 = vmatpush3.bf16.msra.mxu1 %v7708_v5  ;;  %v4253_v33 = vsel %vm8127_vm2, %v4248_v39, %v4252_v57  ;;  %v4276_v5 = vrot.slane %v4274_v62, 5  ;;  %v4290_v19 = vrot.slane %v4288_v56, 5  ;;  %v7724_v57 = vld [vmem:[#allocation3 + $0xc8] sm:$0xff]   ;;  %v7737_v56 = vld [vmem:[#allocation3 + $0x1a0] sm:$0xff]  }
 0x253   : > { %7318 = vmatprep.subr.bf16.mxu1 %v7712_v47  ;;  %v6462_v51 = vcombine.low %v4243_v36, %v4253_v33  ;;  %v4310_v36 = vrot.slane %v4309_v45, 4  ;;  %v7733_v33 = vld [vmem:[#allocation3 + $0x1a8] sm:$0xff]  }
 0x254   : > { %7357 = vmatpush3.bf16.msra.mxu0 %v7719_v41  ;;  %v4277_v6 = vsel %vm8127_vm2, %v4272_v48, %v4276_v5  ;;  %v9483_v41 = vld [vmem:[#allocation2 + $0x34] sm:$0xf]  ;;  %v9498_v5 = vld [vmem:[#allocation2 + $0x40] sm:$0xf] }
 0x255   : > { %7271 = vmatmul.mubr.bf16.gmra.mxu1 %v6409_v1  ;;  %7358 = vmatprep.subr.bf16.mxu0 %v7721_v7  ;;  %v4267_v1 = vsel %vm8127_vm2, %v4262_v50, %v4266_v37  ;;  %v4316_v31 = vshrl.u32 %v9483_v41, 16  ;;  %v4666_v37 = vrot.slane %v9444_v63, 5  ;;  %v9502_v50 = vld [vmem:[#allocation2 + $0x44] sm:$0x1]  ;;  %v4340_v35 = vshrl.u32 %v9498_v5, 16 }
 0x256   : > { %7319 = vmatpush3.bf16.msra.mxu1 %v7712_v47  ;;  %7274 = vmatprep.mubr.bf16.mxu1 %v6410_v38  ;;  %v4282_v47 = vshll.u32 %v4212_v29, 16  ;;  %v6463_v32 = vcombine.low %v4267_v1, %v4277_v6  ;;  %v4294_v38 = vrot.slane %v4292_v53, 4  ;;  %v4327_v29 = vshrl.u32 %v4218_v24, 16  ;;  %v7729_v1 = vld [vmem:[#allocation2 + $0x18] sm:$0xff]  }
 0x257   : > { %7320 = vmatprep.subr.bf16.mxu1 %v7714_v21  ;;  %7311 = vmatmul.mubr.bf16.gmra.mxu0 %v6437_v2  ;;  %v4318_v62 = vrot.slane %v4316_v31, 4  ;;  %v7728_v2 = vld [vmem:[#allocation2 + $0xc] sm:$0xff]   ;;  %v4342_v25 = vrot.slane %v4340_v35, 4  ;;  %v4687_v63 = vrot.slane %v9483_v41, 5 }
 0x258   : > { %7362 = vmatprep.mubr.bf16.mxu0 %v6462_v51  ;;  %7359 = vmatpush3.bf16.msra.mxu0 %v7721_v7  ;;  %v4284_v61 = vrot.slane %v4282_v47, 5  ;;  %v4295_v10 = vor.u32 %v4294_v38, %v4290_v19  ;;  %v6413_v7 = vcombine.low %v9361_v13, %v9363_v49  ;;  %v4669_v13 = vrot.slane %v9446_v59, 5  ;;  %v7734_v38 = vld [vmem:[#allocation2 + $0x24] sm:$0xff]   ;;  %v7750_v59 = vld [vmem:[#allocation3 + $0x140] sm:$0xff]  }
 0x259   : > { %7360 = vmatprep.subr.bf16.mxu0 %v7725_v55  ;;  %v4329_v53 = vrot.slane %v4327_v29, 4 }
 0x25a   : > { %7321 = vmatpush3.bf16.msra.mxu1 %v7714_v21  ;;  %v4312_v21 = vshll.u32 %v9483_v41, 16  ;;  %v4285_v15 = vor.u32 %v4284_v61, %v4281_v0  ;;  %v4296_v52 = vrot.slane %v4295_v10, 4  ;;  %v9511_v61 = vld [vmem:[#allocation2 + $0x50] sm:$0x1]  ;;  %v4690_v41 = vrot.slane %v9485_v42, 5 }
 0x25b   : > { %7322 = vmatprep.subr.bf16.mxu1 %v7718_v8  ;;  %v4370_v31 = vshll.u32 %v9511_v61, 16  ;;  %v4636_v42 = vld [vmem:[#allocation2 + $0x3c] sm:$0xe] }
 0x25c   : > { %7361 = vmatpush3.bf16.msra.mxu0 %v7725_v55  ;;  %v4314_v3 = vrot.slane %v4312_v21, 5  ;;  %v4286_v16 = vrot.slane %v4285_v15, 4  ;;  %v4301_v39 = vsel %vm8127_vm2, %v4296_v52, %v4300_v9  ;;  %v7730_v55 = vld [vmem:[#allocation3 + $0x178] sm:$0xff]   ;;  %v9518_v52 = vrot.slane %v4666_v37, 4 }
 0x25d   : > { %7275 = vmatmul.mubr.bf16.gmra.mxu1 %v6411_v17  ;;  %7410 = vmatprep.subr.bf16.mxu0 %v7727_v30  ;;  %v4330_v17 = vshll.u32 %v4218_v24, 16  ;;  %v9526_v24 = vld [vmem:[#allocation2 + $0x5c] sm:$0x1] }
 0x25e   : > { %7323 = vmatpush3.bf16.msra.mxu1 %v7718_v8  ;;  %7278 = vmatprep.mubr.bf16.mxu1 %v6412_v26  ;;  %v4291_v43 = vsel %vm8127_vm2, %v4286_v16, %v4290_v19  ;;  %v4319_v4 = vor.u32 %v4318_v62, %v4314_v3  ;;  %v4315_v51 = vsel %vm8127_vm2, %v4310_v36, %v4314_v3  ;;  %v4336_v26 = vshll.u32 %v9498_v5, 16  ;;  %v7732_v19 = vld [vmem:[#allocation3 + $0x170] sm:$0xff]   ;;  %v7739_v16 = vld [vmem:[#allocation3 + $0x198] sm:$0xff]  }
 0x25f   : > { %7324 = vmatprep.subr.bf16.mxu1 %v7720_v44  ;;  %7363 = vmatmul.mubr.bf16.vlgmr.msra.gmra.mxu0 %v6463_v32  ;;  %v6464_v8 = vcombine.low %v4291_v43, %v4301_v39  ;;  %v4332_v6 = vrot.slane %v4330_v17, 5  ;;  %v4372_v43 = vrot.slane %v4370_v31, 5  ;;  %v7735_v39 = vld [vmem:[#allocation2 + $0x30] sm:$0xff]   ;;  %v7738_v17 = vld [vmem:[#allocation3 + $0x160] sm:$0xff]   ;;  %v4394_v35 = vshll.u32 %v9526_v24, 16 }
 0x260   : > { %7411 = vmatpush3.bf16.msra.mxu0 %v7727_v30  ;;  %v4320_v49 = vrot.slane %v4319_v4, 4  ;;  %v4338_v0 = vrot.slane %v4336_v26, 5  ;;  %v9509_v30 = vld [vmem:[#allocation2 + $0x4c] sm:$0xf]  ;;  %v4224_v36 = vld [vmem:[#allocation2 + $0x54] sm:$0xf] }
 0x261   : > { %7412 = vmatprep.subr.bf16.mxu0 %v7731_v23  ;;  %7366 = vmatprep.mubr.bf16.mxu0 %v6464_v8  ;;  %v4333_v9 = vor.u32 %v4332_v6, %v4329_v53  ;;  %v4360_v21 = vshll.u32 %v9509_v30, 16  ;;  %v4364_v10 = vshrl.u32 %v9509_v30, 16  ;;  %v7743_v8 = vld [vmem:[#allocation3 + $0x190] sm:$0xff]   ;;  %v4227_v6 = vld [vmem:[#allocation2 + $0x60] sm:$0xf] }
 0x262   : > { %7325 = vmatpush3.bf16.msra.mxu1 %v7720_v44  ;;  %v4325_v48 = vsel %vm8127_vm2, %v4320_v49, %v4324_v54  ;;  %v4346_v44 = vshll.u32 %v9502_v50, 16  ;;  %v4343_v15 = vor.u32 %v4342_v25, %v4338_v0  ;;  %v9524_v49 = vld [vmem:[#allocation2 + $0x58] sm:$0xf]  ;;  %v4396_v25 = vrot.slane %v4394_v35, 5  ;;  %v4632_v35 = vld [vmem:[#allocation2 + $0xc] sm:$0xe] }
 0x263   : > { %7326 = vmatprep.subr.bf16.mxu1 %v7724_v57  ;;  %v6465_v47 = vcombine.low %v4315_v51, %v4325_v48  ;;  %v4334_v46 = vrot.slane %v4333_v9, 4  ;;  %v4362_v34 = vrot.slane %v4360_v21, 5  ;;  %v4378_v51 = vshll.u32 %v4224_v36, 16  ;;  %v7745_v21 = vld [vmem:[#allocation3 + $0x188] sm:$0xff]  }
 0x264   : > { %7413 = vmatpush3.bf16.msra.mxu0 %v7731_v23  ;;  %v4348_v32 = vrot.slane %v4346_v44, 5  ;;  %v4344_v3 = vrot.slane %v4343_v15, 4  ;;  %v4366_v23 = vrot.slane %v4364_v10, 4  ;;  %v4384_v29 = vshll.u32 %v9524_v49, 16 }
 0x265   : > { %7279 = vmatmul.mubr.bf16.gmra.mxu1 %v6413_v7  ;;  %7414 = vmatprep.subr.bf16.mxu0 %v7733_v33  ;;  %v4339_v62 = vsel %vm8127_vm2, %v4334_v46, %v4338_v0  ;;  %v4388_v48 = vshrl.u32 %v9524_v49, 16 }
 0x266   : > { %7327 = vmatpush3.bf16.msra.mxu1 %v7724_v57  ;;  %7330 = vmatprep.mubr.bf16.mxu1 %v7728_v2  ;;  %v4353_v57 = vrot.slane %v4351_v20, 4  ;;  %v4349_v45 = vsel %vm8127_vm2, %v4344_v3, %v4348_v32  ;;  %v4367_v2 = vor.u32 %v4366_v23, %v4362_v34  ;;  %v4386_v53 = vrot.slane %v4384_v29, 5  ;;  %v9535_v32 = vld [vmem:[#allocation2 + $0x64] sm:$0xf]  ;;  %v7741_v3 = vld [vmem:[#allocation2 + $0x48] sm:$0xff]   ;;  %v7742_v23 = vld [vmem:[#allocation3 + $0x158] sm:$0xff]  }
 0x267   : > { %7328 = vmatprep.subr.bf16.mxu1 %v7726_v28  ;;  %7367 = vmatmul.mubr.bf16.gmra.mxu0 %v6465_v47  ;;  %v6466_v4 = vcombine.low %v4339_v62, %v4349_v45  ;;  %v4390_v11 = vrot.slane %v4388_v48, 4  ;;  %v4402_v20 = vshll.u32 %v4227_v6, 16  ;;  %v4408_v27 = vshll.u32 %v9535_v32, 16  ;;  %v7753_v48 = vld [vmem:[#allocation3 + $0x238] sm:$0xff]  }
 0x268   : > { %7415 = vmatpush3.bf16.msra.mxu0 %v7733_v33  ;;  %v4357_v7 = vor.u32 %v4356_v40, %v4353_v57  ;;  %v4368_v33 = vrot.slane %v4367_v2, 4  ;;  %v4412_v10 = vshrl.u32 %v9535_v32, 16 }
 0x269   : > { %7416 = vmatprep.subr.bf16.mxu0 %v7737_v56  ;;  %7370 = vmatprep.mubr.bf16.mxu0 %v6466_v4  ;;  %v4391_v15 = vor.u32 %v4390_v11, %v4386_v53  ;;  %v4404_v40 = vrot.slane %v4402_v20, 5  ;;  %v4676_v11 = vrot.slane %v9459_v12, 5  ;;  %v7756_v20 = vld [vmem:[#allocation2 + $0x30] sm:$0xff]  }
 0x26a   : > { %7329 = vmatpush3.bf16.msra.mxu1 %v7726_v28  ;;  %v7736_v28 = vld [vmem:[#allocation3 + $0x168] sm:$0xff]   ;;  %v4358_v54 = vrot.slane %v4357_v7, 4  ;;  %v4373_v44 = vsel %vm8127_vm2, %v4368_v33, %v4372_v43  ;;  %v4414_v62 = vrot.slane %v4412_v10, 4  ;;  %v7744_v33 = vld [vmem:[#allocation3 + $0x150] sm:$0xff]   ;;  %v4635_v10 = vld [vmem:[#allocation2 + $0x30] sm:$0xe] }
 0x26b   : > { %7378 = vmatprep.subr.bf16.mxu1 %v7730_v55 }
 0x26c   : > { %7417 = vmatpush3.bf16.msra.mxu0 %v7737_v56  ;;  %v4363_v26 = vsel %vm8127_vm2, %v4358_v54, %v4362_v34  ;;  %v4380_v56 = vrot.slane %v4378_v51, 5  ;;  %v4410_v34 = vrot.slane %v4408_v27, 5  ;;  %v4673_v51 = vrot.slane %v9457_v18, 5  ;;  %v4634_v27 = vld [vmem:[#allocation2 + $0x24] sm:$0xe] }
 0x26d   : > { %7331 = vmatmul.mubr.bf16.vlgmr.msra.gmra.mxu1 %v7729_v1  ;;  %7418 = vmatprep.subr.bf16.mxu0 %v7739_v16  ;;  %v7740_v1 = vld [vmem:[#allocation2 + $0x3c] sm:$0xff]   ;;  %v6467_v0 = vcombine.low %v4363_v26, %v4373_v44  ;;  %v4633_v44 = vld [vmem:[#allocation2 + $0x18] sm:$0xe]  ;;  %v4670_v18 = vsel %vm8441_vm5, %v9518_v52, %v4669_v13  ;;  %v7752_v13 = vld [vmem:[#allocation2 + $0x24] sm:$0xff]  }
 0x26e   : > { %7379 = vmatpush3.bf16.msra.mxu1 %v7730_v55  ;;  %7334 = vmatprep.mubr.bf16.mxu1 %v7734_v38  ;;  %v4375_v55 = vshrl.u32 %v4224_v36, 16  ;;  %v9537_v38 = vld [vmem:[#allocation2 + $0x68] sm:$0x1]  ;;  %v7749_v36 = vld [vmem:[#allocation3 + $0x180] sm:$0xff]  }
 0x26f   : > { %7380 = vmatprep.subr.bf16.mxu1 %v7732_v19  ;;  %7371 = vmatmul.mubr.bf16.gmra.mxu0 %v6467_v0  ;;  %v4418_v31 = vshll.u32 %v9537_v38, 16  ;;  %v7751_v26 = vld [vmem:[#allocation2 + $0x18] sm:$0xff]  }
 0x270   : > { %v4377_v47 = vrot.slane %v4375_v55, 4  ;;  %7419 = vmatpush3.bf16.msra.mxu0 %v7739_v16  ;;  %v4392_v16 = vrot.slane %v4391_v15, 4  ;;  %v6480_v15 = vrot.slane %v4634_v27, 9  ;;  %v5599_v27 = vld [vmem:[#allocation2 + $0x18] sm:$0xe] }
 0x271   : > { %7420 = vmatprep.subr.bf16.mxu0 %v7743_v8  ;;  %v4420_v43 = vrot.slane %v4418_v31, 5 }
 0x272   : > { %7381 = vmatpush3.bf16.msra.mxu1 %v7732_v19  ;;  %v4381_v9 = vor.u32 %v4380_v56, %v4377_v47  ;;  %v4399_v19 = vshrl.u32 %v4227_v6, 16  ;;  %v4397_v2 = vsel %vm8127_vm2, %v4392_v16, %v4396_v25  ;;  %v6478_v47 = vrot.slane %v4632_v35, 9  ;;  %v7747_v6 = vld [vmem:[#allocation2 + $0x60] sm:$0xff]  }
 0x273   : > { %7382 = vmatprep.subr.bf16.mxu1 %v7736_v28  ;;  %v4675_v56 = vrot.slane %v4673_v51, 4  ;;  %v6481_v16 = vrot.slane %v4635_v10, 9  ;;  %v6534_v10 = vrot.slane %v5599_v27, 9 }
 0x274   : > { %v4382_v46 = vrot.slane %v4381_v9, 4  ;;  %v4401_v57 = vrot.slane %v4399_v19, 4  ;;  %7421 = vmatpush3.bf16.msra.mxu0 %v7743_v8  ;;  %v4667_v0 = vsel %vm8441_vm5, %v6478_v47, %v4666_v37  ;;  %v6479_v9 = vrot.slane %v4633_v44, 9  ;;  %v7764_v44 = vld [vmem:[#allocation2 + $0x54] sm:$0xff]  }
 0x275   : > { %7335 = vmatmul.mubr.bf16.gmra.mxu1 %v7735_v39  ;;  %7422 = vmatprep.subr.bf16.mxu0 %v7745_v21  ;;  %v7746_v39 = vld [vmem:[#allocation2 + $0x54] sm:$0xff]   ;;  %v6486_v25 = vcombine.low %v4667_v0, %v4670_v18  ;;  %v4683_v19 = vrot.slane %v9474_v60, 5  ;;  %v4677_v37 = vsel %vm8441_vm5, %v4675_v56, %v4676_v11  ;;  %v4639_v18 = vld [vmem:[#allocation2 + $0x60] sm:$0xe] }
 0x276   : > { %7383 = vmatpush3.bf16.msra.mxu1 %v7736_v28  ;;  %7338 = vmatprep.mubr.bf16.mxu1 %v7740_v1  ;;  %v4387_v7 = vsel %vm8127_vm2, %v4382_v46, %v4386_v53  ;;  %v4405_v45 = vor.u32 %v4404_v40, %v4401_v57  ;;  %v4415_v28 = vor.u32 %v4414_v62, %v4410_v34  ;;  %v7748_v1 = vld [vmem:[#allocation3 + $0x148] sm:$0xff]   ;;  %v4680_v53 = vrot.slane %v9472_v58, 5  ;;  %v7754_v58 = vld [vmem:[#allocation3 + $0x1f8] sm:$0xff]   ;;  %v7757_v40 = vld [vmem:[#allocation3 + $0x1f0] sm:$0xff]  }
 0x277   : > { %7384 = vmatprep.subr.bf16.mxu1 %v7738_v17  ;;  %v6468_v4 = vcombine.low %v4387_v7, %v4397_v2  ;;  %v4674_v12 = vsel %vm8441_vm5, %v6479_v9, %v4673_v51  ;;  %v4694_v46 = vrot.slane %v9498_v5, 5  ;;  %v4697_v7 = vrot.slane %v9502_v50, 5  ;;  %v7762_v2 = vld [vmem:[#allocation2 + $0x48] sm:$0xff]   ;;  %v4638_v47 = vld [vmem:[#allocation2 + $0x54] sm:$0xe]  ;;  %v7768_v0 = vld [vmem:[#allocation2 + $0x60] sm:$0xff]  }
 0x278   : > { %v4406_v54 = vrot.slane %v4405_v45, 4  ;;  %v4416_v8 = vrot.slane %v4415_v28, 4  ;;  %7423 = vmatpush3.bf16.msra.mxu0 %v7745_v21  ;;  %v4682_v52 = vrot.slane %v4680_v53, 4  ;;  %v7755_v21 = vld [vmem:[#allocation3 + $0x230] sm:$0xff]   ;;  %v4681_v60 = vsel %vm8441_vm5, %v6480_v15, %v4680_v53 }
 0x279   : > { %7374 = vmatprep.mubr.bf16.mxu0 %v6468_v4  ;;  %7424 = vmatprep.subr.bf16.mxu0 %v7749_v36  ;;  %v6487_v57 = vcombine.low %v4674_v12, %v4677_v37  ;;  %v4701_v45 = vrot.slane %v9509_v30, 5  ;;  %v4696_v28 = vrot.slane %v4694_v46, 4  ;;  %v4637_v5 = vld [vmem:[#allocation2 + $0x48] sm:$0xe]  ;;  %v4708_v4 = vrot.slane %v9524_v49, 5 }
 0x27a   : > { %7385 = vmatpush3.bf16.msra.mxu1 %v7738_v17  ;;  %v4411_v55 = vsel %vm8127_vm2, %v4406_v54, %v4410_v34  ;;  %v4421_v29 = vsel %vm8127_vm2, %v4416_v8, %v4420_v43  ;;  %v4684_v31 = vsel %vm8441_vm5, %v4682_v52, %v4683_v19  ;;  %v4689_v34 = vrot.slane %v4687_v63, 4  ;;  %v7760_v43 = vld [vmem:[#allocation3 + $0x1e8] sm:$0xff]   ;;  %v5174_v52 = vld [vmem:[#allocation2 + $0x1c] sm:$0xf]  ;;  %v5177_v37 = vld [vmem:[#allocation2 + $0x28] sm:$0xf] }
 0x27b   : > { %7386 = vmatprep.subr.bf16.mxu1 %v7742_v23  ;;  %v6469_v17 = vcombine.low %v4411_v55, %v4421_v29  ;;  %v6488_v62 = vcombine.low %v4681_v60, %v4684_v31  ;;  %v4688_v54 = vsel %vm8441_vm5, %v6481_v16, %v4687_v63  ;;  %v4715_v30 = vrot.slane %v9535_v32, 5  ;;  %v7765_v55 = vld [vmem:[#allocation3 + $0x218] sm:$0xff]   ;;  %v5175_v19 = vld [vmem:[#allocation2 + $0x20] sm:$0x1]  ;;  %v5178_v60 = vld [vmem:[#allocation2 + $0x2c] sm:$0x1] }
 0x27c   : > { %7425 = vmatpush3.bf16.msra.mxu0 %v7749_v36  ;;  %v4691_v50 = vsel %vm8441_vm5, %v4689_v34, %v4690_v41  ;;  %v7761_v36 = vld [vmem:[#allocation3 + $0x220] sm:$0xff]   ;;  %v4704_v8 = vrot.slane %v9511_v61, 5  ;;  %v4698_v51 = vsel %vm8441_vm5, %v4696_v28, %v4697_v7  ;;  %v4711_v29 = vrot.slane %v9526_v24, 5  ;;  %v5600_v31 = vld [vmem:[#allocation2 + $0x24] sm:$0xe] }
 0x27d   : > { %7339 = vmatmul.mubr.bf16.gmra.mxu1 %v7741_v3  ;;  %7375 = vmatmul.mubr.bf16.gmra.mxu0 %v6469_v17  ;;  %v7758_v3 = vld [vmem:[#allocation2 + $0x3c] sm:$0xff]   ;;  %v6483_v32 = vrot.slane %v4637_v5, 9  ;;  %v4717_v35 = vrot.slane %v4715_v30, 4  ;;  %v4718_v61 = vrot.slane %v9537_v38, 5  ;;  %v6484_v56 = vrot.slane %v4638_v47, 9  ;;  %v7767_v38 = vld [vmem:[#allocation3 + $0x210] sm:$0xff]  }
 0x27e   : > { %7387 = vmatpush3.bf16.msra.mxu1 %v7742_v23  ;;  %7342 = vmatprep.mubr.bf16.mxu1 %v7746_v39  ;;  %v7759_v23 = vld [vmem:[#allocation3 + $0x228] sm:$0xff]   ;;  %v6482_v39 = vrot.slane %v4636_v42, 9  ;;  %v7763_v17 = vld [vmem:[#allocation3 + $0x1e0] sm:$0xff]   ;;  %v6485_v53 = vrot.slane %v4639_v18, 9  ;;  %v5633_v63 = vrot.slane %v5174_v52, 5  ;;  %v5636_v12 = vrot.slane %v5175_v19, 5 }
 0x27f   : > { %7388 = vmatprep.subr.bf16.mxu1 %v7744_v33  ;;  %7474 = vmatprep.subr.bf16.mxu0 %v7753_v48  ;;  %v4702_v24 = vsel %vm8441_vm5, %v6483_v32, %v4701_v45  ;;  %v9603_v9 = vsel %vm8441_vm5, %v4717_v35, %v4718_v61  ;;  %v5640_v41 = vrot.slane %v5177_v37, 5  ;;  %v5173_v34 = vld [vmem:[#allocation2 + $0x18] sm:$0xf]  ;;  %v7770_v42 = vld [vmem:[#allocation2 + $0x6c] sm:$0xff]   ;;  %v5231_v32 = vshll.u32 %v5177_v37, 16 }
 0x280   : > { %7426 = vmatprep.mubr.bf16.mxu0 %v7751_v26  ;;  %v4695_v49 = vsel %vm8441_vm5, %v6482_v39, %v4694_v46  ;;  %v6489_v26 = vcombine.low %v4688_v54, %v4691_v50  ;;  %v5635_v46 = vrot.slane %v5633_v63, 4  ;;  %v5634_v16 = vsel %vm8441_vm5, %v6534_v10, %v5633_v63  ;;  %v5601_v35 = vld [vmem:[#allocation2 + $0x30] sm:$0xe]  ;;  %v9623_v18 = vld [vmem:[#allocation2 + $0x38] sm:$0x1] }
 0x281   : > { %v5198_v7 = vshrl.u32 %v5173_v34, 16  ;;  %v5211_v39 = vshrl.u32 %v5174_v52, 16  ;;  %v5241_v47 = vshll.u32 %v5178_v60, 16  ;;  %v5650_v63 = vrot.slane %v9623_v18, 5 }
 0x282   : > { %7389 = vmatpush3.bf16.msra.mxu1 %v7744_v33  ;;  %v4703_v33 = vrot.slane %v4701_v45, 4  ;;  %v5201_v45 = vshll.u32 %v5173_v34, 16  ;;  %v5637_v28 = vsel %vm8441_vm5, %v5635_v46, %v5636_v12  ;;  %v9631_v12 = vld [vmem:[#allocation2 + $0x44] sm:$0x1] }
 0x283   : > { %7390 = vmatprep.subr.bf16.mxu1 %v7748_v1  ;;  %v5200_v50 = vrot.slane %v5198_v7, 4  ;;  %v5182_v7 = vld [vmem:[#allocation2 + $0x3c] sm:$0xf] }
 0x285   : > { %7343 = vmatmul.mubr.bf16.gmra.mxu1 %v7747_v6  ;;  %7427 = vmatmul.mubr.bf16.vlgmr.msra.gmra.mxu0 %v7752_v13  ;;  %v4705_v6 = vsel %vm8441_vm5, %v4703_v33, %v4704_v8  ;;  %v7766_v13 = vld [vmem:[#allocation3 + $0x1d8] sm:$0xff]   ;;  %v5213_v8 = vrot.slane %v5211_v39, 4 }
 0x286   : > { %7391 = vmatpush3.bf16.msra.mxu1 %v7748_v1  ;;  %7394 = vmatprep.mubr.bf16.mxu1 %v6486_v25  ;;  %v6490_v1 = vcombine.low %v4695_v49, %v4698_v51  ;;  %v9599_v25 = vsel %vm8441_vm5, %v6485_v53, %v4715_v30  ;;  %v7773_v30 = vld [vmem:[#allocation3 + $0x200] sm:$0xff]   ;;  %v9621_v51 = vld [vmem:[#allocation2 + $0x34] sm:$0xf] }
 0x287   : > { %7392 = vmatprep.subr.bf16.mxu1 %v7750_v59  ;;  %7475 = vmatpush3.bf16.msra.mxu0 %v7753_v48  ;;  %v4710_v48 = vrot.slane %v4708_v4, 4  ;;  %v6493_v15 = vcombine.low %v9599_v25, %v9603_v9  ;;  %v5259_v39 = vshrl.u32 %v9621_v51, 16 }
 0x288   : > { %7430 = vmatprep.mubr.bf16.mxu0 %v7756_v20  ;;  %7476 = vmatprep.subr.bf16.mxu0 %v7755_v21  ;;  %v7771_v20 = vld [vmem:[#allocation3 + $0x208] sm:$0xff]  }
 0x289   : > { %v4712_v11 = vsel %vm8441_vm5, %v4710_v48, %v4711_v29  ;;  %v7772_v29 = vld [vmem:[#allocation3 + $0x1c8] sm:$0xff]   ;;  %v5235_v48 = vshrl.u32 %v5177_v37, 16  ;;  %v5179_v37 = vld [vmem:[#allocation2 + $0x30] sm:$0xf] }
 0x28a   : > { %7393 = vmatpush3.bf16.msra.mxu1 %v7750_v59  ;;  %v4709_v59 = vsel %vm8441_vm5, %v6484_v56, %v4708_v4  ;;  %v6542_v4 = vcombine.low %v5634_v16, %v5637_v28  ;;  %v5249_v16 = vshll.u32 %v5179_v37, 16 }
 0x28b   : > { %7442 = vmatprep.subr.bf16.mxu1 %v7754_v58  ;;  %7477 = vmatpush3.bf16.msra.mxu0 %v7755_v21  ;;  %v6492_v21 = vcombine.low %v4709_v59, %v4712_v11  ;;  %v6536_v59 = vrot.slane %v5601_v35, 9 }
 0x28c   : > { %7478 = vmatprep.subr.bf16.mxu0 %v7759_v23  ;;  %v5251_v28 = vrot.slane %v5249_v16, 5 }
 0x28d   : > { %7395 = vmatmul.mubr.bf16.vlgmr.msra.gmra.mxu1 %v6487_v57  ;;  %7431 = vmatmul.mubr.bf16.gmra.mxu0 %v7758_v3  ;;  %v6535_v57 = vrot.slane %v5600_v31, 9  ;;  %v5207_v3 = vshll.u32 %v5174_v52, 16  ;;  %v9626_v52 = vld [vmem:[#allocation2 + $0x40] sm:$0xf] }
 0x28e   : > { %7443 = vmatpush3.bf16.msra.mxu1 %v7754_v58  ;;  %7398 = vmatprep.mubr.bf16.mxu1 %v6488_v62  ;;  %v6491_v58 = vcombine.low %v4702_v24, %v4705_v6  ;;  %v5642_v62 = vrot.slane %v5640_v41, 4  ;;  %v5233_v24 = vrot.slane %v5231_v32, 5  ;;  %v5237_v6 = vrot.slane %v5235_v48, 4 }
 0x28f   : > { %7444 = vmatprep.subr.bf16.mxu1 %v7757_v40  ;;  %7479 = vmatpush3.bf16.msra.mxu0 %v7759_v23  ;;  %v7769_v23 = vld [vmem:[#allocation3 + $0x1d0] sm:$0xff]   ;;  %v9613_v5 = vsel %vm8441_vm5, %v6535_v57, %v5640_v41 }
 0x290   : > { %7434 = vmatprep.mubr.bf16.mxu0 %v7762_v2  ;;  %7480 = vmatprep.subr.bf16.mxu0 %v7761_v36  ;;  %v5176_v2 = vld [vmem:[#allocation2 + $0x24] sm:$0xf]  ;;  %v5238_v27 = vor.u32 %v5237_v6, %v5233_v24 }
 0x291   : > { %v5222_v49 = vshrl.u32 %v5176_v2, 16 }
 0x292   : > { %7445 = vmatpush3.bf16.msra.mxu1 %v7757_v40  ;;  %v5643_v40 = vrot.slane %v5178_v60, 5  ;;  %v5239_v57 = vrot.slane %v5238_v27, 4 }
 0x293   : > { %7446 = vmatprep.subr.bf16.mxu1 %v7760_v43  ;;  %7481 = vmatpush3.bf16.msra.mxu0 %v7761_v36  ;;  %v5203_v36 = vrot.slane %v5201_v45, 5 }
 0x294   : > { %7482 = vmatprep.subr.bf16.mxu0 %v7765_v55  ;;  %v9617_v54 = vsel %vm8441_vm5, %v5642_v62, %v5643_v40  ;;  %v5654_v40 = vrot.slane %v9626_v52, 5 }
 0x295   : > { %7399 = vmatmul.mubr.bf16.gmra.mxu1 %v6489_v26  ;;  %7435 = vmatmul.mubr.bf16.gmra.mxu0 %v7764_v44  ;;  %v6543_v33 = vcombine.low %v9613_v5, %v9617_v54  ;;  %v5204_v26 = vor.u32 %v5203_v36, %v5200_v50  ;;  %v5270_v36 = vshrl.u32 %v5182_v7, 16 }
 0x296   : > { %7447 = vmatpush3.bf16.msra.mxu1 %v7760_v43  ;;  %7402 = vmatprep.mubr.bf16.mxu1 %v6490_v1  ;;  %v5209_v43 = vrot.slane %v5207_v3, 5  ;;  %v5224_v1 = vrot.slane %v5222_v49, 4  ;;  %v5657_v3 = vrot.slane %v9631_v12, 5  ;;  %v5656_v62 = vrot.slane %v5654_v40, 4 }
 0x297   : > { %7448 = vmatprep.subr.bf16.mxu1 %v7763_v17  ;;  %7483 = vmatpush3.bf16.msra.mxu0 %v7765_v55  ;;  %v5217_v55 = vshll.u32 %v5175_v19, 16  ;;  %v5205_v56 = vrot.slane %v5204_v26, 4  ;;  %v7774_v19 = vld [vmem:[#allocation3 + $0x1c0] sm:$0xff]   ;;  %v5261_v49 = vrot.slane %v5259_v39, 4  ;;  %v5279_v26 = vshll.u32 %v9626_v52, 16 }
 0x298   : > { %7438 = vmatprep.mubr.bf16.mxu0 %v7768_v0  ;;  %7484 = vmatprep.subr.bf16.mxu0 %v7767_v38  ;;  %v5214_v61 = vor.u32 %v5213_v8, %v5209_v43  ;;  %v5602_v0 = vld [vmem:[#allocation2 + $0x3c] sm:$0xe]  ;;  %v5658_v5 = vsel %vm8441_vm5, %v5656_v62, %v5657_v3  ;;  %v5603_v8 = vld [vmem:[#allocation2 + $0x48] sm:$0xe]  ;;  %v5272_v48 = vrot.slane %v5270_v36, 4 }
 0x299   : > { %v5219_v44 = vrot.slane %v5217_v55, 5  ;;  %v6537_v31 = vrot.slane %v5602_v0, 9 }
 0x29a   : > { %7449 = vmatpush3.bf16.msra.mxu1 %v7763_v17  ;;  %v5225_v17 = vshll.u32 %v5176_v2, 16  ;;  %v5215_v11 = vrot.slane %v5214_v61, 4  ;;  %v5604_v61 = vld [vmem:[#allocation2 + $0x54] sm:$0xe] }
 0x29b   : > { %7450 = vmatprep.subr.bf16.mxu1 %v7766_v13  ;;  %7485 = vmatpush3.bf16.msra.mxu0 %v7767_v38  ;;  %v5243_v38 = vrot.slane %v5241_v47, 5  ;;  %v5655_v2 = vsel %vm8441_vm5, %v6537_v31, %v5654_v40  ;;  %v5289_v47 = vshll.u32 %v9631_v12, 16 }
 0x29c   : > { %7486 = vmatprep.subr.bf16.mxu0 %v7771_v20  ;;  %v5227_v53 = vrot.slane %v5225_v17, 5  ;;  %v6545_v54 = vcombine.low %v5655_v2, %v5658_v5  ;;  %v5187_v17 = vld [vmem:[#allocation2 + $0x50] sm:$0x1] }
 0x29d   : > { %7403 = vmatmul.mubr.bf16.gmra.mxu1 %v6491_v58  ;;  %7439 = vmatmul.mubr.bf16.gmra.mxu0 %v7770_v42  ;;  %v5210_v58 = vsel %vm8127_vm2, %v5205_v56, %v5209_v43  ;;  %v5244_v9 = vsel %vm8127_vm2, %v5239_v57, %v5243_v38  ;;  %v5255_v43 = vshll.u32 %v9621_v51, 16  ;;  %v9658_v56 = vld [vmem:[#allocation2 + $0x58] sm:$0xf]  ;;  %v5185_v38 = vld [vmem:[#allocation2 + $0x48] sm:$0xf] }
 0x29e   : > { %7451 = vmatpush3.bf16.msra.mxu1 %v7766_v13  ;;  %7406 = vmatprep.mubr.bf16.mxu1 %v6492_v21  ;;  %v5647_v13 = vrot.slane %v9621_v51, 5  ;;  %v5220_v21 = vsel %vm8127_vm2, %v5215_v11, %v5219_v44  ;;  %v5283_v51 = vshrl.u32 %v9626_v52, 16  ;;  %v5190_v11 = vld [vmem:[#allocation2 + $0x5c] sm:$0x1]  ;;  %v5664_v52 = vrot.slane %v5187_v17, 5 }
 0x29f   : > { %7452 = vmatprep.subr.bf16.mxu1 %v7769_v23  ;;  %7487 = vmatpush3.bf16.msra.mxu0 %v7771_v20  ;;  %v5228_v20 = vor.u32 %v5227_v53, %v5224_v1  ;;  %v6518_v41 = vcombine.low %v5210_v58, %v5220_v21  ;;  %v5257_v55 = vrot.slane %v5255_v43, 5  ;;  %v5281_v1 = vrot.slane %v5279_v26, 5  ;;  %v5188_v57 = vld [vmem:[#allocation2 + $0x54] sm:$0xf] }
 0x2a0   : > { %7490 = vmatprep.mubr.bf16.mxu0 %v6542_v4  ;;  %7488 = vmatprep.subr.bf16.mxu0 %v7773_v30  ;;  %v5648_v10 = vsel %vm8441_vm5, %v6536_v59, %v5647_v13  ;;  %v5649_v60 = vrot.slane %v5647_v13, 4  ;;  %v5265_v4 = vshll.u32 %v9623_v18, 16  ;;  %v6538_v18 = vrot.slane %v5603_v8, 9 }
 0x2a1   : > { %v5229_v46 = vrot.slane %v5228_v20, 4  ;;  %v5262_v44 = vor.u32 %v5261_v49, %v5257_v55  ;;  %v5285_v6 = vrot.slane %v5283_v51, 4  ;;  %v5291_v13 = vrot.slane %v5289_v47, 5  ;;  %v5195_v47 = vld [vmem:[#allocation2 + $0x70] sm:$0xf] }
 0x2a2   : > { %7453 = vmatpush3.bf16.msra.mxu1 %v7769_v23  ;;  %v5651_v34 = vsel %vm8441_vm5, %v5649_v60, %v5650_v63  ;;  %v5246_v23 = vshrl.u32 %v5179_v37, 16  ;;  %v5668_v37 = vrot.slane %v9658_v56, 5  ;;  %v5671_v21 = vrot.slane %v5190_v11, 5 }
 0x2a3   : > { %7454 = vmatprep.subr.bf16.mxu1 %v7772_v29  ;;  %7489 = vmatpush3.bf16.msra.mxu0 %v7773_v30  ;;  %v5234_v25 = vsel %vm8127_vm2, %v5229_v46, %v5233_v24  ;;  %v5273_v30 = vshll.u32 %v5182_v7, 16  ;;  %v5263_v59 = vrot.slane %v5262_v44, 4  ;;  %v5286_v20 = vor.u32 %v5285_v6, %v5281_v1 }
 0x2a4   : > { %v6519_v45 = vcombine.low %v5234_v25, %v5244_v9  ;;  %v5248_v42 = vrot.slane %v5246_v23, 4  ;;  %v5670_v3 = vrot.slane %v5668_v37, 4  ;;  %v5297_v25 = vshll.u32 %v5185_v38, 16 }
 0x2a5   : > { %7407 = vmatmul.mubr.bf16.gmra.mxu1 %v6493_v15  ;;  %v6544_v15 = vcombine.low %v5648_v10, %v5651_v34  ;;  %v5275_v35 = vrot.slane %v5273_v30, 5  ;;  %v5294_v10 = vshrl.u32 %v5185_v38, 16  ;;  %v5318_v2 = vshrl.u32 %v5188_v57, 16 }
 0x2a6   : > { %7455 = vmatpush3.bf16.msra.mxu1 %v7772_v29  ;;  %7458 = vmatprep.mubr.bf16.mxu1 %v6518_v41  ;;  %v5252_v50 = vor.u32 %v5251_v28, %v5248_v42  ;;  %v5267_v29 = vrot.slane %v5265_v4, 5  ;;  %v5287_v41 = vrot.slane %v5286_v20, 4  ;;  %v5672_v7 = vsel %vm8441_vm5, %v5670_v3, %v5671_v21  ;;  %v5192_v42 = vld [vmem:[#allocation2 + $0x64] sm:$0xf]  ;;  %v5605_v4 = vld [vmem:[#allocation2 + $0x60] sm:$0xe] }
 0x2a7   : > { %7456 = vmatprep.subr.bf16.mxu1 %v7774_v19  ;;  %7491 = vmatmul.mubr.bf16.vlgmr.msra.gmra.mxu0 %v6543_v33  ;;  %v5186_v33 = vld [vmem:[#allocation2 + $0x4c] sm:$0xf]  ;;  %v5276_v24 = vor.u32 %v5275_v35, %v5272_v48  ;;  %v5296_v23 = vrot.slane %v5294_v10, 4  ;;  %v5299_v5 = vrot.slane %v5297_v25, 5  ;;  %v5321_v36 = vshll.u32 %v5188_v57, 16 }
 0x2a8   : > { %7494 = vmatprep.mubr.bf16.mxu0 %v6544_v15  ;;  %v5253_v32 = vrot.slane %v5252_v50, 4  ;;  %v5661_v0 = vrot.slane %v5186_v33, 5  ;;  %v5268_v12 = vsel %vm8127_vm2, %v5263_v59, %v5267_v29  ;;  %v5292_v16 = vsel %vm8127_vm2, %v5287_v41, %v5291_v13  ;;  %v5193_v29 = vld [vmem:[#allocation2 + $0x68] sm:$0x1]  ;;  %v5606_v35 = vld [vmem:[#allocation2 + $0x6c] sm:$0xe] }
 0x2a9   : > { %v5277_v58 = vrot.slane %v5276_v24, 4  ;;  %v5303_v9 = vshll.u32 %v5186_v33, 16  ;;  %v5307_v15 = vshrl.u32 %v5186_v33, 16  ;;  %v5320_v50 = vrot.slane %v5318_v2, 4  ;;  %v5194_v41 = vld [vmem:[#allocation2 + $0x6c] sm:$0xf] }
 0x2aa   : > { %7457 = vmatpush3.bf16.msra.mxu1 %v7774_v19  ;;  %v5258_v53 = vsel %vm8127_vm2, %v5253_v32, %v5257_v55  ;;  %v6539_v19 = vrot.slane %v5604_v61, 9  ;;  %v5662_v27 = vsel %vm8441_vm5, %v6538_v18, %v5661_v0  ;;  %v5663_v63 = vrot.slane %v5661_v0, 4  ;;  %v5196_v0 = vld [vmem:[#allocation2 + $0x74] sm:$0x1] }
 0x2ab   : > { %v6520_v60 = vcombine.low %v5258_v53, %v5268_v12  ;;  %v5282_v31 = vsel %vm8127_vm2, %v5277_v58, %v5281_v1  ;;  %v5305_v43 = vrot.slane %v5303_v9, 5  ;;  %v5309_v39 = vrot.slane %v5307_v15, 4 }
 0x2ac   : > { %v5665_v46 = vsel %vm8441_vm5, %v5663_v63, %v5664_v52  ;;  %v5669_v34 = vsel %vm8441_vm5, %v6539_v19, %v5668_v37  ;;  %v6521_v62 = vcombine.low %v5282_v31, %v5292_v16  ;;  %v5327_v30 = vshll.u32 %v9658_v56, 16 }
 0x2ad   : > { %7459 = vmatmul.mubr.bf16.vlgmr.msra.gmra.mxu1 %v6519_v45  ;;  %v6546_v40 = vcombine.low %v5662_v27, %v5665_v46  ;;  %v5313_v45 = vshll.u32 %v5187_v17, 16  ;;  %v6547_v28 = vcombine.low %v5669_v34, %v5672_v7  ;;  %v5300_v33 = vor.u32 %v5299_v5, %v5296_v23 }
 0x2ae   : > { %7462 = vmatprep.mubr.bf16.mxu1 %v6520_v60  ;;  %v5310_v8 = vor.u32 %v5309_v39, %v5305_v43  ;;  %v5331_v55 = vshrl.u32 %v9658_v56, 16  ;;  %v5337_v49 = vshll.u32 %v5190_v11, 16  ;;  %v5323_v26 = vrot.slane %v5321_v36, 5  ;;  %v5191_v56 = vld [vmem:[#allocation2 + $0x60] sm:$0xf] }
 0x2af   : > { %7495 = vmatmul.mubr.bf16.gmra.mxu0 %v6545_v54  ;;  %v5315_v54 = vrot.slane %v5313_v45, 5  ;;  %v5329_v17 = vrot.slane %v5327_v30, 5  ;;  %v6540_v32 = vrot.slane %v5605_v4, 9  ;;  %v5675_v48 = vrot.slane %v5192_v42, 5 }
 0x2b0   : > { %7498 = vmatprep.mubr.bf16.mxu0 %v6546_v40  ;;  %v5301_v51 = vrot.slane %v5300_v33, 4  ;;  %v5311_v61 = vrot.slane %v5310_v8, 4  ;;  %v5333_v44 = vrot.slane %v5331_v55, 4  ;;  %v5339_v1 = vrot.slane %v5337_v49, 5 }
 0x2b1   : > { %v5324_v18 = vor.u32 %v5323_v26, %v5320_v50  ;;  %v5676_v53 = vsel %vm8441_vm5, %v6540_v32, %v5675_v48  ;;  %v5677_v24 = vrot.slane %v5675_v48, 4  ;;  %v5678_v6 = vrot.slane %v5193_v29, 5 }
 0x2b2   : > { %v5306_v11 = vsel %vm8127_vm2, %v5301_v51, %v5305_v43  ;;  %v5316_v38 = vsel %vm8127_vm2, %v5311_v61, %v5315_v54  ;;  %v5334_v59 = vor.u32 %v5333_v44, %v5329_v17  ;;  %v6541_v13 = vrot.slane %v5606_v35, 9 }
 0x2b3   : > { %v6522_v52 = vcombine.low %v5306_v11, %v5316_v38  ;;  %v5325_v19 = vrot.slane %v5324_v18, 4  ;;  %v5679_v58 = vsel %vm8441_vm5, %v5677_v24, %v5678_v6  ;;  %v5682_v20 = vrot.slane %v5195_v47, 5 }
 0x2b4   : > { %v5335_v27 = vrot.slane %v5334_v59, 4  ;;  %v6548_v63 = vcombine.low %v5676_v53, %v5679_v58  ;;  %v5685_v12 = vrot.slane %v5196_v0, 5  ;;  %v5342_v37 = vshrl.u32 %v5191_v56, 16 }
 0x2b5   : > { %7463 = vmatmul.mubr.bf16.gmra.mxu1 %v6521_v62  ;;  %v5330_v21 = vsel %vm8127_vm2, %v5325_v19, %v5329_v17  ;;  %v5683_v10 = vsel %vm8441_vm5, %v6541_v13, %v5682_v20  ;;  %v5684_v60 = vrot.slane %v5682_v20, 4  ;;  %v5345_v31 = vshll.u32 %v5191_v56, 16 }
 0x2b6   : > { %7466 = vmatprep.mubr.bf16.mxu1 %v6522_v52  ;;  %v5340_v46 = vsel %vm8127_vm2, %v5335_v27, %v5339_v1  ;;  %v5344_v57 = vrot.slane %v5342_v37, 4  ;;  %v5351_v40 = vshll.u32 %v5192_v42, 16  ;;  %v5355_v34 = vshrl.u32 %v5192_v42, 16 }
 0x2b7   : > { %7499 = vmatmul.mubr.bf16.gmra.mxu0 %v6547_v28  ;;  %v6523_v3 = vcombine.low %v5330_v21, %v5340_v46  ;;  %v5686_v23 = vsel %vm8441_vm5, %v5684_v60, %v5685_v12  ;;  %v5347_v16 = vrot.slane %v5345_v31, 5  ;;  %v5361_v25 = vshll.u32 %v5193_v29, 16 }
 0x2b8   : > { %7502 = vmatprep.mubr.bf16.mxu0 %v6548_v63  ;;  %v6549_v9 = vcombine.low %v5683_v10, %v5686_v23  ;;  %v5353_v15 = vrot.slane %v5351_v40, 5  ;;  %v5357_v62 = vrot.slane %v5355_v34, 4  ;;  %v5366_v7 = vshrl.u32 %v5194_v41, 16 }
 0x2b9   : > { %v5348_v45 = vor.u32 %v5347_v16, %v5344_v57  ;;  %v5363_v2 = vrot.slane %v5361_v25, 5  ;;  %v5369_v28 = vshll.u32 %v5194_v41, 16  ;;  %v5375_v5 = vshll.u32 %v5195_v47, 16 }
 0x2ba   : > { %v5358_v43 = vor.u32 %v5357_v62, %v5353_v15  ;;  %v5368_v39 = vrot.slane %v5366_v7, 4  ;;  %v5379_v4 = vshrl.u32 %v5195_v47, 16  ;;  %v5385_v42 = vshll.u32 %v5196_v0, 16 }
 0x2bb   : > { %v5349_v54 = vrot.slane %v5348_v45, 4  ;;  %v5371_v50 = vrot.slane %v5369_v28, 5  ;;  %v5377_v14 = vrot.slane %v5375_v5, 5 }
 0x2bc   : > { %v5359_v36 = vrot.slane %v5358_v43, 4  ;;  %v5381_v30 = vrot.slane %v5379_v4, 4  ;;  %v5387_v29 = vrot.slane %v5385_v42, 5 }
 0x2bd   : > { %7467 = vmatmul.mubr.bf16.gmra.mxu1 %v6523_v3  ;;  %v5354_v33 = vsel %vm8127_vm2, %v5349_v54, %v5353_v15  ;;  %v5372_v8 = vor.u32 %v5371_v50, %v5368_v39 }
 0x2be   : > { %v5364_v55 = vsel %vm8127_vm2, %v5359_v36, %v5363_v2  ;;  %v5382_v49 = vor.u32 %v5381_v30, %v5377_v14 }
 0x2bf   : > { %7503 = vmatmul.mubr.bf16.gmra.mxu0 %v6549_v9  ;;  %v6524_v26 = vcombine.low %v5354_v33, %v5364_v55  ;;  %v5373_v17 = vrot.slane %v5372_v8, 4 }
 0x2c0   : > { %v5383_v32 = vrot.slane %v5382_v49, 4 }
 0x2c1   : > { %7470 = vmatprep.mubr.bf16.mxu1 %v6524_v26  ;;  %v5378_v48 = vsel %vm8127_vm2, %v5373_v17, %v5377_v14 }
 0x2c2   : > { %v5388_v35 = vsel %vm8127_vm2, %v5383_v32, %v5387_v29 }
 0x2c3   : > { %v6525_v51 = vcombine.low %v5378_v48, %v5388_v35 }
 0x2c5   : > { %7471 = vmatmul.mubr.bf16.gmra.mxu1 %v6525_v51 }
 0x2ed   : > { %v7236_v61 = vpop.f32.mrf.mxu1 }
 0x2ef   : > { %v3417_v44 = vpop.f32.mrf.mxu1 }
 0x2f1   : > { %v7237_v1 = vpop.f32.mrf.mxu1 }
 0x2f3   : > { %v3420_v47 = vpop.f32.mrf.mxu1 }
 0x2f5   : > { %v7240_v18 = vpop.f32.mrf.mxu1 }
 0x2f7   : > { %v3433_v53 = vpop.f32.mrf.mxu1 }
 0x2f9   : > { %v7241_v24 = vpop.f32.mrf.mxu1 }
 0x2fb   : > { %v3436_v6 = vpop.f32.mrf.mxu1 }
 0x2fd   : > { %v7244_v0 = vpop.f32.mrf.mxu1  ;;  %v7300_v38 = vpop.f32.mrf.mxu0 }
 0x2ff   : > { %v3449_v56 = vpop.f32.mrf.mxu1  ;;  %v3884_v13 = vpop.f32.mrf.mxu0 }
 0x301   : > { %v7245_v11 = vpop.f32.mrf.mxu1  ;;  %v7301_v19 = vpop.f32.mrf.mxu0 }
 0x303   : > { %v3452_v59 = vpop.f32.mrf.mxu1  ;;  %v3887_v58 = vpop.f32.mrf.mxu0 }
 0x305   : > { %v7248_v52 = vpop.f32.mrf.mxu1  ;;  %v7304_v27 = vpop.f32.mrf.mxu0 }
 0x307   : > { %v3465_v22 = vpop.f32.mrf.mxu1  ;;  %v3900_v12 = vpop.f32.mrf.mxu0 }
 0x309   : > { %v7249_v20 = vpop.f32.mrf.mxu1  ;;  %v7305_v21 = vpop.f32.mrf.mxu0 }
 0x30b   : > { %v3468_v63 = vpop.f32.mrf.mxu1  ;;  %v3903_v31 = vpop.f32.mrf.mxu0 }
 0x30d   : > { %v7268_v37 = vpop.f32.mrf.mxu1 }
 0x30e   : > { %v3619_v10 = vadd.f32 %v7268_v37, %v7236_v61 }
 0x30f   : > { %v3610_v60 = vpop.f32.mrf.mxu1  ;;  %v7308_v40 = vpop.f32.mrf.mxu0 }
 0x310   : > { %v3611_v41 = vadd.f32 %v3610_v60, %v3417_v44  ;;  %v9703_v46 = vadd.f32 %v7300_v38, %v3619_v10 }
 0x311   : > { %v7269_v57 = vpop.f32.mrf.mxu1  ;;  %v3916_v16 = vpop.f32.mrf.mxu0 }
 0x312   : > { %v3622_v34 = vadd.f32 %v7269_v57, %v7237_v1  ;;  %v9705_v3 = vadd.f32 %v3884_v13, %v3611_v41 }
 0x313   : > { %v3613_v23 = vpop.f32.mrf.mxu1  ;;  %v7309_v62 = vpop.f32.mrf.mxu0 }
 0x314   : > { %v3614_v25 = vadd.f32 %v3613_v23, %v3420_v47  ;;  %v9707_v9 = vadd.f32 %v7301_v19, %v3622_v34 }
 0x315   : > { %v7272_v15 = vpop.f32.mrf.mxu1  ;;  %v3919_v28 = vpop.f32.mrf.mxu0 }
 0x316   : > { %v3635_v7 = vadd.f32 %v7272_v15, %v7240_v18  ;;  %v9709_v45 = vadd.f32 %v3887_v58, %v3614_v25 }
 0x317   : > { %v3626_v2 = vpop.f32.mrf.mxu1  ;;  %v7312_v4 = vpop.f32.mrf.mxu0 }
 0x318   : > { %v3627_v5 = vadd.f32 %v3626_v2, %v3433_v53  ;;  %v9711_v43 = vadd.f32 %v7304_v27, %v3635_v7 }
 0x319   : > { %v7273_v39 = vpop.f32.mrf.mxu1  ;;  %v3932_v14 = vpop.f32.mrf.mxu0 }
 0x31a   : > { %v3638_v42 = vadd.f32 %v7273_v39, %v7241_v24  ;;  %v9713_v54 = vadd.f32 %v3900_v12, %v3627_v5 }
 0x31b   : > { %v3629_v50 = vpop.f32.mrf.mxu1  ;;  %v7313_v8 = vpop.f32.mrf.mxu0 }
 0x31c   : > { %v3630_v36 = vadd.f32 %v3629_v50, %v3436_v6  ;;  %v9715_v30 = vadd.f32 %v7305_v21, %v3638_v42 }
 0x31d   : > { %v7276_v33 = vpop.f32.mrf.mxu1  ;;  %v3935_v26 = vpop.f32.mrf.mxu0 }
 0x31e   : > { %v3651_v55 = vadd.f32 %v7276_v33, %v7244_v0  ;;  %v9717_v49 = vadd.f32 %v3903_v31, %v3630_v36 }
 0x31f   : > { %v3642_v29 = vpop.f32.mrf.mxu1  ;;  %v9721_v51 = vpop.f32.mrf.mxu0 }
 0x320   : > { %v3643_v17 = vadd.f32 %v3642_v29, %v3449_v56  ;;  %v9719_v32 = vadd.f32 %v7308_v40, %v3651_v55 }
 0x321   : > { %v7277_v48 = vpop.f32.mrf.mxu1  ;;  %v9725_v47 = vpop.f32.mrf.mxu0 }
 0x322   : > { %v3654_v35 = vadd.f32 %v7277_v48, %v7245_v11  ;;  %v9723_v61 = vadd.f32 %v3916_v16, %v3643_v17 }
 0x323   : > { %v3645_v44 = vpop.f32.mrf.mxu1  ;;  %v9729_v6 = vpop.f32.mrf.mxu0 }
 0x324   : > { %v3646_v1 = vadd.f32 %v3645_v44, %v3452_v59  ;;  %v9727_v18 = vadd.f32 %v7309_v62, %v3654_v35 }
 0x325   : > { %v7280_v53 = vpop.f32.mrf.mxu1  ;;  %v9733_v13 = vpop.f32.mrf.mxu0 }
 0x326   : > { %v3667_v24 = vadd.f32 %v7280_v53, %v7248_v52  ;;  %v9731_v0 = vadd.f32 %v3919_v28, %v3646_v1 }
 0x327   : > { %v3658_v56 = vpop.f32.mrf.mxu1  ;;  %v9735_v27 = vpop.f32.mrf.mxu0 }
 0x328   : > { %v3659_v38 = vadd.f32 %v3658_v56, %v3465_v22  ;;  %v3961_v11 = vadd.f32 %v7312_v4, %v3667_v24 }
 0x329   : > { %v7281_v19 = vpop.f32.mrf.mxu1  ;;  %v9737_v21 = vpop.f32.mrf.mxu0 }
 0x32a   : > { %v3670_v58 = vadd.f32 %v7281_v19, %v7249_v20  ;;  %v3959_v59 = vadd.f32 %v3932_v14, %v3659_v38 }
 0x32b   : > { %v3661_v12 = vpop.f32.mrf.mxu1  ;;  %v9739_v60 = vpop.f32.mrf.mxu0 }
 0x32c   : > { %v3662_v37 = vadd.f32 %v3661_v12, %v3468_v63  ;;  %v3962_v10 = vadd.f32 %v7313_v8, %v3670_v58 }
 0x32d   : > { %v7332_v52 = vpop.f32.mrf.mxu1  ;;  %v9741_v22 = vpop.f32.mrf.mxu0 }
 0x32e   : > { %v3960_v31 = vadd.f32 %v3935_v26, %v3662_v37 }
 0x32f   : > { %v4127_v41 = vpop.f32.mrf.mxu1  ;;  %v9747_v20 = vpop.f32.mrf.mxu0 }
 0x331   : > { %v7333_v57 = vpop.f32.mrf.mxu1  ;;  %v9751_v63 = vpop.f32.mrf.mxu0 }
 0x333   : > { %v9743_v40 = vpop.f32.mrf.mxu1  ;;  %v9755_v25 = vpop.f32.mrf.mxu0 }
 0x335   : > { %v9745_v34 = vpop.f32.mrf.mxu1  ;;  %v9759_v62 = vpop.f32.mrf.mxu0 }
 0x336   : > { %10107 = vst [vmem:[#allocation16_spill] sm:$0xff] %v9759_v62 }
 0x337   : > { %v9749_v23 = vpop.f32.mrf.mxu1 }
 0x339   : > { %v9753_v16 = vpop.f32.mrf.mxu1 }
 0x33b   : > { %v9757_v15 = vpop.f32.mrf.mxu1 }
 0x33d   : > { %v9761_v7 = vpop.f32.mrf.mxu1  ;;  %v7376_v28 = vpop.f32.mrf.mxu0 }
 0x33f   : > { %v9763_v2 = vpop.f32.mrf.mxu1  ;;  %v4601_v39 = vpop.f32.mrf.mxu0 }
 0x341   : > { %v9765_v5 = vpop.f32.mrf.mxu1  ;;  %v7377_v42 = vpop.f32.mrf.mxu0 }
 0x343   : > { %v9767_v4 = vpop.f32.mrf.mxu1  ;;  %v4604_v36 = vpop.f32.mrf.mxu0 }
 0x345   : > { %v7344_v50 = vpop.f32.mrf.mxu1  ;;  %v7428_v55 = vpop.f32.mrf.mxu0 }
 0x346   : > { %v4204_v14 = vadd.f32 %v7344_v50, %v3961_v11 }
 0x347   : > { %v4175_v33 = vpop.f32.mrf.mxu1  ;;  %v5094_v48 = vpop.f32.mrf.mxu0 }
 0x348   : > { %v4202_v8 = vadd.f32 %v4175_v33, %v3959_v59  ;;  %v9769_v29 = vadd.f32 %v7376_v28, %v4204_v14 }
 0x349   : > { %v7345_v26 = vpop.f32.mrf.mxu1  ;;  %v7429_v53 = vpop.f32.mrf.mxu0 }
 0x34a   : > { %10108 = vst [vmem:[#allocation19_spill] sm:$0xff] %v9769_v29  ;;  %v4205_v17 = vadd.f32 %v7345_v26, %v3962_v10  ;;  %v9771_v35 = vadd.f32 %v4601_v39, %v4202_v8  ;;  %v4190_v29 = vadd.f32 %v4127_v41, %v9705_v3 }
 0x34b   : > { %v4178_v44 = vpop.f32.mrf.mxu1  ;;  %v9775_v38 = vpop.f32.mrf.mxu0 }
 0x34c   : > { %10109 = vst [vmem:[#allocation22_spill] sm:$0xff] %v9771_v35  ;;  %v4203_v1 = vadd.f32 %v4178_v44, %v3960_v31  ;;  %v9773_v24 = vadd.f32 %v7377_v42, %v4205_v17 }
 0x34d   : > { %v7396_v56 = vpop.f32.mrf.mxu1  ;;  %v9779_v58 = vpop.f32.mrf.mxu0 }
 0x34e   : > { %10110 = vst [vmem:[#allocation30_spill] sm:$0xff] %v9773_v24  ;;  %v9777_v11 = vadd.f32 %v4604_v36, %v4203_v1 }
 0x34f   : > { %v4851_v19 = vpop.f32.mrf.mxu1  ;;  %v9781_v12 = vpop.f32.mrf.mxu0 }
 0x350   : > { %10111 = vst [vmem:[#allocation31_spill] sm:$0xff] %v9777_v11  ;;  %v4192_v11 = vadd.f32 %v7332_v52, %v9703_v46  ;;  %v4191_v46 = vadd.f32 %v9743_v40, %v9709_v45 }
 0x351   : > { %v7397_v59 = vpop.f32.mrf.mxu1  ;;  %v9783_v10 = vpop.f32.mrf.mxu0 }
 0x353   : > { %v4854_v37 = vpop.f32.mrf.mxu1  ;;  %v9785_v39 = vpop.f32.mrf.mxu0 }
 0x355   : > { %v7400_v28 = vpop.f32.mrf.mxu1  ;;  %v9787_v42 = vpop.f32.mrf.mxu0 }
 0x356   : > { %10112 = vst [vmem:[#allocation32_spill] sm:$0xff] %v9787_v42  ;;  %v4618_v42 = vadd.f32 %v9721_v51, %v4192_v11  ;;  %v4617_v11 = vadd.f32 %v9733_v13, %v4191_v46 }
 0x357   : > { %v4867_v31 = vpop.f32.mrf.mxu1  ;;  %v9791_v14 = vpop.f32.mrf.mxu0 }
 0x358   : > { %10113 = vst [vmem:[#allocation33_spill] sm:$0xff] %v9791_v14  ;;  %v4916_v52 = vadd.f32 %v7396_v56, %v4618_v42 }
 0x359   : > { %v9789_v50 = vpop.f32.mrf.mxu1  ;;  %v9795_v33 = vpop.f32.mrf.mxu0 }
 0x35a   : > { %10114 = vst [vmem:[#allocation34_spill] sm:$0xff] %v9795_v33 }
 0x35b   : > { %v9793_v36 = vpop.f32.mrf.mxu1  ;;  %v9799_v26 = vpop.f32.mrf.mxu0 }
 0x35c   : > { %10115 = vst [vmem:[#allocation35_spill] sm:$0xff] %v9799_v26  ;;  %v4193_v26 = vadd.f32 %v7333_v57, %v9707_v9  ;;  %v4196_v9 = vadd.f32 %v9745_v34, %v9711_v43  ;;  %v9842_v34 = vld [vmem:[%s10003_s4] ss:$0 sm:$0xff] }
 0x35d   : > { %v9797_v8 = vpop.f32.mrf.mxu1  ;;  %v9803_v44 = vpop.f32.mrf.mxu0 }
 0x35e   : > { %10116 = vst [vmem:[#allocation36_spill] sm:$0xff] %v9803_v44  ;;  %v4622_v43 = vadd.f32 %v9735_v27, %v4196_v9 }
 0x35f   : > { %v9801_v17 = vpop.f32.mrf.mxu1  ;;  %v9808_v24 = vpop.f32.mrf.mxu0 }
 0x360   : > { %10117 = vst [vmem:[#allocation37_spill] sm:$0xff] %v9808_v24  ;;  %v4616_v24 = vadd.f32 %v9725_v47, %v4190_v29  ;;  %v4194_v47 = vadd.f32 %v9749_v23, %v9713_v54  ;;  %v4915_v29 = vadd.f32 %v4854_v37, %v4617_v11 }
 0x361   : > { %v9805_v1 = vpop.f32.mrf.mxu1  ;;  %v9813_v14 = vpop.f32.mrf.mxu0 }
 0x362   : > { %10119 = vst [vmem:[#allocation39_spill] sm:$0xff] %v9813_v14  ;;  %v4914_v41 = vadd.f32 %v4851_v19, %v4616_v24  ;;  %v4619_v14 = vadd.f32 %v9729_v6, %v4193_v26  ;;  %v4197_v6 = vadd.f32 %v9753_v16, %v9715_v30  ;;  %v4620_v30 = vadd.f32 %v9737_v21, %v4194_v47  ;;  %v10123_v16 = vld [vmem:[#allocation10_spill] sm:$0xff] }
 0x363   : > { %v9810_v35 = vpop.f32.mrf.mxu1  ;;  %v9819_v62 = vpop.f32.mrf.mxu0  ;;  %v5913_v27 = vunpack.c.l.bf16 %v10123_v16  ;;  %v4201_v16 = vadd.f32 %v9765_v5, %v9727_v18 }
 0x364   : > { %10118 = vst [vmem:[#allocation38_spill] sm:$0xff] %v9810_v35  ;;  %10121 = vst [vmem:[#allocation9_spill] sm:$0xff] %v9819_v62  ;;  %v4917_v57 = vadd.f32 %v7397_v59, %v4619_v14  ;;  %v5159_v62 = vadd.f32 %v7428_v55, %v4916_v52  ;;  %v5157_v24 = vadd.f32 %v5094_v48, %v4914_v41  ;;  %v10122_v59 = vld [vmem:[#allocation12_spill] sm:$0xff] }
 0x365   : > { %v9815_v33 = vpop.f32.mrf.mxu1  ;;  %v5915_v42 = vunpack.c.l.bf16 %v10122_v59  ;;  %v4920_v48 = vadd.f32 %v7400_v28, %v4622_v43  ;;  %v4918_v9 = vadd.f32 %v4867_v31, %v4620_v30 }
 0x366   : > { %10120 = vst [vmem:[#allocation40_spill] sm:$0xff] %v9815_v33  ;;  %v5160_v23 = vadd.f32 %v7429_v53, %v4917_v57  ;;  %v4623_v53 = vadd.f32 %v9739_v60, %v4197_v6  ;;  %v10124_v57 = vld [vmem:[#allocation13_spill] sm:$0xff] }
 0x367   : > { %v9821_v44 = vpop.f32.mrf.mxu1  ;;  %v7492_v35 = vpop.f32.mrf.mxu0  ;;  %v5916_v11 = vunpack.c.l.bf16 %v10124_v57  ;;  %v5163_v31 = vadd.f32 %v9779_v58, %v4920_v48 }
 0x369   : > { %v9826_v3 = vpop.f32.mrf.mxu1  ;;  %v5818_v33 = vpop.f32.mrf.mxu0 }
 0x36b   : > { %v9831_v51 = vpop.f32.mrf.mxu1  ;;  %v7493_v45 = vpop.f32.mrf.mxu0 }
 0x36d   : > { %v7460_v40 = vpop.f32.mrf.mxu1  ;;  %v5821_v19 = vpop.f32.mrf.mxu0 }
 0x36e   : > { %v5585_v56 = vadd.f32 %v7460_v40, %v5159_v62  ;;  %v4195_v62 = vadd.f32 %v9757_v15, %v9717_v49 }
 0x36f   : > { %v5520_v13 = vpop.f32.mrf.mxu1  ;;  %v7496_v37 = vpop.f32.mrf.mxu0 }
 0x370   : > { %v5883_v55 = vadd.f32 %v7492_v35, %v5585_v56  ;;  %v5583_v54 = vadd.f32 %v5520_v13, %v5157_v24  ;;  %v5158_v35 = vadd.f32 %v9775_v38, %v4915_v29  ;;  %v4921_v56 = vadd.f32 %v9789_v50, %v4623_v53  ;;  %v10125_v24 = vld [vmem:[#allocation11_spill] sm:$0xff] }
 0x371   : > { %v7461_v14 = vpop.f32.mrf.mxu1  ;;  %v5834_v41 = vpop.f32.mrf.mxu0  ;;  %v5914_v38 = vunpack.c.l.bf16 %v10125_v24  ;;  %v5161_v50 = vadd.f32 %v9781_v12, %v4918_v9 }
 0x372   : > { %v5938_v26 = vadd.f32 %v9842_v34, %v5883_v55  ;;  %v5881_v46 = vadd.f32 %v5818_v33, %v5583_v54  ;;  %v5586_v52 = vadd.f32 %v7461_v14, %v5160_v23  ;;  %v4621_v33 = vadd.f32 %v9741_v22, %v4195_v62  ;;  %v10127_v14 = vld [vmem:[#allocation14_spill] sm:$0xff] }
 0x373   : > { %v5523_v40 = vpop.f32.mrf.mxu1  ;;  %v7497_v47 = vpop.f32.mrf.mxu0  ;;  %v4198_v23 = vadd.f32 %v9763_v2, %v9723_v61 }
 0x374   : > { %v5954_v49 = vadd.f32 %v5938_v26, %v5915_v42  ;;  %v5936_v15 = vadd.f32 %v9842_v34, %v5881_v46  ;;  %v5884_v21 = vadd.f32 %v7493_v45, %v5586_v52  ;;  %v5584_v28 = vadd.f32 %v5523_v40, %v5158_v35 }
 0x375   : > { %v4200_v45 = vadd.f32 %v9761_v7, %v9719_v32  ;;  %v4919_v13 = vadd.f32 %v9793_v36, %v4621_v33  ;;  %v7464_v55 = vpop.f32.mrf.mxu1  ;;  %v5837_v59 = vpop.f32.mrf.mxu0  ;;  %v5164_v32 = vadd.f32 %v9783_v10, %v4921_v56  ;;  %v5917_v26 = vunpack.c.l.bf16 %v10127_v14  ;;  %v10130_v33 = vld [vmem:[#allocation16_spill] sm:$0xff]  ;;  %v10137_v14 = vld [vmem:[#allocation35_spill] sm:$0xff] }
 0x376   : > { %v5970_v29 = vmax.f32 %v5954_v49, 0.0  ;;  %v5952_v60 = vadd.f32 %v5936_v15, %v5913_v27  ;;  %v5939_v6 = vadd.f32 %v9842_v34, %v5884_v21  ;;  %v5882_v43 = vadd.f32 %v5821_v19, %v5584_v28  ;;  %v10126_v19 = vld [vmem:[#allocation17_spill] sm:$0xff]  ;;  %v10129_v21 = vld [vmem:[#allocation15_spill] sm:$0xff] }
 0x377   : > { %v5589_v54 = vadd.f32 %v7464_v55, %v5163_v31  ;;  %v5919_v62 = vunpack.c.l.bf16 %v10126_v19  ;;  %v5536_v48 = vpop.f32.mrf.mxu1  ;;  %v4626_v27 = vadd.f32 %v9747_v20, %v4200_v45  ;;  %v7500_v61 = vpop.f32.mrf.mxu0  ;;  %v5162_v2 = vadd.f32 %v9785_v39, %v4919_v13  ;;  %v10128_v20 = vld [vmem:[#allocation18_spill] sm:$0xff] }
 0x378   : > { %5986 = vst [vmem:[%s9254_s2 + $0x10] sm:$0xff] %v5970_v29  ;;  %v5968_v22 = vmax.f32 %v5952_v60, 0.0  ;;  %v5955_v42 = vadd.f32 %v5939_v6, %v5916_v11  ;;  %v5937_v58 = vadd.f32 %v9842_v34, %v5882_v43  ;;  %v5587_v30 = vadd.f32 %v5536_v48, %v5161_v50  ;;  %v10132_v43 = vld [vmem:[#allocation33_spill] sm:$0xff]  ;;  %v10133_v13 = vld [vmem:[#allocation38_spill] sm:$0xff] }
 0x379   : > { %v5887_v12 = vadd.f32 %v7496_v37, %v5589_v54  ;;  %v7465_v46 = vpop.f32.mrf.mxu1  ;;  %v4199_v37 = vadd.f32 %v9767_v4, %v9731_v0  ;;  %v4924_v18 = vadd.f32 %v9797_v8, %v4626_v27  ;;  %v4624_v5 = vadd.f32 %v9751_v63, %v4198_v23  ;;  %v5850_v4 = vpop.f32.mrf.mxu0 }
 0x37a   : > { %5984 = vst [vmem:[%s9254_s2] sm:$0xff] %v5968_v22  ;;  %v5971_v7 = vmax.f32 %v5955_v42, 0.0  ;;  %v5953_v36 = vadd.f32 %v5937_v58, %v5914_v38  ;;  %v5885_v35 = vadd.f32 %v5834_v41, %v5587_v30  ;;  %v5590_v9 = vadd.f32 %v7465_v46, %v5164_v32  ;;  %v10131_v38 = vld [vmem:[#allocation32_spill] sm:$0xff]  ;;  %v10134_v42 = vld [vmem:[#allocation23_spill] sm:$0xff] }
 0x37b   : > { %v5942_v10 = vadd.f32 %v9842_v34, %v5887_v12  ;;  %v5920_v53 = vunpack.c.l.bf16 %v10128_v20  ;;  %v5539_v57 = vpop.f32.mrf.mxu1  ;;  %v4922_v41 = vadd.f32 %v9801_v17, %v4624_v5  ;;  %v4627_v15 = vadd.f32 %v9755_v25, %v4201_v16  ;;  %v7501_v6 = vpop.f32.mrf.mxu0  ;;  %v10136_v32 = vld [vmem:[#allocation20_spill] sm:$0xff]  ;;  %v10138_v46 = vld [vmem:[#allocation19_spill] sm:$0xff]  ;;  %v10141_v20 = vld [vmem:[#allocation22_spill] sm:$0xff] }
 0x37c   : > { %5987 = vst [vmem:[%s9254_s2 + $0x18] sm:$0xff] %v5971_v7  ;;  %v5969_v52 = vmax.f32 %v5953_v36, 0.0  ;;  %v5940_v39 = vadd.f32 %v9842_v34, %v5885_v35  ;;  %v5888_v40 = vadd.f32 %v7497_v47, %v5590_v9  ;;  %v5588_v49 = vadd.f32 %v5539_v57, %v5162_v2  ;;  %v10139_v2 = vld [vmem:[#allocation40_spill] sm:$0xff] }
 0x37d   : > { %v5958_v11 = vadd.f32 %v5942_v10, %v5919_v62  ;;  %v5918_v0 = vunpack.c.l.bf16 %v10129_v21  ;;  %v4625_v24 = vadd.f32 %v10130_v33, %v4199_v37  ;;  %v5167_v31 = vadd.f32 %v10131_v38, %v4924_v18  ;;  %v7468_v60 = vpop.f32.mrf.mxu1  ;;  %v10135_v62 = vld [vmem:[#allocation34_spill] sm:$0xff]  ;;  %v5853_v36 = vpop.f32.mrf.mxu0  ;;  %v10140_v10 = vld [vmem:[#allocation24_spill] sm:$0xff] }
 0x37e   : > { %5985 = vst [vmem:[%s9254_s2 + $0x8] sm:$0xff] %v5969_v52  ;;  %v5956_v63 = vadd.f32 %v5940_v39, %v5917_v26  ;;  %v5943_v28 = vadd.f32 %v9842_v34, %v5888_v40  ;;  %v5886_v56 = vadd.f32 %v5837_v59, %v5588_v49  ;;  %v4925_v47 = vadd.f32 %v9805_v1, %v4627_v15  ;;  %v10143_v21 = vld [vmem:[#allocation36_spill] sm:$0xff] }
 0x37f   : > { %v5974_v8 = vmax.f32 %v5958_v11, 0.0  ;;  %v5165_v45 = vadd.f32 %v10132_v43, %v4922_v41  ;;  %v4923_v55 = vadd.f32 %v10133_v13, %v4625_v24  ;;  %v5593_v22 = vadd.f32 %v7468_v60, %v5167_v31  ;;  %v5552_v54 = vpop.f32.mrf.mxu1  ;;  %v7504_v57 = vpop.f32.mrf.mxu0  ;;  %v10142_v11 = vld [vmem:[#allocation21_spill] sm:$0xff]  ;;  %v10146_v31 = vld [vmem:[#allocation31_spill] sm:$0xff]  ;;  %v10147_v60 = vld [vmem:[#allocation28_spill] sm:$0xff] }
 0x380   : > { %v5972_v17 = vmax.f32 %v5956_v63, 0.0  ;;  %v5959_v29 = vadd.f32 %v5943_v28, %v5920_v53  ;;  %v5941_v25 = vadd.f32 %v9842_v34, %v5886_v56  ;;  %v5923_v58 = vunpack.c.l.bf16 %v10134_v42  ;;  %v10145_v24 = vld [vmem:[#allocation37_spill] sm:$0xff] }
 0x381   : > { %5990 = vst [vmem:[%s9254_s2 + $0x30] sm:$0xff] %v5974_v8  ;;  %v5891_v23 = vadd.f32 %v7500_v61, %v5593_v22  ;;  %v5591_v19 = vadd.f32 %v5552_v54, %v5165_v45  ;;  %v5168_v48 = vadd.f32 %v10135_v62, %v4925_v47  ;;  %v5921_v7 = vunpack.c.l.bf16 %v10136_v32  ;;  %v7469_v12 = vpop.f32.mrf.mxu1  ;;  %v5866_v56 = vpop.f32.mrf.mxu0  ;;  %v10149_v22 = vld [vmem:[#allocation25_spill] sm:$0xff] }
 0x382   : > { %5988 = vst [vmem:[%s9254_s2 + $0x20] sm:$0xff] %v5972_v17  ;;  %v5975_v50 = vmax.f32 %v5959_v29, 0.0  ;;  %v5957_v59 = vadd.f32 %v5941_v25, %v5918_v0  ;;  %v5166_v26 = vadd.f32 %v10137_v14, %v4923_v55  ;;  %v4928_v52 = vadd.f32 %v10139_v2, %v10138_v46  ;;  %v10148_v55 = vld [vmem:[#allocation39_spill] sm:$0xff]  ;;  %v10151_v62 = vld [vmem:[#allocation29_spill] sm:$0xff] }
 0x383   : > { %v5946_v30 = vadd.f32 %v9842_v34, %v5891_v23  ;;  %v5889_v16 = vadd.f32 %v5850_v4, %v5591_v19  ;;  %v5594_v27 = vadd.f32 %v7469_v12, %v5168_v48  ;;  %v5924_v61 = vunpack.c.l.bf16 %v10140_v10  ;;  %v5555_v35 = vpop.f32.mrf.mxu1  ;;  %v10144_v4 = vld [vmem:[#allocation30_spill] sm:$0xff]  ;;  %v10150_v23 = vld [vmem:[#allocation9_spill] sm:$0xff] }
 0x384   : > { %5991 = vst [vmem:[%s9254_s2 + $0x38] sm:$0xff] %v5975_v50  ;;  %v5973_v1 = vmax.f32 %v5957_v59, 0.0  ;;  %v5592_v5 = vadd.f32 %v5555_v35, %v5166_v26  ;;  %v4926_v53 = vadd.f32 %v9821_v44, %v10141_v20  ;;  %v5922_v39 = vunpack.c.l.bf16 %v10142_v11  ;;  %v7505_v59 = vpop.f32.mrf.mxu0 }
 0x385   : > { %v5962_v9 = vadd.f32 %v5946_v30, %v5923_v58  ;;  %v5944_v37 = vadd.f32 %v9842_v34, %v5889_v16  ;;  %v5892_v18 = vadd.f32 %v7501_v6, %v5594_v27  ;;  %v5171_v0 = vadd.f32 %v10143_v21, %v4928_v52  ;;  %v7472_v33 = vpop.f32.mrf.mxu1  ;;  %v10152_v27 = vld [vmem:[#allocation26_spill] sm:$0xff] }
 0x386   : > { %5989 = vst [vmem:[%s9254_s2 + $0x28] sm:$0xff] %v5973_v1  ;;  %v5890_v15 = vadd.f32 %v5853_v36, %v5592_v5  ;;  %v4929_v8 = vadd.f32 %v9826_v3, %v10144_v4  ;;  %v5169_v38 = vadd.f32 %v10145_v24, %v4926_v53  ;;  %v4927_v47 = vadd.f32 %v9831_v51, %v10146_v31  ;;  %v5869_v16 = vpop.f32.mrf.mxu0 }
 0x387   : > { %v5978_v40 = vmax.f32 %v5962_v9, 0.0  ;;  %v5960_v49 = vadd.f32 %v5944_v37, %v5921_v7  ;;  %v5947_v41 = vadd.f32 %v9842_v34, %v5892_v18  ;;  %v5597_v25 = vadd.f32 %v7472_v33, %v5171_v0  ;;  %v5568_v6 = vpop.f32.mrf.mxu1 }
 0x388   : > { %v5945_v44 = vadd.f32 %v9842_v34, %v5890_v15  ;;  %v5927_v3 = vunpack.c.l.bf16 %v10147_v60  ;;  %v5595_v13 = vadd.f32 %v5568_v6, %v5169_v38  ;;  %v5172_v50 = vadd.f32 %v10148_v55, %v4929_v8 }
 0x389   : > { %5994 = vst [vmem:[%s9254_s2 + $0x50] sm:$0xff] %v5978_v40  ;;  %v5976_v63 = vmax.f32 %v5960_v49, 0.0  ;;  %v5963_v28 = vadd.f32 %v5947_v41, %v5924_v61  ;;  %v5895_v45 = vadd.f32 %v7504_v57, %v5597_v25  ;;  %v5925_v42 = vunpack.c.l.bf16 %v10149_v22  ;;  %v7473_v58 = vpop.f32.mrf.mxu1 }
 0x38a   : > { %v5961_v29 = vadd.f32 %v5945_v44, %v5922_v39  ;;  %v5893_v54 = vadd.f32 %v5866_v56, %v5595_v13  ;;  %v5598_v1 = vadd.f32 %v7473_v58, %v5172_v50  ;;  %v5170_v19 = vadd.f32 %v10150_v23, %v4927_v47 }
 0x38b   : > { %5992 = vst [vmem:[%s9254_s2 + $0x40] sm:$0xff] %v5976_v63  ;;  %v5979_v17 = vmax.f32 %v5963_v28, 0.0  ;;  %v5950_v51 = vadd.f32 %v9842_v34, %v5895_v45  ;;  %v5928_v48 = vunpack.c.l.bf16 %v10151_v62  ;;  %v5571_v32 = vpop.f32.mrf.mxu1  ;;  %v5926_v14 = vunpack.c.l.bf16 %v10152_v27 }
 0x38c   : > { %v5977_v43 = vmax.f32 %v5961_v29, 0.0  ;;  %v5948_v36 = vadd.f32 %v9842_v34, %v5893_v54  ;;  %v5896_v12 = vadd.f32 %v7505_v59, %v5598_v1  ;;  %v5596_v30 = vadd.f32 %v5571_v32, %v5170_v19 }
 0x38d   : > { %5995 = vst [vmem:[%s9254_s2 + $0x58] sm:$0xff] %v5979_v17  ;;  %v5966_v7 = vadd.f32 %v5950_v51, %v5927_v3 }
 0x38e   : > { %5993 = vst [vmem:[%s9254_s2 + $0x48] sm:$0xff] %v5977_v43  ;;  %v5964_v46 = vadd.f32 %v5948_v36, %v5925_v42  ;;  %v5951_v2 = vadd.f32 %v9842_v34, %v5896_v12  ;;  %v5894_v52 = vadd.f32 %v5869_v16, %v5596_v30 }
 0x38f   : > { %v5982_v26 = vmax.f32 %v5966_v7, 0.0 }
 0x390   : > { %v5980_v10 = vmax.f32 %v5964_v46, 0.0  ;;  %v5967_v61 = vadd.f32 %v5951_v2, %v5928_v48  ;;  %v5949_v35 = vadd.f32 %v9842_v34, %v5894_v52 }
 0x391   : > { %5998 = vst [vmem:[%s9254_s2 + $0x70] sm:$0xff] %v5982_v26 }
 0x392   : > { %5996 = vst [vmem:[%s9254_s2 + $0x60] sm:$0xff] %v5980_v10  ;;  %v5983_v9 = vmax.f32 %v5967_v61, 0.0  ;;  %v5965_v37 = vadd.f32 %v5949_v35, %v5926_v14 }
 0x394   : > { %5999 = vst [vmem:[%s9254_s2 + $0x78] sm:$0xff] %v5983_v9  ;;  %v5981_v18 = vmax.f32 %v5965_v37, 0.0 }
 0x396   : > { %5997 = vst [vmem:[%s9254_s2 + $0x68] sm:$0xff] %v5981_v18 }
 0x397   : > { %7814 = shalt.err (!%p7811_p7)
}
 0x398   : > { %s7815_s2 = scalar_lea.hbm %s9940_s12, 2048  ;;  %s7819_s15 = scalar_lea.hbm %s10004_s5, 8192 }
 0x399   : > { %p7816_p9 = scmp.ne.s32.totalorder %s9940_s12, %s7815_s2  ;;  %p7820_p10 = scmp.lt.s32.totalorder %s9940_s12, %s10004_s5 }
 0x39a   : > { %p7821_p12 = scmp.lt.s32.totalorder %s7819_s15, %s7815_s2 }
 0x39b   : > { %p7817_p11 = pnand %p7816_p9, %p7989_p3 }
 0x39c   : > { %p7822_p0 = por %p7821_p12, %p7820_p10 }
 0x39d   : > { %p7818_p13 = pneg %p7817_p11 }
 0x39f   : > { %p7823_p1 = pnand %p7822_p0, %p7818_p13 }
 0x3a1   : > { %7826 = shalt.err (!%p7823_p1)
}
 0x3a2   : > { %s7905_s17 = smov 128   ;;  %s7906_s27 = smov 8  }
 0x3a3   : > { %7511 = dma.vmem_to_hbm [thread:$0]  (%p7989_p3), %s9942_s22, 2048, %s9940_s12, %s9948_s30, %s7905_s17, %s7905_s17, %s7906_s27  }
 0x3a4 PF: > { %p7523_p2 = scmp.ge.s32.totalorder %s7897_s25, 2  ;;  %s6032_s9 = sand.u32 1, %s7869_s18  }
 0x3a5   : > { %s6033_s16 = scalar_lea.sflag [#allocation5], %s6032_s9 }
 0x3a6   : > { %p7518_p4 = pnand %p7523_p2, %p7998_p8 }
 0x3a8   : > { %p7519_p5 = pneg %p7518_p4 }
 0x3aa   : > { %7864 = dma.done.wait (%p7519_p5), %s6033_s16, 2048  }
 0x3ab   : > { %7866 = vsyncadd (%p7519_p5), %s6033_s16, 4294965248  ;;  %s19_s25 = sadd.s32 1, %s7897_s25   ;;  %s10154_s18 = smov %s7873_s19 }
 0x3ac   : > { %p16_p6 = scmp.ge.s32.totalorder %s19_s25, 6   ;;  %s10155_s19 = smov %s7877_s20 }
 0x3ad   : > { %s10156_s20 = smov %s8016_s13  ;;  %s10157_s21 = smov %s7889_s23 }
 0x3ae   : > { %s10158_s22 = smov %s7893_s24  ;;  %s10159_s23 = smov %s10162_s28 }
 0x3af   : > { %s10160_s24 = smov %s10166_s29  ;;  %18 = sbr.rel (!%p16_p6) target bundleno = 8 (0x8), region = 108 }
 0x3b4   :  { %6038 = vsyncpa [#allocation4], 1 }
 0x3b5   :  { %6040 = vsyncpa [#allocation4 + $0x1], 1 }
 0x3b6   :  { %6041 = vsyncpa [#allocation5], 1 }
 0x3b7   :  { %6043 = vsyncpa [#allocation5 + $0x1], 1 }

</bundles_post_ra>
